<compile_context>
chip_gen: v7x
topology: tpu7x:2x2x1
jax: 0.10.0
libtpu: 0.0.40
codegen_flags: <defaults>
</compile_context>

<pallas_src>
import functools

import jax
import jax.numpy as jnp
from jax.experimental import pallas as pl
from jax.experimental.pallas import tpu as pltpu

_LANE = 128   # TPU lane width: channel dims are zero-padded to a multiple.
_WPAD = 8     # left/right pad on the W (sublane) axis so interior stores into
              # the halo buffer start at a sublane-aligned offset.


def _round_up(x, m):
    return (x + m - 1) // m * m


def _double_conv_kernel(x_ref, w1_ref, b1_ref, w2_ref, b2_ref,
                        o_ref, xp_ref, slab_ref, *, H, W, Cin, CK1, CO):
    """Fused [conv3x3(pad=1) + folded BN + ReLU] x 2 for one batch element.

    x_ref    : (1, H, W, Cin)            unpadded NHWC input tile
    w1_ref   : (9*CK1, CO)               conv1 weights (BN scale folded in),
                                         3x3 taps flattened, Cin padded->CK1
    w2_ref   : (9*CO, CO)                conv2 weights (BN scale folded in),
                                         Cout padded->CO on both sides
    b*_ref   : (1, CO)                   folded BatchNorm shift (+conv bias)
    o_ref    : (1, H, W, CO)             lane-dense output (padded chans = 0)
    xp_ref   : (H+2, W+2*_WPAD, CKmax)   VMEM halo buffer, shared by stages
    slab_ref : (H, W, 9*CKmax)           VMEM im2col slab, shared by stages
    """

    def conv_bn_relu(w_ref, b_ref, ck):
        # im2col: 9 shape-matched, lane-tile-aligned VMEM copies, then a
        # single MXU matmul with K = 9*ck (f32 accumulation).
        for t in range(9):                                   # static unroll
            di, dj = t // 3, t % 3
            c0 = _WPAD - 1 + dj
            slab_ref[:, :, t * ck:(t + 1) * ck] = \
                xp_ref[di:di + H, c0:c0 + W, :ck]
        acc = jnp.dot(slab_ref[:, :, :9 * ck].reshape(H * W, 9 * ck),
                      w_ref[...], preferred_element_type=jnp.float32)
        # BN scale is folded into w; add the folded shift and ReLU.
        return jnp.maximum(acc + b_ref[0], 0.0)

    # ---- stage 1: conv1 + BN + ReLU --------------------------------------
    # Zero the halo buffer every grid step (scratch is uninitialised and,
    # under megacore batch sharding, per-core).  Only the border ring is ever
    # *needed* as zeros, but the contiguous full fill is a single unmasked
    # store stream and stays off the critical (MXU) path.
    xp_ref[...] = jnp.zeros_like(xp_ref)
    xp_ref[1:H + 1, _WPAD:_WPAD + W, :Cin] = x_ref[0].astype(xp_ref.dtype)
    y1 = conv_bn_relu(w1_ref, b1_ref, CK1)                   # (H*W, CO) f32

    # ---- stage 2: conv2 + BN + ReLU (conv1 result stays in VMEM) ---------
    # Interior channels beyond the ones written below keep stale data, but
    # the matching weight rows are zero, so they contribute nothing.
    xp_ref[1:H + 1, _WPAD:_WPAD + W, :CO] = \
        y1.reshape(H, W, CO).astype(xp_ref.dtype)
    y2 = conv_bn_relu(w2_ref, b2_ref, CO)                    # (H*W, CO) f32

    o_ref[0] = y2.reshape(H, W, CO).astype(o_ref.dtype)


def _fold_and_pad_params(params, Cin):
    """Fold BN scale into weights, flatten 3x3 taps, pad channels to 128."""
    w1, w2 = params["w1"], params["w2"]       # (3,3,Cin,Cout), (3,3,Cout,Cout)
    Cout = w1.shape[-1]
    CK1 = _round_up(Cin, _LANE)               # stage-1 contraction channel pad
    CO = _round_up(Cout, _LANE)               # lane-dense output / stage-2 pad

    def pad_w(w, ck_in, scale):
        ci, co = w.shape[2], w.shape[3]
        wf = w.astype(jnp.float32) * scale.astype(jnp.float32)[None, None,
                                                               None, :]
        wp = jnp.pad(wf, ((0, 0), (0, 0), (0, ck_in - ci), (0, CO - co)))
        return wp.reshape(9 * ck_in, CO)      # row index = (3*di + dj)*ck + c

    def pad_v(v):
        return jnp.pad(v.astype(jnp.float32),
                       (0, CO - v.shape[0])).reshape(1, CO)

    return (pad_w(w1, CK1, params["scale1"]), pad_v(params["shift1"]),
            pad_w(w2, CO, params["scale2"]), pad_v(params["shift2"]),
            Cout, CK1, CO)


def double_conv_nhwc(x_nhwc, params):
    """Fused DoubleConv on NHWC input (single pallas_call, preferred layout)."""
    N, H, W, Cin = x_nhwc.shape
    (w1_k, b1, w2_k, b2, Cout, CK1, CO) = _fold_and_pad_params(params, Cin)
    CKmax = max(CK1, CO)
    kernel = functools.partial(_double_conv_kernel,
                               H=H, W=W, Cin=Cin, CK1=CK1, CO=CO)
    out = pl.pallas_call(
        kernel,
        out_shape=jax.ShapeDtypeStruct((N, H, W, CO), x_nhwc.dtype),
        grid_spec=pltpu.PrefetchScalarGridSpec(
            num_scalar_prefetch=0,
            grid=(N,),
            in_specs=[
                pl.BlockSpec((1, H, W, Cin), lambda n: (n, 0, 0, 0)),
                pl.BlockSpec((9 * CK1, CO), lambda n: (0, 0)),
                pl.BlockSpec((1, CO), lambda n: (0, 0)),
                pl.BlockSpec((9 * CO, CO), lambda n: (0, 0)),
                pl.BlockSpec((1, CO), lambda n: (0, 0)),
            ],
            out_specs=pl.BlockSpec((1, H, W, CO), lambda n: (n, 0, 0, 0)),
            scratch_shapes=[
                pltpu.VMEM((H + 2, W + 2 * _WPAD, CKmax), jnp.float32),
                pltpu.VMEM((H, W, 9 * CKmax), jnp.float32),
            ],
        ),
        compiler_params=pltpu.CompilerParams(
            dimension_semantics=("parallel",),
            vmem_limit_bytes=32 * 1024 * 1024,
        ),
    )(x_nhwc, w1_k, b1, w2_k, b2)
    return out[..., :Cout]                    # drop lane padding


def double_conv(x_nchw, params):
    """PyTorch-convention forward: NCHW in / NCHW out (one transpose pair)."""
    x = jnp.transpose(x_nchw, (0, 2, 3, 1))            # NCHW -> NHWC
    y = double_conv_nhwc(x, params)
    return jnp.transpose(y, (0, 3, 1, 2))              # NHWC -> NCHW


def init_double_conv_params(key, in_ch, out_ch, eps=1e-5):
    """Deterministic parameter init (conv weights + folded inference BN)."""
    k1, k2, k3, k4 = jax.random.split(key, 4)
    w1 = jax.random.normal(k1, (3, 3, in_ch, out_ch), jnp.float32)
    w1 = w1 * (1.0 / jnp.sqrt(9.0 * in_ch))
    b1 = jax.random.normal(k2, (out_ch,), jnp.float32) * 0.01
    w2 = jax.random.normal(k3, (3, 3, out_ch, out_ch), jnp.float32)
    w2 = w2 * (1.0 / jnp.sqrt(9.0 * out_ch))
    b2 = jax.random.normal(k4, (out_ch,), jnp.float32) * 0.01
    # BatchNorm (inference): gamma=1, beta=0, running_mean=0, running_var=1
    gamma = jnp.ones((out_ch,), jnp.float32)
    beta = jnp.zeros((out_ch,), jnp.float32)
    mean = jnp.zeros((out_ch,), jnp.float32)
    var = jnp.ones((out_ch,), jnp.float32)
    s = gamma / jnp.sqrt(var + eps)
    scale1, shift1 = s, beta + (b1 - mean) * s
    scale2, shift2 = s, beta + (b2 - mean) * s
    return dict(w1=w1, scale1=scale1, shift1=shift1,
                w2=w2, scale2=scale2, shift2=shift2)


def _reference_double_conv(x_nchw, params):
    """Pure-JAX reference (lax.conv) for validation."""
    def one(x_nhwc, w, scale, shift):
        y = jax.lax.conv_general_dilated(
            x_nhwc, w, window_strides=(1, 1), padding="SAME",
            dimension_numbers=("NHWC", "HWIO", "NHWC"))
        y = y * scale[None, None, None, :] + shift[None, None, None, :]
        return jnp.maximum(y, 0.0)
    x = jnp.transpose(x_nchw, (0, 2, 3, 1))
    y = one(x, params["w1"], params["scale1"], params["shift1"])
    y = one(y, params["w2"], params["scale2"], params["shift2"])
    return jnp.transpose(y, (0, 3, 1, 2))


if __name__ == "__main__":
    key = jax.random.PRNGKey(0)
    kx, kp = jax.random.split(key)

    N, Cin, Cout, H, W = 2, 4, 8, 16, 16
    x = jax.random.normal(kx, (N, Cin, H, W), jnp.float32)   # NCHW like torch
    params = init_double_conv_params(kp, Cin, Cout)

    out = jax.block_until_ready(double_conv(x, params))
    assert out.shape == (N, Cout, H, W), out.shape

    ref = jax.block_until_ready(_reference_double_conv(x, params))
    max_err = float(jnp.max(jnp.abs(out - ref)))
    assert jnp.allclose(out, ref, rtol=1e-4, atol=1e-4), max_err

    print("KERNEL_OK")
</pallas_src>

<mosaic_0001>
module attributes {stable_mosaic.version = 11 : i64} {
  func.func @_double_conv_kernel(%arg0: i32, %arg1: memref<1x16x16x4xf32, #tpu.memory_space<vmem>>, %arg2: memref<1152x128xf32, #tpu.memory_space<vmem>>, %arg3: memref<1x128xf32, #tpu.memory_space<vmem>>, %arg4: memref<1152x128xf32, #tpu.memory_space<vmem>>, %arg5: memref<1x128xf32, #tpu.memory_space<vmem>>, %arg6: memref<1x16x16x128xf32, #tpu.memory_space<vmem>>, %arg7: memref<18x32x128xf32, #tpu.memory_space<vmem>>, %arg8: memref<16x16x1152xf32, #tpu.memory_space<vmem>>) attributes {dimension_semantics = [#tpu.dimension_semantics<parallel>], iteration_bounds = array<i64: 2>, scalar_prefetch = 0 : i64, scratch_operands = 2 : i64, tpu.core_type = #tpu.core_type<tc>, window_params = [{transform_indices = @transform_0, window_bounds = array<i64: 1, 16, 16, 4>}, {pipeline_mode = #tpu.pipeline_mode<synchronous>, transform_indices = @transform_1, window_bounds = array<i64: 1152, 128>}, {pipeline_mode = #tpu.pipeline_mode<synchronous>, transform_indices = @transform_2, window_bounds = array<i64: 1, 128>}, {pipeline_mode = #tpu.pipeline_mode<synchronous>, transform_indices = @transform_3, window_bounds = array<i64: 1152, 128>}, {pipeline_mode = #tpu.pipeline_mode<synchronous>, transform_indices = @transform_4, window_bounds = array<i64: 1, 128>}, {transform_indices = @transform_5, window_bounds = array<i64: 1, 16, 16, 128>}]} {
    %cst = arith.constant 0.000000e+00 : f32
    %0 = vector.broadcast %cst : f32 to vector<18x32x128xf32>
    %c0 = arith.constant 0 : index
    %c0_0 = arith.constant 0 : index
    %c0_1 = arith.constant 0 : index
    %1 = vector.load %arg7[%c0, %c0_0, %c0_1] : memref<18x32x128xf32, #tpu.memory_space<vmem>>, vector<18x32x128xf32>
    tpu.vector_store %arg7[%c0, %c0_0, %c0_1], %0 {strides = array<i32>} : memref<18x32x128xf32, #tpu.memory_space<vmem>>, vector<18x32x128xf32>,
    %c0_2 = arith.constant 0 : index
    %c0_3 = arith.constant 0 : index
    %c0_4 = arith.constant 0 : index
    %c0_5 = arith.constant 0 : index
    %2 = vector.load %arg1[%c0_2, %c0_3, %c0_4, %c0_5] : memref<1x16x16x4xf32, #tpu.memory_space<vmem>>, vector<1x16x16x4xf32>
    %3 = vector.shape_cast %2 : vector<1x16x16x4xf32> to vector<16x16x4xf32>
    %c1 = arith.constant 1 : index
    %c8 = arith.constant 8 : index
    %c0_6 = arith.constant 0 : index
    %4 = vector.load %arg7[%c1, %c8, %c0_6] : memref<18x32x128xf32, #tpu.memory_space<vmem>>, vector<16x16x4xf32>
    tpu.vector_store %arg7[%c1, %c8, %c0_6], %3 {strides = array<i32>} : memref<18x32x128xf32, #tpu.memory_space<vmem>>, vector<16x16x4xf32>,
    %c0_7 = arith.constant 0 : index
    %c7 = arith.constant 7 : index
    %c0_8 = arith.constant 0 : index
    %5 = vector.load %arg7[%c0_7, %c7, %c0_8] : memref<18x32x128xf32, #tpu.memory_space<vmem>>, vector<16x16x128xf32>
    %c0_9 = arith.constant 0 : index
    %c0_10 = arith.constant 0 : index
    %c0_11 = arith.constant 0 : index
    %6 = vector.load %arg8[%c0_9, %c0_10, %c0_11] : memref<16x16x1152xf32, #tpu.memory_space<vmem>>, vector<16x16x128xf32>
    tpu.vector_store %arg8[%c0_9, %c0_10, %c0_11], %5 {strides = array<i32>} : memref<16x16x1152xf32, #tpu.memory_space<vmem>>, vector<16x16x128xf32>,
    %c0_12 = arith.constant 0 : index
    %c8_13 = arith.constant 8 : index
    %c0_14 = arith.constant 0 : index
    %7 = vector.load %arg7[%c0_12, %c8_13, %c0_14] : memref<18x32x128xf32, #tpu.memory_space<vmem>>, vector<16x16x128xf32>
    %c0_15 = arith.constant 0 : index
    %c0_16 = arith.constant 0 : index
    %c128 = arith.constant 128 : index
    %8 = vector.load %arg8[%c0_15, %c0_16, %c128] : memref<16x16x1152xf32, #tpu.memory_space<vmem>>, vector<16x16x128xf32>
    tpu.vector_store %arg8[%c0_15, %c0_16, %c128], %7 {strides = array<i32>} : memref<16x16x1152xf32, #tpu.memory_space<vmem>>, vector<16x16x128xf32>,
    %c0_17 = arith.constant 0 : index
    %c9 = arith.constant 9 : index
    %c0_18 = arith.constant 0 : index
    %9 = vector.load %arg7[%c0_17, %c9, %c0_18] : memref<18x32x128xf32, #tpu.memory_space<vmem>>, vector<16x16x128xf32>
    %c0_19 = arith.constant 0 : index
    %c0_20 = arith.constant 0 : index
    %c256 = arith.constant 256 : index
    %10 = vector.load %arg8[%c0_19, %c0_20, %c256] : memref<16x16x1152xf32, #tpu.memory_space<vmem>>, vector<16x16x128xf32>
    tpu.vector_store %arg8[%c0_19, %c0_20, %c256], %9 {strides = array<i32>} : memref<16x16x1152xf32, #tpu.memory_space<vmem>>, vector<16x16x128xf32>,
    %c1_21 = arith.constant 1 : index
    %c7_22 = arith.constant 7 : index
    %c0_23 = arith.constant 0 : index
    %11 = vector.load %arg7[%c1_21, %c7_22, %c0_23] : memref<18x32x128xf32, #tpu.memory_space<vmem>>, vector<16x16x128xf32>
    %c0_24 = arith.constant 0 : index
    %c0_25 = arith.constant 0 : index
    %c384 = arith.constant 384 : index
    %12 = vector.load %arg8[%c0_24, %c0_25, %c384] : memref<16x16x1152xf32, #tpu.memory_space<vmem>>, vector<16x16x128xf32>
    tpu.vector_store %arg8[%c0_24, %c0_25, %c384], %11 {strides = array<i32>} : memref<16x16x1152xf32, #tpu.memory_space<vmem>>, vector<16x16x128xf32>,
    %c1_26 = arith.constant 1 : index
    %c8_27 = arith.constant 8 : index
    %c0_28 = arith.constant 0 : index
    %13 = vector.load %arg7[%c1_26, %c8_27, %c0_28] : memref<18x32x128xf32, #tpu.memory_space<vmem>>, vector<16x16x128xf32>
    %c0_29 = arith.constant 0 : index
    %c0_30 = arith.constant 0 : index
    %c512 = arith.constant 512 : index
    %14 = vector.load %arg8[%c0_29, %c0_30, %c512] : memref<16x16x1152xf32, #tpu.memory_space<vmem>>, vector<16x16x128xf32>
    tpu.vector_store %arg8[%c0_29, %c0_30, %c512], %13 {strides = array<i32>} : memref<16x16x1152xf32, #tpu.memory_space<vmem>>, vector<16x16x128xf32>,
    %c1_31 = arith.constant 1 : index
    %c9_32 = arith.constant 9 : index
    %c0_33 = arith.constant 0 : index
    %15 = vector.load %arg7[%c1_31, %c9_32, %c0_33] : memref<18x32x128xf32, #tpu.memory_space<vmem>>, vector<16x16x128xf32>
    %c0_34 = arith.constant 0 : index
    %c0_35 = arith.constant 0 : index
    %c640 = arith.constant 640 : index
    %16 = vector.load %arg8[%c0_34, %c0_35, %c640] : memref<16x16x1152xf32, #tpu.memory_space<vmem>>, vector<16x16x128xf32>
    tpu.vector_store %arg8[%c0_34, %c0_35, %c640], %15 {strides = array<i32>} : memref<16x16x1152xf32, #tpu.memory_space<vmem>>, vector<16x16x128xf32>,
    %c2 = arith.constant 2 : index
    %c7_36 = arith.constant 7 : index
    %c0_37 = arith.constant 0 : index
    %17 = vector.load %arg7[%c2, %c7_36, %c0_37] : memref<18x32x128xf32, #tpu.memory_space<vmem>>, vector<16x16x128xf32>
    %c0_38 = arith.constant 0 : index
    %c0_39 = arith.constant 0 : index
    %c768 = arith.constant 768 : index
    %18 = vector.load %arg8[%c0_38, %c0_39, %c768] : memref<16x16x1152xf32, #tpu.memory_space<vmem>>, vector<16x16x128xf32>
    tpu.vector_store %arg8[%c0_38, %c0_39, %c768], %17 {strides = array<i32>} : memref<16x16x1152xf32, #tpu.memory_space<vmem>>, vector<16x16x128xf32>,
    %c2_40 = arith.constant 2 : index
    %c8_41 = arith.constant 8 : index
    %c0_42 = arith.constant 0 : index
    %19 = vector.load %arg7[%c2_40, %c8_41, %c0_42] : memref<18x32x128xf32, #tpu.memory_space<vmem>>, vector<16x16x128xf32>
    %c0_43 = arith.constant 0 : index
    %c0_44 = arith.constant 0 : index
    %c896 = arith.constant 896 : index
    %20 = vector.load %arg8[%c0_43, %c0_44, %c896] : memref<16x16x1152xf32, #tpu.memory_space<vmem>>, vector<16x16x128xf32>
    tpu.vector_store %arg8[%c0_43, %c0_44, %c896], %19 {strides = array<i32>} : memref<16x16x1152xf32, #tpu.memory_space<vmem>>, vector<16x16x128xf32>,
    %c2_45 = arith.constant 2 : index
    %c9_46 = arith.constant 9 : index
    %c0_47 = arith.constant 0 : index
    %21 = vector.load %arg7[%c2_45, %c9_46, %c0_47] : memref<18x32x128xf32, #tpu.memory_space<vmem>>, vector<16x16x128xf32>
    %c0_48 = arith.constant 0 : index
    %c0_49 = arith.constant 0 : index
    %c1024 = arith.constant 1024 : index
    %22 = vector.load %arg8[%c0_48, %c0_49, %c1024] : memref<16x16x1152xf32, #tpu.memory_space<vmem>>, vector<16x16x128xf32>
    tpu.vector_store %arg8[%c0_48, %c0_49, %c1024], %21 {strides = array<i32>} : memref<16x16x1152xf32, #tpu.memory_space<vmem>>, vector<16x16x128xf32>,
    %c0_50 = arith.constant 0 : index
    %c0_51 = arith.constant 0 : index
    %c0_52 = arith.constant 0 : index
    %23 = vector.load %arg8[%c0_50, %c0_51, %c0_52] : memref<16x16x1152xf32, #tpu.memory_space<vmem>>, vector<16x16x1152xf32>
    %24 = vector.shape_cast %23 : vector<16x16x1152xf32> to vector<256x1152xf32>
    %c0_53 = arith.constant 0 : index
    %c0_54 = arith.constant 0 : index
    %25 = vector.load %arg2[%c0_53, %c0_54] : memref<1152x128xf32, #tpu.memory_space<vmem>>, vector<1152x128xf32>
    %cst_55 = arith.constant dense<0.000000e+00> : vector<256x128xf32>
    %26 = tpu.matmul %24, %25, %cst_55 {dimension_numbers = #tpu.dot_dimension_numbers<[1], [0], [0], [1], [0, 0, 1, 1], [], []>} : vector<256x1152xf32>, vector<1152x128xf32>, vector<256x128xf32> -> vector<256x128xf32>
    %c0_56 = arith.constant 0 : index
    %c0_57 = arith.constant 0 : index
    %27 = vector.load %arg3[%c0_56, %c0_57] : memref<1x128xf32, #tpu.memory_space<vmem>>, vector<1x128xf32>
    %28 = vector.shape_cast %27 : vector<1x128xf32> to vector<128xf32>
    %29 = vector.shape_cast %28 : vector<128xf32> to vector<1x128xf32>
    %30 = vector.broadcast %29 : vector<1x128xf32> to vector<256x128xf32>
    %31 = arith.addf %26, %30 : vector<256x128xf32>
    %cst_58 = arith.constant 0.000000e+00 : f32
    %32 = vector.broadcast %cst_58 : f32 to vector<256x128xf32>
    %33 = arith.maximumf %31, %32 : vector<256x128xf32>
    %34 = vector.shape_cast %33 : vector<256x128xf32> to vector<16x16x128xf32>
    %c1_59 = arith.constant 1 : index
    %c8_60 = arith.constant 8 : index
    %c0_61 = arith.constant 0 : index
    %35 = vector.load %arg7[%c1_59, %c8_60, %c0_61] : memref<18x32x128xf32, #tpu.memory_space<vmem>>, vector<16x16x128xf32>
    tpu.vector_store %arg7[%c1_59, %c8_60, %c0_61], %34 {strides = array<i32>} : memref<18x32x128xf32, #tpu.memory_space<vmem>>, vector<16x16x128xf32>,
    %c0_62 = arith.constant 0 : index
    %c7_63 = arith.constant 7 : index
    %c0_64 = arith.constant 0 : index
    %36 = vector.load %arg7[%c0_62, %c7_63, %c0_64] : memref<18x32x128xf32, #tpu.memory_space<vmem>>, vector<16x16x128xf32>
    %c0_65 = arith.constant 0 : index
    %c0_66 = arith.constant 0 : index
    %c0_67 = arith.constant 0 : index
    %37 = vector.load %arg8[%c0_65, %c0_66, %c0_67] : memref<16x16x1152xf32, #tpu.memory_space<vmem>>, vector<16x16x128xf32>
    tpu.vector_store %arg8[%c0_65, %c0_66, %c0_67], %36 {strides = array<i32>} : memref<16x16x1152xf32, #tpu.memory_space<vmem>>, vector<16x16x128xf32>,
    %c0_68 = arith.constant 0 : index
    %c8_69 = arith.constant 8 : index
    %c0_70 = arith.constant 0 : index
    %38 = vector.load %arg7[%c0_68, %c8_69, %c0_70] : memref<18x32x128xf32, #tpu.memory_space<vmem>>, vector<16x16x128xf32>
    %c0_71 = arith.constant 0 : index
    %c0_72 = arith.constant 0 : index
    %c128_73 = arith.constant 128 : index
    %39 = vector.load %arg8[%c0_71, %c0_72, %c128_73] : memref<16x16x1152xf32, #tpu.memory_space<vmem>>, vector<16x16x128xf32>
    tpu.vector_store %arg8[%c0_71, %c0_72, %c128_73], %38 {strides = array<i32>} : memref<16x16x1152xf32, #tpu.memory_space<vmem>>, vector<16x16x128xf32>,
    %c0_74 = arith.constant 0 : index
    %c9_75 = arith.constant 9 : index
    %c0_76 = arith.constant 0 : index
    %40 = vector.load %arg7[%c0_74, %c9_75, %c0_76] : memref<18x32x128xf32, #tpu.memory_space<vmem>>, vector<16x16x128xf32>
    %c0_77 = arith.constant 0 : index
    %c0_78 = arith.constant 0 : index
    %c256_79 = arith.constant 256 : index
    %41 = vector.load %arg8[%c0_77, %c0_78, %c256_79] : memref<16x16x1152xf32, #tpu.memory_space<vmem>>, vector<16x16x128xf32>
    tpu.vector_store %arg8[%c0_77, %c0_78, %c256_79], %40 {strides = array<i32>} : memref<16x16x1152xf32, #tpu.memory_space<vmem>>, vector<16x16x128xf32>,
    %c1_80 = arith.constant 1 : index
    %c7_81 = arith.constant 7 : index
    %c0_82 = arith.constant 0 : index
    %42 = vector.load %arg7[%c1_80, %c7_81, %c0_82] : memref<18x32x128xf32, #tpu.memory_space<vmem>>, vector<16x16x128xf32>
    %c0_83 = arith.constant 0 : index
    %c0_84 = arith.constant 0 : index
    %c384_85 = arith.constant 384 : index
    %43 = vector.load %arg8[%c0_83, %c0_84, %c384_85] : memref<16x16x1152xf32, #tpu.memory_space<vmem>>, vector<16x16x128xf32>
    tpu.vector_store %arg8[%c0_83, %c0_84, %c384_85], %42 {strides = array<i32>} : memref<16x16x1152xf32, #tpu.memory_space<vmem>>, vector<16x16x128xf32>,
    %c1_86 = arith.constant 1 : index
    %c8_87 = arith.constant 8 : index
    %c0_88 = arith.constant 0 : index
    %44 = vector.load %arg7[%c1_86, %c8_87, %c0_88] : memref<18x32x128xf32, #tpu.memory_space<vmem>>, vector<16x16x128xf32>
    %c0_89 = arith.constant 0 : index
    %c0_90 = arith.constant 0 : index
    %c512_91 = arith.constant 512 : index
    %45 = vector.load %arg8[%c0_89, %c0_90, %c512_91] : memref<16x16x1152xf32, #tpu.memory_space<vmem>>, vector<16x16x128xf32>
    tpu.vector_store %arg8[%c0_89, %c0_90, %c512_91], %44 {strides = array<i32>} : memref<16x16x1152xf32, #tpu.memory_space<vmem>>, vector<16x16x128xf32>,
    %c1_92 = arith.constant 1 : index
    %c9_93 = arith.constant 9 : index
    %c0_94 = arith.constant 0 : index
    %46 = vector.load %arg7[%c1_92, %c9_93, %c0_94] : memref<18x32x128xf32, #tpu.memory_space<vmem>>, vector<16x16x128xf32>
    %c0_95 = arith.constant 0 : index
    %c0_96 = arith.constant 0 : index
    %c640_97 = arith.constant 640 : index
    %47 = vector.load %arg8[%c0_95, %c0_96, %c640_97] : memref<16x16x1152xf32, #tpu.memory_space<vmem>>, vector<16x16x128xf32>
    tpu.vector_store %arg8[%c0_95, %c0_96, %c640_97], %46 {strides = array<i32>} : memref<16x16x1152xf32, #tpu.memory_space<vmem>>, vector<16x16x128xf32>,
    %c2_98 = arith.constant 2 : index
    %c7_99 = arith.constant 7 : index
    %c0_100 = arith.constant 0 : index
    %48 = vector.load %arg7[%c2_98, %c7_99, %c0_100] : memref<18x32x128xf32, #tpu.memory_space<vmem>>, vector<16x16x128xf32>
    %c0_101 = arith.constant 0 : index
    %c0_102 = arith.constant 0 : index
    %c768_103 = arith.constant 768 : index
    %49 = vector.load %arg8[%c0_101, %c0_102, %c768_103] : memref<16x16x1152xf32, #tpu.memory_space<vmem>>, vector<16x16x128xf32>
    tpu.vector_store %arg8[%c0_101, %c0_102, %c768_103], %48 {strides = array<i32>} : memref<16x16x1152xf32, #tpu.memory_space<vmem>>, vector<16x16x128xf32>,
    %c2_104 = arith.constant 2 : index
    %c8_105 = arith.constant 8 : index
    %c0_106 = arith.constant 0 : index
    %50 = vector.load %arg7[%c2_104, %c8_105, %c0_106] : memref<18x32x128xf32, #tpu.memory_space<vmem>>, vector<16x16x128xf32>
    %c0_107 = arith.constant 0 : index
    %c0_108 = arith.constant 0 : index
    %c896_109 = arith.constant 896 : index
    %51 = vector.load %arg8[%c0_107, %c0_108, %c896_109] : memref<16x16x1152xf32, #tpu.memory_space<vmem>>, vector<16x16x128xf32>
    tpu.vector_store %arg8[%c0_107, %c0_108, %c896_109], %50 {strides = array<i32>} : memref<16x16x1152xf32, #tpu.memory_space<vmem>>, vector<16x16x128xf32>,
    %c2_110 = arith.constant 2 : index
    %c9_111 = arith.constant 9 : index
    %c0_112 = arith.constant 0 : index
    %52 = vector.load %arg7[%c2_110, %c9_111, %c0_112] : memref<18x32x128xf32, #tpu.memory_space<vmem>>, vector<16x16x128xf32>
    %c0_113 = arith.constant 0 : index
    %c0_114 = arith.constant 0 : index
    %c1024_115 = arith.constant 1024 : index
    %53 = vector.load %arg8[%c0_113, %c0_114, %c1024_115] : memref<16x16x1152xf32, #tpu.memory_space<vmem>>, vector<16x16x128xf32>
    tpu.vector_store %arg8[%c0_113, %c0_114, %c1024_115], %52 {strides = array<i32>} : memref<16x16x1152xf32, #tpu.memory_space<vmem>>, vector<16x16x128xf32>,
    %c0_116 = arith.constant 0 : index
    %c0_117 = arith.constant 0 : index
    %c0_118 = arith.constant 0 : index
    %54 = vector.load %arg8[%c0_116, %c0_117, %c0_118] : memref<16x16x1152xf32, #tpu.memory_space<vmem>>, vector<16x16x1152xf32>
    %55 = vector.shape_cast %54 : vector<16x16x1152xf32> to vector<256x1152xf32>
    %c0_119 = arith.constant 0 : index
    %c0_120 = arith.constant 0 : index
    %56 = vector.load %arg4[%c0_119, %c0_120] : memref<1152x128xf32, #tpu.memory_space<vmem>>, vector<1152x128xf32>
    %cst_121 = arith.constant dense<0.000000e+00> : vector<256x128xf32>
    %57 = tpu.matmul %55, %56, %cst_121 {dimension_numbers = #tpu.dot_dimension_numbers<[1], [0], [0], [1], [0, 0, 1, 1], [], []>} : vector<256x1152xf32>, vector<1152x128xf32>, vector<256x128xf32> -> vector<256x128xf32>
    %c0_122 = arith.constant 0 : index
    %c0_123 = arith.constant 0 : index
    %58 = vector.load %arg5[%c0_122, %c0_123] : memref<1x128xf32, #tpu.memory_space<vmem>>, vector<1x128xf32>
    %59 = vector.shape_cast %58 : vector<1x128xf32> to vector<128xf32>
    %60 = vector.shape_cast %59 : vector<128xf32> to vector<1x128xf32>
    %61 = vector.broadcast %60 : vector<1x128xf32> to vector<256x128xf32>
    %62 = arith.addf %57, %61 : vector<256x128xf32>
    %cst_124 = arith.constant 0.000000e+00 : f32
    %63 = vector.broadcast %cst_124 : f32 to vector<256x128xf32>
    %64 = arith.maximumf %62, %63 : vector<256x128xf32>
    %65 = vector.shape_cast %64 : vector<256x128xf32> to vector<16x16x128xf32>
    %c0_125 = arith.constant 0 : index
    %c0_126 = arith.constant 0 : index
    %c0_127 = arith.constant 0 : index
    %c0_128 = arith.constant 0 : index
    %66 = vector.load %arg6[%c0_125, %c0_126, %c0_127, %c0_128] : memref<1x16x16x128xf32, #tpu.memory_space<vmem>>, vector<1x16x16x128xf32>
    %67 = vector.shape_cast %66 : vector<1x16x16x128xf32> to vector<16x16x128xf32>
    %68 = vector.shape_cast %65 : vector<16x16x128xf32> to vector<1x16x16x128xf32>
    tpu.vector_store %arg6[%c0_125, %c0_126, %c0_127, %c0_128], %68 {strides = array<i32>} : memref<1x16x16x128xf32, #tpu.memory_space<vmem>>, vector<1x16x16x128xf32>,
    return
  }
  func.func @transform_0(%arg0: i32) -> (i32, i32, i32, i32) {
    %c0_i32 = arith.constant 0 : i32
    %c0_i32_0 = arith.constant 0 : i32
    %c0_i32_1 = arith.constant 0 : i32
    %c0_i32_2 = arith.constant 0 : i32
    return %arg0, %c0_i32, %c0_i32_0, %c0_i32_1 : i32, i32, i32, i32
  }
  func.func @transform_1(%arg0: i32) -> (i32, i32) {
    %c0_i32 = arith.constant 0 : i32
    %c0_i32_0 = arith.constant 0 : i32
    %c0_i32_1 = arith.constant 0 : i32
    return %c0_i32, %c0_i32_0 : i32, i32
  }
  func.func @transform_2(%arg0: i32) -> (i32, i32) {
    %c0_i32 = arith.constant 0 : i32
    %c0_i32_0 = arith.constant 0 : i32
    %c0_i32_1 = arith.constant 0 : i32
    return %c0_i32, %c0_i32_0 : i32, i32
  }
  func.func @transform_3(%arg0: i32) -> (i32, i32) {
    %c0_i32 = arith.constant 0 : i32
    %c0_i32_0 = arith.constant 0 : i32
    %c0_i32_1 = arith.constant 0 : i32
    return %c0_i32, %c0_i32_0 : i32, i32
  }
  func.func @transform_4(%arg0: i32) -> (i32, i32) {
    %c0_i32 = arith.constant 0 : i32
    %c0_i32_0 = arith.constant 0 : i32
    %c0_i32_1 = arith.constant 0 : i32
    return %c0_i32, %c0_i32_0 : i32, i32
  }
  func.func @transform_5(%arg0: i32) -> (i32, i32, i32, i32) {
    %c0_i32 = arith.constant 0 : i32
    %c0_i32_0 = arith.constant 0 : i32
    %c0_i32_1 = arith.constant 0 : i32
    %c0_i32_2 = arith.constant 0 : i32
    return %arg0, %c0_i32, %c0_i32_0, %c0_i32_1 : i32, i32, i32, i32
  }
}

</mosaic_0001>

<bundles_post_ra>
// kernel: tpu_custom_call.1
= control target key start
LH: loop header
LB: loop body
LE: loop exit
PB: predicated region body
PF: predicated region fallthrough
CT: control target
= control target key end

     0   :  { %10 = vsyncpa [#allocation5], 0  ;;  %s7905_s0 = inlined_call_operand.vmem [shape: f32[2,16,16,4], index: 0, kind: input, shape index: {}]   ;;  %s7906_s1 = inlined_call_operand.hbm [shape: f32[1152,128], index: 1, kind: input, shape index: {}]   ;;  %s7907_s2 = inlined_call_operand.vmem [shape: f32[1,128], index: 2, kind: input, shape index: {}]   ;;  %s7908_s3 = inlined_call_operand.hbm [shape: f32[1152,128], index: 3, kind: input, shape index: {}]   ;;  %s7909_s4 = inlined_call_operand.vmem [shape: f32[1,128], index: 4, kind: input, shape index: {}]   ;;  %s7910_s5 = inlined_call_operand.hbm [shape: f32[2,16,16,128], index: 5, kind: output, shape index: {}]  }
   0x1   :  { %11 = vsyncpa [#allocation8], 0 }
   0x2   :  { %12 = vsyncpa [#allocation6], 0 }
   0x3   :  { %14 = vsyncpa [#allocation6 + $0x1], 0  ;;  %s6321_s18 = smov 0   ;;  %s6323_s19 = smov 0  }
   0x4   :  { %s6325_s20 = smov 0   ;;  %s6327_s21 = smov 0  }
   0x5 LB: > { %s6342_s22 = sadd.s32 4294967295, %s6280_s21   ;;  %s4898_s23 = sadd.s32 4294967294, %s6280_s21   ;;  %s6280_s21 = sphi %s6327_s21, %s8027_s21   ;;  %s6276_s20 = sphi %s6325_s20, %s8026_s20   ;;  %s6272_s19 = sphi %s6323_s19, %s8025_s19   ;;  %s6268_s18 = sphi %s6321_s18, %s8024_s18  }
   0x6   : > { %s6346_s24 = sadd.s32 1, %s6280_s21   ;;  %s137_s25 = sadd.s32 1, %s6276_s20 }
   0x7   : > { %s134_s26 = ssub.s32 %s6280_s21, %s6346_s24  ;;  %p147_p0 = scmp.ne.s32.totalorder %s6276_s20, %s6272_s19 }
   0x8   : > { %p135_p1 = scmp.eq.s32.totalorder %s134_s26, 0  ;;  %p148_p2 = scmp.eq.s32.totalorder %s6342_s22, 1 }
   0x9   : > { %p153_p3 = scmp.ne.s32.totalorder %s6272_s19, %s6268_s18  ;;  %p154_p4 = scmp.eq.s32.totalorder %s4898_s23, 1 }
   0xa   : > { %s6357_s27 = scalar_select %p135_p1, %s6276_s20, %s137_s25  }
   0xb   : > { %p6359_p5 = por %p148_p2, %p147_p0  ;;  %p6363_p6 = por %p154_p4, %p153_p3 }
   0xc   : > { %p4899_p7 = scmp.ge.s32.totalorder %s6280_s21, 1  ;;  %p161_p8 = scmp.lt.s32.totalorder %s6280_s21, 3 }
   0xd   : > { %s7956_s28 = scalar_select %p6359_p5, 1, 0 }
   0xe   : > { %s7957_s29 = scalar_select %p6363_p6, 1, 0 }
   0xf   : > { %p7911_p9 = scmp.eq.s32.totalorder %s6342_s22, 0  ;;  %p6370_p10 = pnand %p4899_p7, %p161_p8 }
  0x10   : > { %s6282_s6 = smov [#allocation4]   ;;  %s6283_s9 = smov [#allocation7]  }
  0x11   : > { %s7958_s30 = scalar_select %p6370_p10, 1, 0 }
  0x12   : > { %s173_s7 = sshll.u32 %s6282_s6, 4  ;;  %p6096_p11 = pneg %p6370_p10  ;;  %s174_s7 = int_to_ptr.vmem [resolvable:$true] %s173_s7 }
  0x13   : > { %s189_s10 = sshll.u32 %s6283_s9, 4  ;;  %s6154_s13 = scalar_lea.hbm %s7906_s1, 18432  ;;  %s6382_s10 = int_to_ptr.vmem [resolvable:$true] %s189_s10 }
  0x14   : > { %p6378_p12 = pnand %p7911_p9, %p6096_p11  ;;  %p6155_p13 = scmp.ne.s32.totalorder %s7906_s1, %s6154_s13 }
  0x15   : > { %p6161_p3 = scmp.lt.u32.totalorder %s6154_s13, %s7906_s1 }
  0x16   : > { %p6156_p0 = pneg %p6378_p12 }
  0x18   : > { %p6157_p1 = pnand %p6156_p0, %p6155_p13 }
  0x1a   : > { %p6158_p2 = pneg %p6157_p1 }
  0x1c   : > { %p6163_p4 = pnand %p6161_p3, %p6158_p2 }
  0x1e   : > { %6166 = shalt.err (!%p6163_p4)
}
  0x1f   : > { %s6167_s23 = scalar_lea.vmem %s174_s7, 18432  ;;  %p6175_p9 = scmp.lt.s32.totalorder %s174_s7, %s174_s7 }
  0x20   : > { %p6168_p7 = scmp.ne.s32.totalorder %s174_s7, %s6167_s23  ;;  %p6176_p6 = scmp.lt.s32.totalorder %s6167_s23, %s6167_s23 }
  0x22   : > { %p6170_p8 = pnand %p6168_p7, %p6156_p0  ;;  %p6177_p5 = por %p6176_p6, %p6175_p9 }
  0x24   : > { %p6171_p11 = pneg %p6170_p8 }
  0x26   : > { %p6178_p10 = pnand %p6177_p5, %p6171_p11 }
  0x28   : > { %6181 = shalt.err (!%p6178_p10)
}
  0x29   : > { %s6284_s25 = smov 128   ;;  %s6285_s26 = smov 8  }
  0x2a   : > { %6099 = dma.hbm_to_vmem [thread:$0]  (!%p6378_p12), %s7906_s1, 18432, %s174_s7, [#allocation5], %s6284_s25, %s6284_s25, %s6285_s26  }
  0x2b   : > { %s6182_s13 = scalar_lea.hbm %s7908_s3, 18432 }
  0x2c   : > { %p6183_p13 = scmp.ne.s32.totalorder %s7908_s3, %s6182_s13  ;;  %p6189_p9 = scmp.lt.u32.totalorder %s6182_s13, %s7908_s3 }
  0x2e   : > { %p6185_p5 = pnand %p6183_p13, %p6156_p0 }
  0x30   : > { %p6186_p6 = pneg %p6185_p5 }
  0x32   : > { %p6191_p10 = pnand %p6189_p9, %p6186_p6 }
  0x34   : > { %6194 = shalt.err (!%p6191_p10)
}
  0x35   : > { %s6195_s7 = scalar_lea.vmem %s6382_s10, 18432  ;;  %p6203_p4 = scmp.lt.s32.totalorder %s6382_s10, %s6382_s10 }
  0x36   : > { %p6196_p1 = scmp.ne.s32.totalorder %s6382_s10, %s6195_s7  ;;  %p6204_p7 = scmp.lt.s32.totalorder %s6195_s7, %s6195_s7 }
  0x38   : > { %p6198_p2 = pnand %p6196_p1, %p6156_p0  ;;  %p6205_p8 = por %p6204_p7, %p6203_p4 }
  0x3a   : > { %p6199_p3 = pneg %p6198_p2 }
  0x3c   : > { %p6206_p11 = pnand %p6205_p8, %p6199_p3 }
  0x3e   : > { %6209 = shalt.err (!%p6206_p11)
}
  0x3f   : > { %6102 = dma.hbm_to_vmem [thread:$0]  (!%p6378_p12), %s7908_s3, 18432, %s6382_s10, [#allocation8], %s6284_s25, %s6284_s25, %s6285_s26  }
  0x40   : > { %p7960_p13 = scmp.ne.s32.totalorder %s7958_s30, 0 }
  0x42   : > { %216 = sbr.rel (%p7960_p13) target bundleno = 1507 (0x5e3), region = 40 }
  0x49   : > { %p7961_p5 = scmp.eq.s32.totalorder %s6342_s22, 0 }
  0x4b   : > { %6255 = dma.done.wait (%p7961_p5), [#allocation5], 18432   ;;  %p7962_p0 = pmov %p7961_p5 }
  0x4d   : > { %6257 = vsyncadd (%p7962_p0), [#allocation5], 4294948864  ;;  %p7963_p6 = pmov %p7962_p0 }
  0x4e   : > { %p7964_p9 = pmov %p7962_p0 }
  0x4f   : > { %6259 = dma.done.wait (%p7963_p6), [#allocation8], 18432  }
  0x50   : > { %6261 = vsyncadd (%p7964_p9), [#allocation8], 4294948864  ;;  %v7914_v0 = vmov 0.0|0.0   ;;  %v6287_v1 = vmov 0.0   ;;  %p248_p12 = scmp.lt.s32.totalorder %s6342_s22, 1  ;;  %v1256_v2 = vld [vmem:[#allocation4] sm:$0xff] }
  0x51   : > { %5174 = vmatprep.subr.bf16.mxu0 %v7914_v0  ;;  %254 = vst [vmem:[#allocation2 + $0x8] sm:$0xff] %v6287_v1  ;;  %1471 = vmatprep.mubr.f32.mxu0 %v6287_v1  ;;  %253 = vst [vmem:[#allocation2] sm:$0xff] %v6287_v1  ;;  %v1257_v3 = vld [vmem:[#allocation4 + $0x8] sm:$0xff]  ;;  %v1258_v4 = vld [vmem:[#allocation4 + $0x10] sm:$0xff]  ;;  %vm358_vm0 = vcmask 31744   ;;  %s245_s12 = sand.u32 1, %s6272_s19  }
  0x52   : > { %255 = vst [vmem:[#allocation2 + $0x10] sm:$0xff] %v6287_v1  ;;  %256 = vst [vmem:[#allocation2 + $0x18] sm:$0xff] %v6287_v1  ;;  %v5175_v5 = vpack.c.bf16 %v1257_v3, %v1256_v2  ;;  %v1259_v6 = vld [vmem:[#allocation4 + $0x18] sm:$0xff]  ;;  %s249_s30 = scalar_select %p248_p12, %s6342_s22, 1  ;;  %v1260_v8 = vld [vmem:[#allocation4 + $0x20] sm:$0xff] }
  0x53   : > { %257 = vst [vmem:[#allocation2 + $0x20] sm:$0xff] %v6287_v1  ;;  %258 = vst [vmem:[#allocation2 + $0x28] sm:$0xff] %v6287_v1  ;;  %v5178_v7 = vpack.c.bf16 %v1259_v6, %v1258_v4  ;;  %v1261_v9 = vld [vmem:[#allocation4 + $0x28] sm:$0xff]  ;;  %v1262_v11 = vld [vmem:[#allocation4 + $0x30] sm:$0xff]  ;;  %s4906_s15 = sshll.u32 %s245_s12, 8  ;;  %s4917_s17 = sshll.u32 %s6342_s22, 12 }
  0x54   : > { %259 = vst [vmem:[#allocation2 + $0x30] sm:$0xff] %v6287_v1  ;;  %260 = vst [vmem:[#allocation2 + $0x38] sm:$0xff] %v6287_v1  ;;  %5176 = vmatpush1.bf16.msra.mxu0 %v5175_v5  ;;  %s4916_s8 = sshll.u32 %s249_s30, 8  ;;  %v5181_v10 = vpack.c.bf16 %v1261_v9, %v1260_v8  ;;  %v1263_v12 = vld [vmem:[#allocation4 + $0x38] sm:$0xff]  ;;  %v1264_v14 = vld [vmem:[#allocation4 + $0x40] sm:$0xff]  ;;  %s7766_s16 = scalar_lea.vmem [#allocation9], %s4906_s15 }
  0x55   : > { %261 = vst [vmem:[#allocation2 + $0x40] sm:$0xff] %v6287_v1  ;;  %262 = vst [vmem:[#allocation2 + $0x48] sm:$0xff] %v6287_v1  ;;  %5177 = vmatprep.subr.bf16.mxu0 %v7914_v0  ;;  %s6522_s26 = scalar_lea.vmem %s7905_s0, %s4916_s8  ;;  %v5184_v13 = vpack.c.bf16 %v1263_v12, %v1262_v11  ;;  %v1265_v15 = vld [vmem:[#allocation4 + $0x48] sm:$0xff]  ;;  %v1266_v23 = vld [vmem:[#allocation4 + $0x50] sm:$0xff]  ;;  %s4814_s7 = sshll.u32 %s7766_s16, 4  ;;  %s7858_s7 = int_to_ptr.vmem [resolvable:$true] %s4814_s7 }
  0x56   : > { %263 = vst [vmem:[#allocation2 + $0x50] sm:$0xff] %v6287_v1  ;;  %264 = vst [vmem:[#allocation2 + $0x58] sm:$0xff] %v6287_v1  ;;  %v325_v16 = vld [vmem:[%s6522_s26] sm:$0xff]  ;;  %v326_v17 = vld [vmem:[%s6522_s26 + $0x8] sm:$0xff]  ;;  %v5187_v21 = vpack.c.bf16 %v1265_v15, %v1264_v14  ;;  %s7856_s30 = scalar_lea.hbm %s7910_s5, %s4917_s17  ;;  %s7864_s22 = scalar_lea.sflag [#allocation6], %s245_s12 }
  0x57   : > { %265 = vst [vmem:[#allocation2 + $0x60] sm:$0xff] %v6287_v1  ;;  %266 = vst [vmem:[#allocation2 + $0x68] sm:$0xff] %v6287_v1  ;;  %v327_v18 = vld [vmem:[%s6522_s26 + $0x10] sm:$0xff]  ;;  %v328_v19 = vld [vmem:[%s6522_s26 + $0x18] sm:$0xff]  ;;  %s6210_s8 = scalar_lea.vmem %s7858_s7, 4096  ;;  %p8022_p1 = scmp.ne.s32.totalorder %s7956_s28, 0 }
  0x58   : > { %267 = vst [vmem:[#allocation2 + $0x70] sm:$0xff] %v6287_v1  ;;  %268 = vst [vmem:[#allocation2 + $0x78] sm:$0xff] %v6287_v1  ;;  %5179 = vmatpush1.bf16.msra.mxu0 %v5178_v7  ;;  %v329_v20 = vld [vmem:[%s6522_s26 + $0x20] sm:$0xff]  ;;  %v330_v22 = vld [vmem:[%s6522_s26 + $0x28] sm:$0xff]  ;;  %p6211_p10 = scmp.ne.s32.totalorder %s7858_s7, %s6210_s8  ;;  %s6288_s10 = smov [#allocation9]  }
  0x59   : > { %269 = vst [vmem:[#allocation2 + $0x80] sm:$0xff] %v6287_v1  ;;  %270 = vst [vmem:[#allocation2 + $0x88] sm:$0xff] %v6287_v1  ;;  %5180 = vmatprep.subr.bf16.mxu0 %v7914_v0  ;;  %v1267_v24 = vld [vmem:[#allocation4 + $0x58] sm:$0xff]  ;;  %v331_v25 = vld [vmem:[%s6522_s26 + $0x30] sm:$0xff]  ;;  %s6214_s25 = sshll.u32 %s6288_s10, 4  ;;  %s6215_s25 = int_to_ptr.vmem [resolvable:$false] %s6214_s25 }
  0x5a   : > { %271 = vst [vmem:[#allocation2 + $0x90] sm:$0xff] %v6287_v1  ;;  %272 = vst [vmem:[#allocation2 + $0x98] sm:$0xff] %v6287_v1  ;;  %v332_v26 = vld [vmem:[%s6522_s26 + $0x38] sm:$0xff]  ;;  %v333_v27 = vld [vmem:[%s6522_s26 + $0x40] sm:$0xff]  ;;  %v5190_v30 = vpack.c.bf16 %v1267_v24, %v1266_v23  ;;  %p6212_p2 = pnand %p6211_p10, %p8022_p1  ;;  %p6217_p4 = scmp.lt.s32.totalorder %s7858_s7, %s6215_s25 }
  0x5b   : > { %273 = vst [vmem:[#allocation2 + $0xa0] sm:$0xff] %v6287_v1  ;;  %274 = vst [vmem:[#allocation2 + $0xa8] sm:$0xff] %v6287_v1  ;;  %v334_v28 = vld [vmem:[%s6522_s26 + $0x48] sm:$0xff]  ;;  %v335_v29 = vld [vmem:[%s6522_s26 + $0x50] sm:$0xff] }
  0x5c   : > { %275 = vst [vmem:[#allocation2 + $0xb0] sm:$0xff] %v6287_v1  ;;  %276 = vst [vmem:[#allocation2 + $0xb8] sm:$0xff] %v6287_v1  ;;  %5182 = vmatpush1.bf16.msra.mxu0 %v5181_v10  ;;  %v336_v31 = vld [vmem:[%s6522_s26 + $0x58] sm:$0xff]  ;;  %v1268_v32 = vld [vmem:[#allocation4 + $0x60] sm:$0xff]  ;;  %p6213_p3 = pneg %p6212_p2 }
  0x5d   : > { %277 = vst [vmem:[#allocation2 + $0xc0] sm:$0xff] %v6287_v1  ;;  %278 = vst [vmem:[#allocation2 + $0xc8] sm:$0xff] %v6287_v1  ;;  %5183 = vmatprep.subr.bf16.mxu0 %v7914_v0  ;;  %v1269_v33 = vld [vmem:[#allocation4 + $0x68] sm:$0xff]  ;;  %v337_v34 = vld [vmem:[%s6522_s26 + $0x60] sm:$0xff] }
  0x5e   : > { %279 = vst [vmem:[#allocation2 + $0xd0] sm:$0xff] %v6287_v1  ;;  %280 = vst [vmem:[#allocation2 + $0xd8] sm:$0xff] %v6287_v1  ;;  %v5193_v35 = vpack.c.bf16 %v1269_v33, %v1268_v32  ;;  %v1270_v36 = vld [vmem:[#allocation4 + $0x70] sm:$0xff]  ;;  %v1271_v37 = vld [vmem:[#allocation4 + $0x78] sm:$0xff] }
  0x5f   : > { %281 = vst [vmem:[#allocation2 + $0xe0] sm:$0xff] %v6287_v1  ;;  %282 = vst [vmem:[#allocation2 + $0xe8] sm:$0xff] %v6287_v1  ;;  %v5196_v38 = vpack.c.bf16 %v1271_v37, %v1270_v36  ;;  %v1272_v39 = vld [vmem:[#allocation4 + $0x80] sm:$0xff]  ;;  %v1273_v40 = vld [vmem:[#allocation4 + $0x88] sm:$0xff] }
  0x60   : > { %283 = vst [vmem:[#allocation2 + $0xf0] sm:$0xff] %v6287_v1  ;;  %284 = vst [vmem:[#allocation2 + $0xf8] sm:$0xff] %v6287_v1  ;;  %5185 = vmatpush1.bf16.msra.mxu0 %v5184_v13  ;;  %v338_v41 = vld [vmem:[%s6522_s26 + $0x68] sm:$0xff]  ;;  %v339_v42 = vld [vmem:[%s6522_s26 + $0x70] sm:$0xff]  ;;  %v5199_v43 = vpack.c.bf16 %v1273_v40, %v1272_v39 }
  0x61   : > { %285 = vst [vmem:[#allocation2 + $0x100] sm:$0xff] %v6287_v1  ;;  %286 = vst [vmem:[#allocation2 + $0x108] sm:$0xff] %v6287_v1  ;;  %5186 = vmatprep.subr.bf16.mxu0 %v7914_v0  ;;  %v1274_v44 = vld [vmem:[#allocation4 + $0x90] sm:$0xff]  ;;  %v340_v45 = vld [vmem:[%s6522_s26 + $0x78] sm:$0xff] }
  0x62   : > { %287 = vst [vmem:[#allocation2 + $0x110] sm:$0xff] %v6287_v1  ;;  %288 = vst [vmem:[#allocation2 + $0x118] sm:$0xff] %v6287_v1  ;;  %v341_v46 = vld [vmem:[%s6522_s26 + $0x80] sm:$0xff]  ;;  %v1275_v47 = vld [vmem:[#allocation4 + $0x98] sm:$0xff] }
  0x63   : > { %289 = vst [vmem:[#allocation2 + $0x120] sm:$0xff] %v6287_v1  ;;  %290 = vst [vmem:[#allocation2 + $0x128] sm:$0xff] %v6287_v1  ;;  %v342_v48 = vld [vmem:[%s6522_s26 + $0x88] sm:$0xff]  ;;  %v343_v49 = vld [vmem:[%s6522_s26 + $0x90] sm:$0xff]  ;;  %v5202_v52 = vpack.c.bf16 %v1275_v47, %v1274_v44 }
  0x64   : > { %291 = vst [vmem:[#allocation2 + $0x130] sm:$0xff] %v6287_v1  ;;  %292 = vst [vmem:[#allocation2 + $0x138] sm:$0xff] %v6287_v1  ;;  %5188 = vmatpush1.bf16.msra.mxu0 %v5187_v21  ;;  %v344_v50 = vld [vmem:[%s6522_s26 + $0x98] sm:$0xff]  ;;  %v345_v51 = vld [vmem:[%s6522_s26 + $0xa0] sm:$0xff] }
  0x65   : > { %293 = vst [vmem:[#allocation2 + $0x140] sm:$0xff] %v6287_v1  ;;  %294 = vst [vmem:[#allocation2 + $0x148] sm:$0xff] %v6287_v1  ;;  %5189 = vmatprep.subr.bf16.mxu0 %v7914_v0  ;;  %v1276_v53 = vld [vmem:[#allocation4 + $0xa0] sm:$0xff]  ;;  %v346_v54 = vld [vmem:[%s6522_s26 + $0xa8] sm:$0xff] }
  0x66   : > { %295 = vst [vmem:[#allocation2 + $0x150] sm:$0xff] %v6287_v1  ;;  %296 = vst [vmem:[#allocation2 + $0x158] sm:$0xff] %v6287_v1  ;;  %v347_v55 = vld [vmem:[%s6522_s26 + $0xb0] sm:$0xff]  ;;  %v1277_v56 = vld [vmem:[#allocation4 + $0xa8] sm:$0xff] }
  0x67   : > { %297 = vst [vmem:[#allocation2 + $0x160] sm:$0xff] %v6287_v1  ;;  %298 = vst [vmem:[#allocation2 + $0x168] sm:$0xff] %v6287_v1  ;;  %v348_v57 = vld [vmem:[%s6522_s26 + $0xb8] sm:$0xff]  ;;  %v349_v58 = vld [vmem:[%s6522_s26 + $0xc0] sm:$0xff]  ;;  %v5205_v60 = vpack.c.bf16 %v1277_v56, %v1276_v53 }
  0x68   : > { %299 = vst [vmem:[#allocation2 + $0x170] sm:$0xff] %v6287_v1  ;;  %300 = vst [vmem:[#allocation2 + $0x178] sm:$0xff] %v6287_v1  ;;  %5191 = vmatpush1.bf16.msra.mxu0 %v5190_v30  ;;  %v350_v59 = vld [vmem:[%s6522_s26 + $0xc8] sm:$0xff]  ;;  %v1278_v61 = vld [vmem:[#allocation4 + $0xb0] sm:$0xff] }
  0x69   : > { %301 = vst [vmem:[#allocation2 + $0x180] sm:$0xff] %v6287_v1  ;;  %302 = vst [vmem:[#allocation2 + $0x188] sm:$0xff] %v6287_v1  ;;  %5192 = vmatprep.subr.bf16.mxu0 %v7914_v0  ;;  %v1279_v62 = vld [vmem:[#allocation4 + $0xb8] sm:$0xff]  ;;  %v1280_v2 = vld [vmem:[#allocation4 + $0xc0] sm:$0xff] }
  0x6a   : > { %303 = vst [vmem:[#allocation2 + $0x190] sm:$0xff] %v6287_v1  ;;  %304 = vst [vmem:[#allocation2 + $0x198] sm:$0xff] %v6287_v1  ;;  %v5208_v63 = vpack.c.bf16 %v1279_v62, %v1278_v61  ;;  %v1281_v3 = vld [vmem:[#allocation4 + $0xc8] sm:$0xff]  ;;  %v351_v5 = vld [vmem:[%s6522_s26 + $0xd0] sm:$0xff] }
  0x6b   : > { %305 = vst [vmem:[#allocation2 + $0x1a0] sm:$0xff] %v6287_v1  ;;  %306 = vst [vmem:[#allocation2 + $0x1a8] sm:$0xff] %v6287_v1  ;;  %v5211_v4 = vpack.c.bf16 %v1281_v3, %v1280_v2  ;;  %v352_v6 = vld [vmem:[%s6522_s26 + $0xd8] sm:$0xff]  ;;  %v1282_v7 = vld [vmem:[#allocation4 + $0xd0] sm:$0xff] }
  0x6c   : > { %307 = vst [vmem:[#allocation2 + $0x1b0] sm:$0xff] %v6287_v1  ;;  %308 = vst [vmem:[#allocation2 + $0x1b8] sm:$0xff] %v6287_v1  ;;  %5194 = vmatpush1.bf16.msra.mxu0 %v5193_v35  ;;  %v1283_v8 = vld [vmem:[#allocation4 + $0xd8] sm:$0xff]  ;;  %v353_v9 = vld [vmem:[%s6522_s26 + $0xe0] sm:$0xff] }
  0x6d   : > { %309 = vst [vmem:[#allocation2 + $0x1c0] sm:$0xff] %v6287_v1  ;;  %310 = vst [vmem:[#allocation2 + $0x1c8] sm:$0xff] %v6287_v1  ;;  %5195 = vmatprep.subr.bf16.mxu0 %v7914_v0  ;;  %v5214_v10 = vpack.c.bf16 %v1283_v8, %v1282_v7  ;;  %v1284_v11 = vld [vmem:[#allocation4 + $0xe0] sm:$0xff]  ;;  %v1285_v12 = vld [vmem:[#allocation4 + $0xe8] sm:$0xff] }
  0x6e   : > { %311 = vst [vmem:[#allocation2 + $0x1d0] sm:$0xff] %v6287_v1  ;;  %312 = vst [vmem:[#allocation2 + $0x1d8] sm:$0xff] %v6287_v1  ;;  %v354_v13 = vld [vmem:[%s6522_s26 + $0xe8] sm:$0xff]  ;;  %v5217_v14 = vpack.c.bf16 %v1285_v12, %v1284_v11  ;;  %v1286_v15 = vld [vmem:[#allocation4 + $0xf0] sm:$0xff] }
  0x6f   : > { %313 = vst [vmem:[#allocation2 + $0x1e0] sm:$0xff] %v6287_v1  ;;  %314 = vst [vmem:[#allocation2 + $0x1e8] sm:$0xff] %v6287_v1  ;;  %v1291_v23 = vld [vmem:[#allocation4 + $0x118] sm:$0xff]  ;;  %v392_v24 = vld [vmem:[#allocation2 + $0xf] sm:$0xff] }
  0x70   : > { %315 = vst [vmem:[#allocation2 + $0x1f0] sm:$0xff] %v6287_v1  ;;  %316 = vst [vmem:[#allocation2 + $0x1f8] sm:$0xff] %v6287_v1  ;;  %5197 = vmatpush1.bf16.msra.mxu0 %v5196_v38  ;;  %v1295_v32 = vld [vmem:[#allocation4 + $0x138] sm:$0xff]  ;;  %v1296_v36 = vld [vmem:[#allocation4 + $0x140] sm:$0xff] }
  0x71   : > { %317 = vst [vmem:[#allocation2 + $0x200] sm:$0xff] %v6287_v1  ;;  %318 = vst [vmem:[#allocation2 + $0x208] sm:$0xff] %v6287_v1  ;;  %5198 = vmatprep.subr.bf16.mxu0 %v7914_v0  ;;  %v1297_v37 = vld [vmem:[#allocation4 + $0x148] sm:$0xff]  ;;  %v1300_v47 = vld [vmem:[#allocation4 + $0x160] sm:$0xff] }
  0x72   : > { %319 = vst [vmem:[#allocation2 + $0x210] sm:$0xff] %v6287_v1  ;;  %320 = vst [vmem:[#allocation2 + $0x218] sm:$0xff] %v6287_v1  ;;  %v5235_v39 = vpack.c.bf16 %v1297_v37, %v1296_v36  ;;  %v1303_v53 = vld [vmem:[#allocation4 + $0x178] sm:$0xff]  ;;  %v1306_v62 = vld [vmem:[#allocation4 + $0x190] sm:$0xff] }
  0x73   : > { %321 = vst [vmem:[#allocation2 + $0x220] sm:$0xff] %v6287_v1  ;;  %322 = vst [vmem:[#allocation2 + $0x228] sm:$0xff] %v6287_v1  ;;  %v1311_v11 = vld [vmem:[#allocation4 + $0x1b8] sm:$0xff] }
  0x74   : > { %323 = vst [vmem:[#allocation2 + $0x230] sm:$0xff] %v6287_v1  ;;  %324 = vst [vmem:[#allocation2 + $0x238] sm:$0xff] %v6287_v1  ;;  %5200 = vmatpush1.bf16.msra.mxu0 %v5199_v43  ;;  %v1299_v43 = vld [vmem:[#allocation4 + $0x158] sm:$0xff] }
  0x75   : > { %359 = vst.msk [vmem:[#allocation2 + $0x28] sm:$0xff] %vm358_vm0, %v325_v16  ;;  %360 = vst.msk [vmem:[#allocation2 + $0x30] sm:$0xff] %vm358_vm0, %v326_v17  ;;  %5201 = vmatprep.subr.bf16.mxu0 %v7914_v0  ;;  %v1287_v16 = vld [vmem:[#allocation4 + $0xf8] sm:$0xff] }
  0x76   : > { %361 = vst.msk [vmem:[#allocation2 + $0x48] sm:$0xff] %vm358_vm0, %v327_v18  ;;  %362 = vst.msk [vmem:[#allocation2 + $0x50] sm:$0xff] %vm358_vm0, %v328_v19  ;;  %v5220_v17 = vpack.c.bf16 %v1287_v16, %v1286_v15  ;;  %v1288_v18 = vld [vmem:[#allocation4 + $0x100] sm:$0xff]  ;;  %v1289_v19 = vld [vmem:[#allocation4 + $0x108] sm:$0xff] }
  0x77   : > { %363 = vst.msk [vmem:[#allocation2 + $0x68] sm:$0xff] %vm358_vm0, %v329_v20  ;;  %364 = vst.msk [vmem:[#allocation2 + $0x70] sm:$0xff] %vm358_vm0, %v330_v22  ;;  %v391_v20 = vld [vmem:[#allocation2 + $0x7] sm:$0xff]  ;;  %v5223_v21 = vpack.c.bf16 %v1289_v19, %v1288_v18  ;;  %v1290_v22 = vld [vmem:[#allocation4 + $0x110] sm:$0xff] }
  0x78   : > { %365 = vst.msk [vmem:[#allocation2 + $0x88] sm:$0xff] %vm358_vm0, %v331_v25  ;;  %366 = vst.msk [vmem:[#allocation2 + $0x90] sm:$0xff] %vm358_vm0, %v332_v26  ;;  %5203 = vmatpush1.bf16.msra.mxu0 %v5202_v52  ;;  %v5226_v25 = vpack.c.bf16 %v1291_v23, %v1290_v22  ;;  %v1302_v52 = vld [vmem:[#allocation4 + $0x170] sm:$0xff]  ;;  %v1312_v15 = vld [vmem:[#allocation4 + $0x1c0] sm:$0xff] }
  0x79   : > { %367 = vst.msk [vmem:[#allocation2 + $0xa8] sm:$0xff] %vm358_vm0, %v333_v27  ;;  %368 = vst.msk [vmem:[#allocation2 + $0xb0] sm:$0xff] %vm358_vm0, %v334_v28  ;;  %5204 = vmatprep.subr.bf16.mxu0 %v7914_v0  ;;  %v1292_v27 = vld [vmem:[#allocation4 + $0x120] sm:$0xff]  ;;  %v1293_v28 = vld [vmem:[#allocation4 + $0x128] sm:$0xff] }
  0x7a   : > { %369 = vst.msk [vmem:[#allocation2 + $0xc8] sm:$0xff] %vm358_vm0, %v335_v29  ;;  %370 = vst.msk [vmem:[#allocation2 + $0xd0] sm:$0xff] %vm358_vm0, %v336_v31  ;;  %v5229_v30 = vpack.c.bf16 %v1293_v28, %v1292_v27  ;;  %v1313_v16 = vld [vmem:[#allocation4 + $0x1c8] sm:$0xff] }
  0x7b   : > { %371 = vst.msk [vmem:[#allocation2 + $0xe8] sm:$0xff] %vm358_vm0, %v337_v34  ;;  %372 = vst.msk [vmem:[#allocation2 + $0xf0] sm:$0xff] %vm358_vm0, %v338_v41  ;;  %v5259_v18 = vpack.c.bf16 %v1313_v16, %v1312_v15  ;;  %v1317_v27 = vld [vmem:[#allocation4 + $0x1e8] sm:$0xff] }
  0x7c   : > { %373 = vst.msk [vmem:[#allocation2 + $0x108] sm:$0xff] %vm358_vm0, %v339_v42  ;;  %374 = vst.msk [vmem:[#allocation2 + $0x110] sm:$0xff] %vm358_vm0, %v340_v45  ;;  %5206 = vmatpush1.bf16.msra.mxu0 %v5205_v60  ;;  %v6599_v26 = vld [vmem:[#allocation2 + $0x28] sm:$0xff]  ;;  %v6605_v31 = vld [vmem:[#allocation2 + $0x30] sm:$0xff] }
  0x7d   : > { %375 = vst.msk [vmem:[#allocation2 + $0x128] sm:$0xff] %vm358_vm0, %v341_v46  ;;  %376 = vst.msk [vmem:[#allocation2 + $0x130] sm:$0xff] %vm358_vm0, %v342_v48  ;;  %5207 = vmatprep.subr.bf16.mxu0 %v7914_v0  ;;  %v6603_v29 = vld [vmem:[#allocation2 + $0x27] sm:$0xff]  ;;  %v6610_v33 = vld [vmem:[#allocation2 + $0x2f] sm:$0xff] }
  0x7e   : > { %377 = vst.msk [vmem:[#allocation2 + $0x148] sm:$0xff] %vm358_vm0, %v343_v49  ;;  %378 = vst.msk [vmem:[#allocation2 + $0x150] sm:$0xff] %vm358_vm0, %v344_v50  ;;  %v6612_v35 = vld [vmem:[#allocation2 + $0x48] sm:$0xff]  ;;  %v6621_v41 = vld [vmem:[#allocation2 + $0x50] sm:$0xff] }
  0x7f   : > { %379 = vst.msk [vmem:[#allocation2 + $0x168] sm:$0xff] %vm358_vm0, %v345_v51  ;;  %380 = vst.msk [vmem:[#allocation2 + $0x170] sm:$0xff] %vm358_vm0, %v346_v54  ;;  %v6617_v38 = vld [vmem:[#allocation2 + $0x47] sm:$0xff]  ;;  %v1298_v42 = vld [vmem:[#allocation4 + $0x150] sm:$0xff] }
  0x80   : > { %381 = vst.msk [vmem:[#allocation2 + $0x188] sm:$0xff] %vm358_vm0, %v347_v55  ;;  %382 = vst.msk [vmem:[#allocation2 + $0x190] sm:$0xff] %vm358_vm0, %v348_v57  ;;  %5209 = vmatpush1.bf16.msra.mxu0 %v5208_v63  ;;  %v6619_v40 = vld [vmem:[#allocation2 + $0x49] sm:$0xff]  ;;  %v5238_v45 = vpack.c.bf16 %v1299_v43, %v1298_v42  ;;  %v5244_v55 = vpack.c.bf16 %v1303_v53, %v1302_v52  ;;  %v1304_v57 = vld [vmem:[#allocation4 + $0x180] sm:$0xff] }
  0x81   : > { %383 = vst.msk [vmem:[#allocation2 + $0x1a8] sm:$0xff] %vm358_vm0, %v349_v58  ;;  %384 = vst.msk [vmem:[#allocation2 + $0x1b0] sm:$0xff] %vm358_vm0, %v350_v59  ;;  %5210 = vmatprep.subr.bf16.mxu0 %v7914_v0  ;;  %5046 = vmatprep.mubr.f32.mxu1 %v6619_v40  ;;  %v6627_v44 = vld [vmem:[#allocation2 + $0x4f] sm:$0xff]  ;;  %v6634_v49 = vld [vmem:[#allocation2 + $0x67] sm:$0xff] }
  0x82   : > { %385 = vst.msk [vmem:[#allocation2 + $0x1c8] sm:$0xff] %vm358_vm0, %v351_v5  ;;  %386 = vst.msk [vmem:[#allocation2 + $0x1d0] sm:$0xff] %vm358_vm0, %v352_v6  ;;  %v6629_v46 = vld [vmem:[#allocation2 + $0x68] sm:$0xff]  ;;  %v6636_v51 = vld [vmem:[#allocation2 + $0x70] sm:$0xff] }
  0x83   : > { %387 = vst.msk [vmem:[#allocation2 + $0x1e8] sm:$0xff] %vm358_vm0, %v353_v9  ;;  %388 = vst.msk [vmem:[#allocation2 + $0x1f0] sm:$0xff] %vm358_vm0, %v354_v13  ;;  %v1301_v48 = vld [vmem:[#allocation4 + $0x168] sm:$0xff]  ;;  %v6650_v61 = vld [vmem:[#allocation2 + $0x90] sm:$0xff] }
  0x84   : > { %5212 = vmatpush1.bf16.msra.mxu0 %v5211_v4  ;;  %v5241_v50 = vpack.c.bf16 %v1301_v48, %v1300_v47  ;;  %v6641_v54 = vld [vmem:[#allocation2 + $0x6f] sm:$0xff]  ;;  %v6648_v59 = vld [vmem:[#allocation2 + $0x87] sm:$0xff]  ;;  %v1307_v63 = vld [vmem:[#allocation4 + $0x198] sm:$0xff] }
  0x85   : > { %5213 = vmatprep.subr.bf16.mxu0 %v7914_v0  ;;  %v6643_v56 = vld [vmem:[#allocation2 + $0x88] sm:$0xff]  ;;  %v5250_v3 = vpack.c.bf16 %v1307_v63, %v1306_v62  ;;  %v1308_v5 = vld [vmem:[#allocation4 + $0x1a0] sm:$0xff]  ;;  %v6664_v9 = vld [vmem:[#allocation2 + $0xb0] sm:$0xff] }
  0x86   : > { %v1305_v58 = vld [vmem:[#allocation4 + $0x188] sm:$0xff]  ;;  %v6678_v19 = vld [vmem:[#allocation2 + $0xd0] sm:$0xff] }
  0x87   : > { %v5247_v60 = vpack.c.bf16 %v1305_v58, %v1304_v57  ;;  %v6655_v2 = vld [vmem:[#allocation2 + $0x8f] sm:$0xff]  ;;  %v6662_v7 = vld [vmem:[#allocation2 + $0xa7] sm:$0xff] }
  0x88   : > { %5215 = vmatpush1.bf16.msra.mxu0 %v5214_v10  ;;  %v6657_v4 = vld [vmem:[#allocation2 + $0xa8] sm:$0xff]  ;;  %v1310_v10 = vld [vmem:[#allocation4 + $0x1b0] sm:$0xff] }
  0x89   : > { %5216 = vmatprep.subr.bf16.mxu0 %v7914_v0  ;;  %v1309_v6 = vld [vmem:[#allocation4 + $0x1a8] sm:$0xff]  ;;  %v5256_v13 = vpack.c.bf16 %v1311_v11, %v1310_v10  ;;  %v6706_v43 = vld [vmem:[#allocation2 + $0x110] sm:$0xff] }
  0x8a   : > { %v5253_v8 = vpack.c.bf16 %v1309_v6, %v1308_v5  ;;  %v6669_v12 = vld [vmem:[#allocation2 + $0xaf] sm:$0xff]  ;;  %v6690_v28 = vld [vmem:[#allocation2 + $0xe7] sm:$0xff] }
  0x8b   : > { %v6683_v22 = vld [vmem:[#allocation2 + $0xcf] sm:$0xff]  ;;  %v6704_v42 = vld [vmem:[#allocation2 + $0x107] sm:$0xff] }
  0x8c   : > { %5218 = vmatpush1.bf16.msra.mxu0 %v5217_v14  ;;  %v6671_v14 = vld [vmem:[#allocation2 + $0xc8] sm:$0xff]  ;;  %v6731_v57 = vld [vmem:[#allocation2 + $0x150] sm:$0xff] }
  0x8d   : > { %5219 = vmatprep.subr.bf16.mxu0 %v7914_v0  ;;  %v6697_v36 = vld [vmem:[#allocation2 + $0xef] sm:$0xff]  ;;  %v6717_v48 = vld [vmem:[#allocation2 + $0x127] sm:$0xff] }
  0x8e   : > { %v6713_v47 = vld [vmem:[#allocation2 + $0x128] sm:$0xff]  ;;  %v6743_v63 = vld [vmem:[#allocation2 + $0x170] sm:$0xff] }
  0x8f   : > { %v6723_v52 = vld [vmem:[#allocation2 + $0x12f] sm:$0xff]  ;;  %v6741_v62 = vld [vmem:[#allocation2 + $0x167] sm:$0xff]  ;;  %7965 = vst [vmem:[#allocation13_spill] sm:$0xff] %v6743_v63 }
  0x90   : > { %5221 = vmatpush1.bf16.msra.mxu0 %v5220_v17  ;;  %v6676_v17 = vld [vmem:[#allocation2 + $0xc7] sm:$0xff]  ;;  %v6735_v58 = vld [vmem:[#allocation2 + $0x14f] sm:$0xff] }
  0x91   : > { %5222 = vmatprep.subr.bf16.mxu0 %v7914_v0  ;;  %v6725_v53 = vld [vmem:[#allocation2 + $0x148] sm:$0xff]  ;;  %v6767_v15 = vld [vmem:[#allocation2 + $0x1b0] sm:$0xff] }
  0x92   : > { %v6749_v5 = vld [vmem:[#allocation2 + $0x188] sm:$0xff]  ;;  %7969 = vst [vmem:[#allocation17_spill] sm:$0xff] %v6767_v15 }
  0x93   : > { %1472 = vmatmul.mubr.f32.vlgmr.msra.gmra.mrb[0].mxu0 %v391_v20  ;;  %v1314_v20 = vld [vmem:[#allocation4 + $0x1d0] sm:$0xff]  ;;  %7966 = vst [vmem:[#allocation14_spill] sm:$0xff] %v6749_v5  ;;  %v6753_v6 = vld [vmem:[#allocation2 + $0x187] sm:$0xff] }
  0x94   : > { %5224 = vmatpush1.bf16.msra.mxu0 %v5223_v21  ;;  %1476 = vmatprep.mubr.f32.mxu0 %v6287_v1  ;;  %v1294_v1 = vld [vmem:[#allocation4 + $0x130] sm:$0xff]  ;;  %v1315_v21 = vld [vmem:[#allocation4 + $0x1d8] sm:$0xff]  ;;  %v6761_v11 = vld [vmem:[#allocation2 + $0x1a8] sm:$0xff] }
  0x95   : > { %5225 = vmatprep.subr.bf16.mxu0 %v7914_v0  ;;  %v5232_v34 = vpack.c.bf16 %v1295_v32, %v1294_v1  ;;  %v5262_v23 = vpack.c.bf16 %v1315_v21, %v1314_v20  ;;  %v6692_v1 = vld [vmem:[#allocation2 + $0xf0] sm:$0xff]  ;;  %7968 = vst [vmem:[#allocation16_spill] sm:$0xff] %v6761_v11  ;;  %v6777_v20 = vld [vmem:[#allocation2 + $0x1c7] sm:$0xff] }
  0x96   : > { %v1318_v32 = vld [vmem:[#allocation4 + $0x1f0] sm:$0xff] }
  0x97   : > { %1477 = vmatmul.mubr.f32.gmra.mrb[2].mxu0 %v392_v24  ;;  %v6685_v24 = vld [vmem:[#allocation2 + $0xe8] sm:$0xff]  ;;  %v6779_v21 = vld [vmem:[#allocation2 + $0x1d0] sm:$0xff] }
  0x98   : > { %1481 = vmatprep.mubr.f32.mxu0 %v6599_v26  ;;  %5227 = vmatpush1.bf16.msra.mxu0 %v5226_v25  ;;  %v1316_v25 = vld [vmem:[#allocation4 + $0x1e0] sm:$0xff]  ;;  %v6759_v10 = vld [vmem:[#allocation2 + $0x18f] sm:$0xff]  ;;  %7971 = vst [vmem:[#allocation19_spill] sm:$0xff] %v6779_v21 }
  0x99   : > { %5228 = vmatprep.subr.bf16.mxu0 %v7914_v0  ;;  %v6771_v16 = vld [vmem:[#allocation2 + $0x1af] sm:$0xff] }
  0x9b   : > { %1482 = vmatmul.mubr.f32.gmra.mrb[4].mxu0 %v6603_v29 }
  0x9c   : > { %1486 = vmatprep.mubr.f32.mxu0 %v6605_v31  ;;  %5230 = vmatpush1.bf16.msra.mxu0 %v5229_v30  ;;  %v5265_v30 = vpack.c.bf16 %v1317_v27, %v1316_v25  ;;  %v6785_v25 = vld [vmem:[#allocation2 + $0x1cf] sm:$0xff] }
  0x9d   : > { %5231 = vmatprep.subr.bf16.mxu0 %v7914_v0  ;;  %v6787_v27 = vld [vmem:[#allocation2 + $0x1e8] sm:$0xff] }
  0x9e   : > { %7972 = vst [vmem:[#allocation20_spill] sm:$0xff] %v6787_v27 }
  0x9f   : > { %1487 = vmatmul.mubr.f32.gmra.mrb[6].mxu0 %v6610_v33 }
  0xa0   : > { %1491 = vmatprep.mubr.f32.mxu0 %v6612_v35  ;;  %5233 = vmatpush1.bf16.msra.mxu0 %v5232_v34  ;;  %v1319_v34 = vld [vmem:[#allocation4 + $0x1f8] sm:$0xff] }
  0xa1   : > { %5234 = vmatprep.subr.bf16.mxu0 %v7914_v0  ;;  %v5268_v37 = vpack.c.bf16 %v1319_v34, %v1318_v32  ;;  %v6793_v32 = vld [vmem:[#allocation2 + $0x1e7] sm:$0xff]  ;;  %v6795_v34 = vld [vmem:[#allocation2 + $0x1f0] sm:$0xff] }
  0xa2   : > { %7973 = vst [vmem:[#allocation21_spill] sm:$0xff] %v6795_v34 }
  0xa3   : > { %1492 = vmatmul.mubr.f32.gmra.mrb[8].mxu0 %v6617_v38 }
  0xa4   : > { %1496 = vmatprep.mubr.f32.mxu0 %v6621_v41  ;;  %5236 = vmatpush1.bf16.msra.mxu0 %v5235_v39  ;;  %v6699_v39 = vld [vmem:[#allocation2 + $0x108] sm:$0xff] }
  0xa5   : > { %5237 = vmatprep.subr.bf16.mxu0 %v7914_v0 }
  0xa7   : > { %1497 = vmatmul.mubr.f32.gmra.mrb[10].mxu0 %v6627_v44 }
  0xa8   : > { %1501 = vmatprep.mubr.f32.mxu0 %v6629_v46  ;;  %5239 = vmatpush1.bf16.msra.mxu0 %v5238_v45  ;;  %v6711_v45 = vld [vmem:[#allocation2 + $0x10f] sm:$0xff] }
  0xa9   : > { %5240 = vmatprep.subr.bf16.mxu0 %v7914_v0 }
  0xab   : > { %1502 = vmatmul.mubr.f32.gmra.mrb[12].mxu0 %v6634_v49 }
  0xac   : > { %1506 = vmatprep.mubr.f32.mxu0 %v6636_v51  ;;  %5242 = vmatpush1.bf16.msra.mxu0 %v5241_v50  ;;  %v6719_v50 = vld [vmem:[#allocation2 + $0x130] sm:$0xff] }
  0xad   : > { %5243 = vmatprep.subr.bf16.mxu0 %v7914_v0 }
  0xaf   : > { %1507 = vmatmul.mubr.f32.gmra.mrb[14].mxu0 %v6641_v54 }
  0xb0   : > { %1511 = vmatprep.mubr.f32.mxu0 %v6643_v56  ;;  %5245 = vmatpush1.bf16.msra.mxu0 %v5244_v55  ;;  %v6729_v55 = vld [vmem:[#allocation2 + $0x147] sm:$0xff] }
  0xb1   : > { %5246 = vmatprep.subr.bf16.mxu0 %v7914_v0 }
  0xb3   : > { %1512 = vmatmul.mubr.f32.gmra.mrb[16].mxu0 %v6648_v59 }
  0xb4   : > { %1516 = vmatprep.mubr.f32.mxu0 %v6650_v61  ;;  %5248 = vmatpush1.bf16.msra.mxu0 %v5247_v60  ;;  %v6737_v60 = vld [vmem:[#allocation2 + $0x168] sm:$0xff] }
  0xb5   : > { %5249 = vmatprep.subr.bf16.mxu0 %v7914_v0 }
  0xb7   : > { %1517 = vmatmul.mubr.f32.gmra.mrb[18].mxu0 %v6655_v2 }
  0xb8   : > { %1521 = vmatprep.mubr.f32.mxu0 %v6657_v4  ;;  %5251 = vmatpush1.bf16.msra.mxu0 %v5250_v3  ;;  %v6747_v3 = vld [vmem:[#allocation2 + $0x16f] sm:$0xff] }
  0xb9   : > { %5252 = vmatprep.subr.bf16.mxu0 %v7914_v0 }
  0xbb   : > { %1522 = vmatmul.mubr.f32.gmra.mrb[20].mxu0 %v6662_v7 }
  0xbc   : > { %1526 = vmatprep.mubr.f32.mxu0 %v6664_v9  ;;  %5254 = vmatpush1.bf16.msra.mxu0 %v5253_v8  ;;  %v6755_v8 = vld [vmem:[#allocation2 + $0x190] sm:$0xff] }
  0xbd   : > { %5255 = vmatprep.subr.bf16.mxu0 %v7914_v0  ;;  %7967 = vst [vmem:[#allocation15_spill] sm:$0xff] %v6755_v8 }
  0xbf   : > { %1527 = vmatmul.mubr.f32.gmra.mrb[22].mxu0 %v6669_v12 }
  0xc0   : > { %1531 = vmatprep.mubr.f32.mxu0 %v6671_v14  ;;  %5257 = vmatpush1.bf16.msra.mxu0 %v5256_v13  ;;  %v6765_v13 = vld [vmem:[#allocation2 + $0x1a7] sm:$0xff] }
  0xc1   : > { %5258 = vmatprep.subr.bf16.mxu0 %v7914_v0 }
  0xc3   : > { %1532 = vmatmul.mubr.f32.gmra.mrb[24].mxu0 %v6676_v17 }
  0xc4   : > { %1536 = vmatprep.mubr.f32.mxu0 %v6678_v19  ;;  %5260 = vmatpush1.bf16.msra.mxu0 %v5259_v18  ;;  %v6773_v18 = vld [vmem:[#allocation2 + $0x1c8] sm:$0xff] }
  0xc5   : > { %5261 = vmatprep.subr.bf16.mxu0 %v7914_v0  ;;  %7970 = vst [vmem:[#allocation18_spill] sm:$0xff] %v6773_v18 }
  0xc7   : > { %1537 = vmatmul.mubr.f32.gmra.mrb[26].mxu0 %v6683_v22 }
  0xc8   : > { %1541 = vmatprep.mubr.f32.mxu0 %v6685_v24  ;;  %5263 = vmatpush1.bf16.msra.mxu0 %v5262_v23  ;;  %v355_v23 = vld [vmem:[%s6522_s26 + $0xf0] sm:$0xff] }
  0xc9   : > { %5264 = vmatprep.subr.bf16.mxu0 %v7914_v0  ;;  %389 = vst.msk [vmem:[#allocation2 + $0x208] sm:$0xff] %vm358_vm0, %v355_v23  ;;  %v1320_v23 = vld [vmem:[#allocation4 + $0x200] sm:$0xff] }
  0xcb   : > { %1542 = vmatmul.mubr.f32.gmra.mrb[28].mxu0 %v6690_v28 }
  0xcc   : > { %1546 = vmatprep.mubr.f32.mxu0 %v6692_v1  ;;  %5266 = vmatpush1.bf16.msra.mxu0 %v5265_v30  ;;  %v356_v30 = vld [vmem:[%s6522_s26 + $0xf8] sm:$0xff]  ;;  %s6216_s26 = scalar_lea.vmem %s6215_s25, 8192 }
  0xcd   : > { %5267 = vmatprep.subr.bf16.mxu0 %v7914_v0  ;;  %390 = vst.msk [vmem:[#allocation2 + $0x210] sm:$0xff] %vm358_vm0, %v356_v30  ;;  %v519_v30 = vld [vmem:[#allocation2 + $0x9] sm:$0xff]  ;;  %p6218_p7 = scmp.lt.s32.totalorder %s6216_s26, %s6210_s8 }
  0xcf   : > { %1547 = vmatmul.mubr.f32.gmra.mrb[30].mxu0 %v6697_v36  ;;  %p6219_p8 = por %p6218_p7, %p6217_p4 }
  0xd0   : > { %1551 = vmatprep.mubr.f32.mxu0 %v6699_v39  ;;  %5269 = vmatpush1.bf16.msra.mxu0 %v5268_v37  ;;  %v6799_v37 = vld [vmem:[#allocation2 + $0x1ef] sm:$0xff] }
  0xd1   : > { %5270 = vmatprep.subr.bf16.mxu0 %v7914_v0  ;;  %v1321_v0 = vld [vmem:[#allocation4 + $0x208] sm:$0xff]  ;;  %p6220_p11 = pnand %p6219_p8, %p6213_p3 }
  0xd3   : > { %1552 = vmatmul.mubr.f32.gmra.mrb[32].mxu0 %v6704_v42 }
  0xd4   : > { %1556 = vmatprep.mubr.f32.mxu0 %v6706_v43 }
  0xd7   : > { %1557 = vmatmul.mubr.f32.gmra.mrb[34].mxu0 %v6711_v45 }
  0xd8   : > { %1561 = vmatprep.mubr.f32.mxu0 %v6713_v47 }
  0xdb   : > { %1562 = vmatmul.mubr.f32.gmra.mrb[36].mxu0 %v6717_v48 }
  0xdc   : > { %1566 = vmatprep.mubr.f32.mxu0 %v6719_v50 }
  0xdf   : > { %1567 = vmatmul.mubr.f32.gmra.mrb[38].mxu0 %v6723_v52 }
  0xe0   : > { %1571 = vmatprep.mubr.f32.mxu0 %v6725_v53 }
  0xe3   : > { %1572 = vmatmul.mubr.f32.gmra.mrb[40].mxu0 %v6729_v55 }
  0xe4   : > { %1576 = vmatprep.mubr.f32.mxu0 %v6731_v57 }
  0xe7   : > { %1577 = vmatmul.mubr.f32.gmra.mrb[42].mxu0 %v6735_v58 }
  0xe8   : > { %1581 = vmatprep.mubr.f32.mxu0 %v6737_v60 }
  0xeb   : > { %1582 = vmatmul.mubr.f32.gmra.mrb[44].mxu0 %v6741_v62 }
  0xec   : > { %1586 = vmatprep.mubr.f32.mxu0 %v6743_v63  ;;  %v6806_v63 = vld [vmem:[#allocation2 + $0x29] sm:$0xff] }
  0xef   : > { %1587 = vmatmul.mubr.f32.gmra.mrb[46].mxu0 %v6747_v3 }
  0xf0   : > { %1591 = vmatprep.mubr.f32.mxu0 %v6749_v5  ;;  %v1325_v5 = vld [vmem:[#allocation4 + $0x228] sm:$0xff] }
  0xf3   : > { %1592 = vmatmul.mubr.f32.gmra.mrb[48].mxu0 %v6753_v6 }
  0xf4   : > { %1596 = vmatprep.mubr.f32.mxu0 %v6755_v8  ;;  %v7974_v8 = vmov 0.0|0.0  }
  0xf7   : > { %1597 = vmatmul.mubr.f32.gmra.mrb[50].mxu0 %v6759_v10 }
  0xf8   : > { %1601 = vmatprep.mubr.f32.mxu0 %v6761_v11 }
  0xfb   : > { %1602 = vmatmul.mubr.f32.gmra.mrb[52].mxu0 %v6765_v13 }
  0xfc   : > { %1606 = vmatprep.mubr.f32.mxu0 %v6767_v15  ;;  %v520_v15 = vld [vmem:[#allocation2 + $0x11] sm:$0xff] }
  0xff   : > { %1607 = vmatmul.mubr.f32.gmra.mrb[54].mxu0 %v6771_v16 }
 0x100   : > { %1611 = vmatprep.mubr.f32.mxu0 %v6773_v18  ;;  %v1322_v18 = vld [vmem:[#allocation4 + $0x210] sm:$0xff] }
 0x103   : > { %1612 = vmatmul.mubr.f32.gmra.mrb[56].mxu0 %v6777_v20 }
 0x104   : > { %1616 = vmatprep.mubr.f32.mxu0 %v6779_v21  ;;  %v5271_v21 = vpack.c.bf16 %v1321_v0, %v1320_v23  ;;  %v1326_v0 = vld [vmem:[#allocation4 + $0x230] sm:$0xff]  ;;  %v1327_v23 = vld [vmem:[#allocation4 + $0x238] sm:$0xff] }
 0x107   : > { %1617 = vmatmul.mubr.f32.gmra.mrb[58].mxu0 %v6785_v25 }
 0x108   : > { %1621 = vmatprep.mubr.f32.mxu0 %v6787_v27  ;;  %v1323_v27 = vld [vmem:[#allocation4 + $0x218] sm:$0xff] }
 0x109   : > { %v5274_v11 = vpack.c.bf16 %v1323_v27, %v1322_v18  ;;  %v5280_v18 = vpack.c.bf16 %v1327_v23, %v1326_v0  ;;  %v1334_v0 = vld [vmem:[#allocation4 + $0x270] sm:$0xff] }
 0x10a   : > { %v6829_v23 = vld [vmem:[#allocation2 + $0x71] sm:$0xff] }
 0x10b   : > { %1622 = vmatmul.mubr.f32.gmra.mrb[60].mxu0 %v6793_v32 }
 0x10c   : > { %1626 = vmatprep.mubr.f32.mxu0 %v6795_v34  ;;  %v1324_v34 = vld [vmem:[#allocation4 + $0x220] sm:$0xff] }
 0x10f   : > { %1627 = vmatmul.mubr.f32.gmra.mrb[62].mxu0 %v6799_v37 }
 0x110   : > { %1696 = vmatprep.mubr.f32.mxu0 %v6603_v29  ;;  %v5277_v29 = vpack.c.bf16 %v1325_v5, %v1324_v34  ;;  %v1332_v34 = vld [vmem:[#allocation4 + $0x260] sm:$0xff] }
 0x113   : > { %1697 = vmatmul.mubr.f32.vlgmr.msra.gmra.mrb[0].mxu0 %v519_v30  ;;  %v1333_v30 = vld [vmem:[#allocation4 + $0x268] sm:$0xff] }
 0x114   : > { %5272 = vmatpush1.bf16.msra.mxu0 %v5271_v21  ;;  %1701 = vmatprep.mubr.f32.mxu0 %v6610_v33  ;;  %v6811_v33 = vld [vmem:[#allocation2 + $0x31] sm:$0xff] }
 0x115   : > { %5273 = vmatprep.subr.bf16.mxu0 %v7974_v8  ;;  %v1331_v21 = vld [vmem:[#allocation4 + $0x258] sm:$0xff] }
 0x117   : > { %1702 = vmatmul.mubr.f32.gmra.mrb[2].mxu0 %v520_v15  ;;  %v1328_v15 = vld [vmem:[#allocation4 + $0x240] sm:$0xff] }
 0x118   : > { %1706 = vmatprep.mubr.f32.mxu0 %v6617_v38  ;;  %5275 = vmatpush1.bf16.msra.mxu0 %v5274_v11  ;;  %v1329_v38 = vld [vmem:[#allocation4 + $0x248] sm:$0xff]  ;;  %v1330_v11 = vld [vmem:[#allocation4 + $0x250] sm:$0xff] }
 0x119   : > { %5276 = vmatprep.subr.bf16.mxu0 %v7974_v8  ;;  %v5283_v5 = vpack.c.bf16 %v1329_v38, %v1328_v15  ;;  %v5286_v27 = vpack.c.bf16 %v1331_v21, %v1330_v11  ;;  %v1336_v15 = vld [vmem:[#allocation4 + $0x280] sm:$0xff]  ;;  %v6834_v38 = vld [vmem:[#allocation2 + $0x89] sm:$0xff]  ;;  %v6839_v21 = vld [vmem:[#allocation2 + $0x91] sm:$0xff] }
 0x11a   : > { %v1338_v11 = vld [vmem:[#allocation4 + $0x290] sm:$0xff] }
 0x11b   : > { %1707 = vmatmul.mubr.f32.gmra.mrb[4].mxu0 %v6806_v63 }
 0x11c   : > { %1711 = vmatprep.mubr.f32.mxu0 %v6627_v44  ;;  %5278 = vmatpush1.bf16.msra.mxu0 %v5277_v29  ;;  %v6819_v44 = vld [vmem:[#allocation2 + $0x51] sm:$0xff]  ;;  %v5289_v29 = vpack.c.bf16 %v1333_v30, %v1332_v34  ;;  %v1340_v34 = vld [vmem:[#allocation4 + $0x2a0] sm:$0xff]  ;;  %v6844_v30 = vld [vmem:[#allocation2 + $0xa9] sm:$0xff] }
 0x11d   : > { %5279 = vmatprep.subr.bf16.mxu0 %v7974_v8 }
 0x11f   : > { %1712 = vmatmul.mubr.f32.gmra.mrb[6].mxu0 %v6811_v33 }
 0x120   : > { %1716 = vmatprep.mubr.f32.mxu0 %v6634_v49  ;;  %5281 = vmatpush1.bf16.msra.mxu0 %v5280_v18  ;;  %v6824_v49 = vld [vmem:[#allocation2 + $0x69] sm:$0xff] }
 0x121   : > { %5282 = vmatprep.subr.bf16.mxu0 %v7974_v8 }
 0x123   : > { %1717 = vmatmul.mubr.f32.gmra.mrb[8].mxu0 %v6619_v40 }
 0x124   : > { %1721 = vmatprep.mubr.f32.mxu0 %v6641_v54  ;;  %5284 = vmatpush1.bf16.msra.mxu0 %v5283_v5  ;;  %v1335_v54 = vld [vmem:[#allocation4 + $0x278] sm:$0xff] }
 0x125   : > { %5285 = vmatprep.subr.bf16.mxu0 %v7974_v8  ;;  %v5292_v18 = vpack.c.bf16 %v1335_v54, %v1334_v0  ;;  %v1342_v0 = vld [vmem:[#allocation4 + $0x2b0] sm:$0xff] }
 0x126   : > { %v6849_v54 = vld [vmem:[#allocation2 + $0xb1] sm:$0xff] }
 0x127   : > { %1722 = vmatmul.mubr.f32.gmra.mrb[10].mxu0 %v6819_v44 }
 0x128   : > { %1726 = vmatprep.mubr.f32.mxu0 %v6648_v59  ;;  %5287 = vmatpush1.bf16.msra.mxu0 %v5286_v27  ;;  %v1337_v59 = vld [vmem:[#allocation4 + $0x288] sm:$0xff] }
 0x129   : > { %5288 = vmatprep.subr.bf16.mxu0 %v7974_v8  ;;  %v5295_v5 = vpack.c.bf16 %v1337_v59, %v1336_v15  ;;  %v1344_v15 = vld [vmem:[#allocation4 + $0x2c0] sm:$0xff]  ;;  %v6854_v59 = vld [vmem:[#allocation2 + $0xc9] sm:$0xff] }
 0x12b   : > { %1727 = vmatmul.mubr.f32.gmra.mrb[12].mxu0 %v6824_v49 }
 0x12c   : > { %1731 = vmatprep.mubr.f32.mxu0 %v6655_v2  ;;  %5290 = vmatpush1.bf16.msra.mxu0 %v5289_v29  ;;  %v1339_v2 = vld [vmem:[#allocation4 + $0x298] sm:$0xff] }
 0x12d   : > { %5291 = vmatprep.subr.bf16.mxu0 %v7974_v8  ;;  %v5298_v27 = vpack.c.bf16 %v1339_v2, %v1338_v11  ;;  %v1346_v11 = vld [vmem:[#allocation4 + $0x2d0] sm:$0xff] }
 0x12e   : > { %v6859_v2 = vld [vmem:[#allocation2 + $0xd1] sm:$0xff] }
 0x12f   : > { %1732 = vmatmul.mubr.f32.gmra.mrb[14].mxu0 %v6829_v23 }
 0x130   : > { %1736 = vmatprep.mubr.f32.mxu0 %v6662_v7  ;;  %5293 = vmatpush1.bf16.msra.mxu0 %v5292_v18  ;;  %v1341_v7 = vld [vmem:[#allocation4 + $0x2a8] sm:$0xff] }
 0x131   : > { %5294 = vmatprep.subr.bf16.mxu0 %v7974_v8  ;;  %v5301_v29 = vpack.c.bf16 %v1341_v7, %v1340_v34  ;;  %v1348_v34 = vld [vmem:[#allocation4 + $0x2e0] sm:$0xff]  ;;  %v6864_v7 = vld [vmem:[#allocation2 + $0xe9] sm:$0xff] }
 0x133   : > { %1737 = vmatmul.mubr.f32.gmra.mrb[16].mxu0 %v6834_v38 }
 0x134   : > { %1741 = vmatprep.mubr.f32.mxu0 %v6669_v12  ;;  %5296 = vmatpush1.bf16.msra.mxu0 %v5295_v5  ;;  %v1343_v12 = vld [vmem:[#allocation4 + $0x2b8] sm:$0xff] }
 0x135   : > { %5297 = vmatprep.subr.bf16.mxu0 %v7974_v8  ;;  %v5304_v18 = vpack.c.bf16 %v1343_v12, %v1342_v0  ;;  %v1350_v0 = vld [vmem:[#allocation4 + $0x2f0] sm:$0xff] }
 0x136   : > { %v6869_v12 = vld [vmem:[#allocation2 + $0xf1] sm:$0xff] }
 0x137   : > { %1742 = vmatmul.mubr.f32.gmra.mrb[18].mxu0 %v6839_v21 }
 0x138   : > { %1746 = vmatprep.mubr.f32.mxu0 %v6676_v17  ;;  %5299 = vmatpush1.bf16.msra.mxu0 %v5298_v27  ;;  %v1345_v17 = vld [vmem:[#allocation4 + $0x2c8] sm:$0xff] }
 0x139   : > { %5300 = vmatprep.subr.bf16.mxu0 %v7974_v8  ;;  %v5307_v5 = vpack.c.bf16 %v1345_v17, %v1344_v15  ;;  %v6883_v15 = vld [vmem:[#allocation2 + $0x129] sm:$0xff] }
 0x13a   : > { %v6891_v17 = vld [vmem:[#allocation2 + $0x149] sm:$0xff] }
 0x13b   : > { %1747 = vmatmul.mubr.f32.gmra.mrb[20].mxu0 %v6844_v30 }
 0x13c   : > { %1751 = vmatprep.mubr.f32.mxu0 %v6683_v22  ;;  %5302 = vmatpush1.bf16.msra.mxu0 %v5301_v29  ;;  %v1347_v22 = vld [vmem:[#allocation4 + $0x2d8] sm:$0xff] }
 0x13d   : > { %5303 = vmatprep.subr.bf16.mxu0 %v7974_v8  ;;  %v5310_v27 = vpack.c.bf16 %v1347_v22, %v1346_v11  ;;  %v1387_v22 = vld [vmem:[#allocation4 + $0x418] sm:$0xff] }
 0x13f   : > { %1752 = vmatmul.mubr.f32.gmra.mrb[22].mxu0 %v6849_v54 }
 0x140   : > { %1756 = vmatprep.mubr.f32.mxu0 %v6690_v28  ;;  %5305 = vmatpush1.bf16.msra.mxu0 %v5304_v18  ;;  %v1349_v28 = vld [vmem:[#allocation4 + $0x2e8] sm:$0xff] }
 0x141   : > { %5306 = vmatprep.subr.bf16.mxu0 %v7974_v8  ;;  %v5313_v29 = vpack.c.bf16 %v1349_v28, %v1348_v34  ;;  %v1388_v34 = vld [vmem:[#allocation4 + $0x420] sm:$0xff]  ;;  %v1389_v28 = vld [vmem:[#allocation4 + $0x428] sm:$0xff] }
 0x143   : > { %1757 = vmatmul.mubr.f32.gmra.mrb[24].mxu0 %v6854_v59 }
 0x144   : > { %1761 = vmatprep.mubr.f32.mxu0 %v6697_v36  ;;  %5308 = vmatpush1.bf16.msra.mxu0 %v5307_v5  ;;  %v1351_v36 = vld [vmem:[#allocation4 + $0x2f8] sm:$0xff]  ;;  %v1385_v5 = vld [vmem:[#allocation4 + $0x408] sm:$0xff] }
 0x145   : > { %5309 = vmatprep.subr.bf16.mxu0 %v7974_v8  ;;  %v5316_v18 = vpack.c.bf16 %v1351_v36, %v1350_v0  ;;  %v1390_v0 = vld [vmem:[#allocation4 + $0x430] sm:$0xff]  ;;  %v1391_v36 = vld [vmem:[#allocation4 + $0x438] sm:$0xff] }
 0x147   : > { %1762 = vmatmul.mubr.f32.gmra.mrb[26].mxu0 %v6859_v2 }
 0x148   : > { %1766 = vmatprep.mubr.f32.mxu0 %v6704_v42  ;;  %5311 = vmatpush1.bf16.msra.mxu0 %v5310_v27  ;;  %v6874_v42 = vld [vmem:[#allocation2 + $0x109] sm:$0xff] }
 0x149   : > { %5312 = vmatprep.subr.bf16.mxu0 %v7974_v8 }
 0x14b   : > { %1767 = vmatmul.mubr.f32.gmra.mrb[28].mxu0 %v6864_v7 }
 0x14c   : > { %1771 = vmatprep.mubr.f32.mxu0 %v6711_v45  ;;  %5314 = vmatpush1.bf16.msra.mxu0 %v5313_v29  ;;  %v6879_v45 = vld [vmem:[#allocation2 + $0x111] sm:$0xff]  ;;  %v5374_v29 = vpack.c.bf16 %v1389_v28, %v1388_v34  ;;  %v1396_v28 = vld [vmem:[#allocation4 + $0x460] sm:$0xff] }
 0x14d   : > { %5315 = vmatprep.subr.bf16.mxu0 %v7974_v8 }
 0x14f   : > { %1772 = vmatmul.mubr.f32.gmra.mrb[30].mxu0 %v6869_v12 }
 0x150   : > { %1776 = vmatprep.mubr.f32.mxu0 %v6717_v48  ;;  %5317 = vmatpush1.bf16.msra.mxu0 %v5316_v18  ;;  %v6887_v48 = vld [vmem:[#allocation2 + $0x131] sm:$0xff]  ;;  %v5378_v18 = vpack.c.bf16 %v1391_v36, %v1390_v0 }
 0x151   : > { %5318 = vmatprep.subr.bf16.mxu0 %v7974_v8  ;;  %v6935_v0 = vld [vmem:[#allocation2 + $0x20f] sm:$0xff] }
 0x152   : > { %v6939_v36 = vld [vmem:[#allocation2 + $0x1f1] sm:$0xff] }
 0x153   : > { %1777 = vmatmul.mubr.f32.gmra.mrb[32].mxu0 %v6874_v42 }
 0x154   : > { %1781 = vmatprep.mubr.f32.mxu0 %v6723_v52  ;;  %v6895_v52 = vld [vmem:[#allocation2 + $0x151] sm:$0xff] }
 0x157   : > { %1782 = vmatmul.mubr.f32.gmra.mrb[34].mxu0 %v6879_v45 }
 0x158   : > { %1786 = vmatprep.mubr.f32.mxu0 %v6729_v55  ;;  %v6899_v55 = vld [vmem:[#allocation2 + $0x169] sm:$0xff] }
 0x15b   : > { %1787 = vmatmul.mubr.f32.gmra.mrb[36].mxu0 %v6883_v15 }
 0x15c   : > { %1791 = vmatprep.mubr.f32.mxu0 %v6735_v58  ;;  %v6903_v58 = vld [vmem:[#allocation2 + $0x171] sm:$0xff] }
 0x15f   : > { %1792 = vmatmul.mubr.f32.gmra.mrb[38].mxu0 %v6887_v48 }
 0x160   : > { %1796 = vmatprep.mubr.f32.mxu0 %v6741_v62  ;;  %v6907_v62 = vld [vmem:[#allocation2 + $0x189] sm:$0xff] }
 0x163   : > { %1797 = vmatmul.mubr.f32.gmra.mrb[40].mxu0 %v6891_v17 }
 0x164   : > { %1801 = vmatprep.mubr.f32.mxu0 %v6747_v3  ;;  %v1384_v3 = vld [vmem:[#allocation4 + $0x400] sm:$0xff] }
 0x165   : > { %v5366_v11 = vpack.c.bf16 %v1385_v5, %v1384_v3  ;;  %v1392_v3 = vld [vmem:[#allocation4 + $0x440] sm:$0xff]  ;;  %v1393_v5 = vld [vmem:[#allocation4 + $0x448] sm:$0xff] }
 0x167   : > { %1802 = vmatmul.mubr.f32.gmra.mrb[42].mxu0 %v6895_v52  ;;  %5367 = vmatprep.subr.bf16.mxu1 %v5366_v11 }
 0x168   : > { %1806 = vmatprep.mubr.f32.mxu0 %v6753_v6  ;;  %v6911_v6 = vld [vmem:[#allocation2 + $0x191] sm:$0xff]  ;;  %5369 = vmatpush3.bf16.msra.mxu1 %v5366_v11  ;;  %v5382_v11 = vpack.c.bf16 %v1393_v5, %v1392_v3  ;;  %v1352_v5 = vld [vmem:[#allocation4 + $0x300] sm:$0xff] }
 0x169   : > { %v1399_v3 = vld [vmem:[#allocation4 + $0x478] sm:$0xff] }
 0x16b   : > { %1807 = vmatmul.mubr.f32.gmra.mrb[44].mxu0 %v6899_v55 }
 0x16c   : > { %1811 = vmatprep.mubr.f32.mxu0 %v6759_v10  ;;  %v1386_v10 = vld [vmem:[#allocation4 + $0x410] sm:$0xff] }
 0x16d   : > { %v5370_v27 = vpack.c.bf16 %v1387_v22, %v1386_v10  ;;  %v1394_v10 = vld [vmem:[#allocation4 + $0x450] sm:$0xff]  ;;  %v1395_v22 = vld [vmem:[#allocation4 + $0x458] sm:$0xff] }
 0x16e   : > { %v5386_v34 = vpack.c.bf16 %v1395_v22, %v1394_v10 }
 0x16f   : > { %1812 = vmatmul.mubr.f32.gmra.mrb[46].mxu0 %v6903_v58  ;;  %5371 = vmatprep.subr.bf16.mxu1 %v5370_v27 }
 0x170   : > { %1816 = vmatprep.mubr.f32.mxu0 %v6765_v13  ;;  %v6915_v13 = vld [vmem:[#allocation2 + $0x1a9] sm:$0xff]  ;;  %5373 = vmatpush3.bf16.msra.mxu1 %v5370_v27 }
 0x171   : > { %5375 = vmatprep.subr.bf16.mxu1 %v5374_v29  ;;  %v6929_v27 = vld [vmem:[#allocation2 + $0x207] sm:$0xff] }
 0x173   : > { %1817 = vmatmul.mubr.f32.gmra.mrb[48].mxu0 %v6907_v62 }
 0x174   : > { %1821 = vmatprep.mubr.f32.mxu0 %v6771_v16  ;;  %v6919_v16 = vld [vmem:[#allocation2 + $0x1b1] sm:$0xff]  ;;  %5377 = vmatpush3.bf16.msra.mxu1 %v5374_v29  ;;  %v1397_v29 = vld [vmem:[#allocation4 + $0x468] sm:$0xff] }
 0x175   : > { %5379 = vmatprep.subr.bf16.mxu1 %v5378_v18 }
 0x177   : > { %1822 = vmatmul.mubr.f32.gmra.mrb[50].mxu0 %v6911_v6 }
 0x178   : > { %1826 = vmatprep.mubr.f32.mxu0 %v6777_v20  ;;  %v6923_v20 = vld [vmem:[#allocation2 + $0x1c9] sm:$0xff]  ;;  %5381 = vmatpush3.bf16.msra.mxu1 %v5378_v18 }
 0x179   : > { %5383 = vmatprep.subr.bf16.mxu1 %v5382_v11  ;;  %v1398_v18 = vld [vmem:[#allocation4 + $0x470] sm:$0xff] }
 0x17a   : > { %v5394_v10 = vpack.c.bf16 %v1399_v3, %v1398_v18  ;;  %v1357_v18 = vld [vmem:[#allocation4 + $0x328] sm:$0xff]  ;;  %v1359_v3 = vld [vmem:[#allocation4 + $0x338] sm:$0xff] }
 0x17b   : > { %1827 = vmatmul.mubr.f32.gmra.mrb[52].mxu0 %v6915_v13 }
 0x17c   : > { %1831 = vmatprep.mubr.f32.mxu0 %v6785_v25  ;;  %v6927_v25 = vld [vmem:[#allocation2 + $0x1d1] sm:$0xff]  ;;  %5385 = vmatpush3.bf16.msra.mxu1 %v5382_v11  ;;  %v1353_v11 = vld [vmem:[#allocation4 + $0x308] sm:$0xff] }
 0x17d   : > { %5387 = vmatprep.subr.bf16.mxu1 %v5386_v34  ;;  %v5319_v22 = vpack.c.bf16 %v1353_v11, %v1352_v5  ;;  %v1362_v5 = vld [vmem:[#allocation4 + $0x350] sm:$0xff]  ;;  %v1364_v11 = vld [vmem:[#allocation4 + $0x360] sm:$0xff] }
 0x17f   : > { %1832 = vmatmul.mubr.f32.gmra.mrb[54].mxu0 %v6919_v16 }
 0x180   : > { %1836 = vmatprep.mubr.f32.mxu0 %v6793_v32  ;;  %v6933_v32 = vld [vmem:[#allocation2 + $0x1e9] sm:$0xff]  ;;  %5389 = vmatpush3.bf16.msra.mxu1 %v5386_v34 }
 0x181   : > { %v1354_v34 = vld [vmem:[#allocation4 + $0x310] sm:$0xff] }
 0x183   : > { %1837 = vmatmul.mubr.f32.gmra.mrb[56].mxu0 %v6923_v20 }
 0x184   : > { %1841 = vmatprep.mubr.f32.mxu0 %v6799_v37  ;;  %v5390_v37 = vpack.c.bf16 %v1397_v29, %v1396_v28  ;;  %v1355_v28 = vld [vmem:[#allocation4 + $0x318] sm:$0xff] }
 0x185   : > { %v5322_v29 = vpack.c.bf16 %v1355_v28, %v1354_v34  ;;  %v1370_v34 = vld [vmem:[#allocation4 + $0x390] sm:$0xff]  ;;  %v1372_v28 = vld [vmem:[#allocation4 + $0x3a0] sm:$0xff] }
 0x186   : > { %5391 = vmatprep.subr.bf16.mxu1 %v5390_v37 }
 0x187   : > { %1842 = vmatmul.mubr.f32.gmra.mrb[58].mxu0 %v6927_v25  ;;  %5393 = vmatpush3.bf16.msra.mxu1 %v5390_v37  ;;  %v1356_v37 = vld [vmem:[#allocation4 + $0x320] sm:$0xff] }
 0x188   : > { %1846 = vmatprep.mubr.f32.mxu0 %v6929_v27  ;;  %5395 = vmatprep.subr.bf16.mxu1 %v5394_v10 }
 0x18b   : > { %1847 = vmatmul.mubr.f32.gmra.mrb[60].mxu0 %v6933_v32  ;;  %5397 = vmatpush3.bf16.msra.mxu1 %v5394_v10  ;;  %v1366_v10 = vld [vmem:[#allocation4 + $0x370] sm:$0xff] }
 0x18c   : > { %1851 = vmatprep.mubr.f32.mxu0 %v6935_v0  ;;  %5398 = vmatprep.subr.bf16.mxu1 %v7974_v8 }
 0x18e   : > { %5047 = vmatmul.mubr.f32.vlgmr.msra.gmra.mrb[0].mxu1 %v6819_v44 }
 0x18f   : > { %1852 = vmatmul.mubr.f32.gmra.mrb[62].mxu0 %v6939_v36  ;;  %5049 = vmatprep.mubr.f32.mxu1 %v6824_v49 }
 0x190   : > { %1921 = vmatprep.mubr.f32.mxu0 %v6806_v63  ;;  %v1358_v63 = vld [vmem:[#allocation4 + $0x330] sm:$0xff] }
 0x192   : > { %5050 = vmatmul.mubr.f32.gmra.mrb[2].mxu1 %v6829_v23 }
 0x193   : > { %1922 = vmatmul.mubr.f32.vlgmr.msra.gmra.mrb[0].mxu0 %v6599_v26  ;;  %v5325_v26 = vpack.c.bf16 %v1357_v18, %v1356_v37  ;;  %5052 = vmatprep.mubr.f32.mxu1 %v6834_v38  ;;  %v1376_v37 = vld [vmem:[#allocation4 + $0x3c0] sm:$0xff]  ;;  %v1378_v18 = vld [vmem:[#allocation4 + $0x3d0] sm:$0xff] }
 0x194   : > { %5320 = vmatpush1.bf16.msra.mxu0 %v5319_v22  ;;  %1926 = vmatprep.mubr.f32.mxu0 %v6811_v33  ;;  %v1360_v33 = vld [vmem:[#allocation4 + $0x340] sm:$0xff] }
 0x195   : > { %5321 = vmatprep.subr.bf16.mxu0 %v7974_v8  ;;  %v1368_v22 = vld [vmem:[#allocation4 + $0x380] sm:$0xff] }
 0x196   : > { %5053 = vmatmul.mubr.f32.gmra.mrb[4].mxu1 %v6839_v21 }
 0x197   : > { %1927 = vmatmul.mubr.f32.gmra.mrb[2].mxu0 %v6605_v31  ;;  %v5328_v31 = vpack.c.bf16 %v1359_v3, %v1358_v63  ;;  %5055 = vmatprep.mubr.f32.mxu1 %v6844_v30  ;;  %v741_v63 = vld [vmem:[#allocation2 + $0x209] sm:$0xff]  ;;  %v1383_v3 = vld [vmem:[#allocation4 + $0x3f8] sm:$0xff] }
 0x198   : > { %1931 = vmatprep.mubr.f32.mxu0 %v6619_v40  ;;  %5323 = vmatpush1.bf16.msra.mxu0 %v5322_v29  ;;  %v1361_v40 = vld [vmem:[#allocation4 + $0x348] sm:$0xff]  ;;  %v1374_v29 = vld [vmem:[#allocation4 + $0x3b0] sm:$0xff] }
 0x199   : > { %5324 = vmatprep.subr.bf16.mxu0 %v7974_v8 }
 0x19a   : > { %5056 = vmatmul.mubr.f32.gmra.mrb[6].mxu1 %v6849_v54 }
 0x19b   : > { %1932 = vmatmul.mubr.f32.gmra.mrb[4].mxu0 %v6612_v35  ;;  %v5331_v35 = vpack.c.bf16 %v1361_v40, %v1360_v33  ;;  %5058 = vmatprep.mubr.f32.mxu1 %v6854_v59  ;;  %v3464_v33 = vld [vmem:[#allocation7 + $0x20] sm:$0xff]  ;;  %v3465_v40 = vld [vmem:[#allocation7 + $0x28] sm:$0xff] }
 0x19c   : > { %1936 = vmatprep.mubr.f32.mxu0 %v6819_v44  ;;  %5326 = vmatpush1.bf16.msra.mxu0 %v5325_v26  ;;  %v1363_v44 = vld [vmem:[#allocation4 + $0x358] sm:$0xff]  ;;  %v1380_v26 = vld [vmem:[#allocation4 + $0x3e0] sm:$0xff] }
 0x19d   : > { %5327 = vmatprep.subr.bf16.mxu0 %v7974_v8 }
 0x19e   : > { %5059 = vmatmul.mubr.f32.gmra.mrb[8].mxu1 %v6859_v2 }
 0x19f   : > { %1937 = vmatmul.mubr.f32.gmra.mrb[6].mxu0 %v6621_v41  ;;  %v5334_v41 = vpack.c.bf16 %v1363_v44, %v1362_v5  ;;  %5061 = vmatprep.mubr.f32.mxu1 %v6864_v7  ;;  %v842_v5 = vld [vmem:[#allocation2 + $0x68] sm:$0xff]  ;;  %v5405_v44 = vpack.c.bf16 %v3465_v40, %v3464_v33  ;;  %v3486_v33 = vld [vmem:[#allocation7 + $0xd0] sm:$0xff]  ;;  %v3487_v40 = vld [vmem:[#allocation7 + $0xd8] sm:$0xff] }
 0x1a0   : > { %1941 = vmatprep.mubr.f32.mxu0 %v6824_v49  ;;  %5329 = vmatpush1.bf16.msra.mxu0 %v5328_v31  ;;  %v1365_v49 = vld [vmem:[#allocation4 + $0x368] sm:$0xff]  ;;  %v742_v31 = vld [vmem:[#allocation2 + $0x211] sm:$0xff] }
 0x1a1   : > { %5330 = vmatprep.subr.bf16.mxu0 %v7974_v8 }
 0x1a2   : > { %5062 = vmatmul.mubr.f32.gmra.mrb[10].mxu1 %v6869_v12 }
 0x1a3   : > { %1942 = vmatmul.mubr.f32.gmra.mrb[8].mxu0 %v6629_v46  ;;  %v5337_v46 = vpack.c.bf16 %v1365_v49, %v1364_v11  ;;  %5064 = vmatprep.mubr.f32.mxu1 %v6874_v42  ;;  %v3467_v11 = vld [vmem:[#allocation7 + $0x38] sm:$0xff]  ;;  %v3588_v49 = vld [vmem:[#allocation7 + $0x400] sm:$0xff] }
 0x1a4   : > { %1946 = vmatprep.mubr.f32.mxu0 %v6829_v23  ;;  %5332 = vmatpush1.bf16.msra.mxu0 %v5331_v35  ;;  %v1367_v23 = vld [vmem:[#allocation4 + $0x378] sm:$0xff]  ;;  %v777_v35 = vld [vmem:[#allocation2 + $0x4f] sm:$0xff] }
 0x1a5   : > { %5333 = vmatprep.subr.bf16.mxu0 %v7974_v8 }
 0x1a6   : > { %5065 = vmatmul.mubr.f32.gmra.mrb[12].mxu1 %v6879_v45 }
 0x1a7   : > { %1947 = vmatmul.mubr.f32.gmra.mrb[10].mxu0 %v6636_v51  ;;  %v5340_v51 = vpack.c.bf16 %v1367_v23, %v1366_v10  ;;  %5067 = vmatprep.mubr.f32.mxu1 %v6883_v15  ;;  %v3589_v10 = vld [vmem:[#allocation7 + $0x408] sm:$0xff]  ;;  %v843_v23 = vld [vmem:[#allocation2 + $0x70] sm:$0xff] }
 0x1a8   : > { %1951 = vmatprep.mubr.f32.mxu0 %v6834_v38  ;;  %5335 = vmatpush1.bf16.msra.mxu0 %v5334_v41  ;;  %v1369_v38 = vld [vmem:[#allocation4 + $0x388] sm:$0xff]  ;;  %v3466_v41 = vld [vmem:[#allocation7 + $0x30] sm:$0xff] }
 0x1a9   : > { %5336 = vmatprep.subr.bf16.mxu0 %v7974_v8 }
 0x1aa   : > { %5068 = vmatmul.mubr.f32.gmra.mrb[14].mxu1 %v6887_v48 }
 0x1ab   : > { %1952 = vmatmul.mubr.f32.gmra.mrb[12].mxu0 %v6643_v56  ;;  %v5343_v56 = vpack.c.bf16 %v1369_v38, %v1368_v22  ;;  %5070 = vmatprep.mubr.f32.mxu1 %v6891_v17  ;;  %v5408_v22 = vpack.c.bf16 %v3467_v11, %v3466_v41  ;;  %v3468_v38 = vld [vmem:[#allocation7 + $0x40] sm:$0xff]  ;;  %v789_v41 = vld [vmem:[#allocation2 + $0x10f] sm:$0xff] }
 0x1ac   : > { %1956 = vmatprep.mubr.f32.mxu0 %v6839_v21  ;;  %5338 = vmatpush1.bf16.msra.mxu0 %v5337_v46  ;;  %v1371_v21 = vld [vmem:[#allocation4 + $0x398] sm:$0xff]  ;;  %v778_v46 = vld [vmem:[#allocation2 + $0x67] sm:$0xff] }
 0x1ad   : > { %5339 = vmatprep.subr.bf16.mxu0 %v7974_v8  ;;  %v854_v11 = vld [vmem:[#allocation2 + $0x128] sm:$0xff] }
 0x1ae   : > { %5071 = vmatmul.mubr.f32.gmra.mrb[16].mxu1 %v6895_v52 }
 0x1af   : > { %1957 = vmatmul.mubr.f32.gmra.mrb[14].mxu0 %v6650_v61  ;;  %v5346_v61 = vpack.c.bf16 %v1371_v21, %v1370_v34  ;;  %5073 = vmatprep.mubr.f32.mxu1 %v6899_v55  ;;  %v779_v34 = vld [vmem:[#allocation2 + $0x6f] sm:$0xff] }
 0x1b0   : > { %1961 = vmatprep.mubr.f32.mxu0 %v6844_v30  ;;  %5341 = vmatpush1.bf16.msra.mxu0 %v5340_v51  ;;  %v1373_v30 = vld [vmem:[#allocation4 + $0x3a8] sm:$0xff]  ;;  %v7056_v51 = vpack.c.bf16 %v3589_v10, %v3588_v49 }
 0x1b1   : > { %5342 = vmatprep.subr.bf16.mxu0 %v7974_v8  ;;  %v844_v21 = vld [vmem:[#allocation2 + $0x88] sm:$0xff] }
 0x1b2   : > { %5074 = vmatmul.mubr.f32.gmra.mrb[18].mxu1 %v6903_v58  ;;  %v790_v49 = vld [vmem:[#allocation2 + $0x127] sm:$0xff]  ;;  %v791_v10 = vld [vmem:[#allocation2 + $0x12f] sm:$0xff] }
 0x1b3   : > { %1962 = vmatmul.mubr.f32.gmra.mrb[16].mxu0 %v6657_v4  ;;  %v5349_v4 = vpack.c.bf16 %v1373_v30, %v1372_v28  ;;  %5076 = vmatprep.mubr.f32.mxu1 %v6907_v62  ;;  %v3470_v28 = vld [vmem:[#allocation7 + $0x50] sm:$0xff]  ;;  %v3471_v30 = vld [vmem:[#allocation7 + $0x58] sm:$0xff] }
 0x1b4   : > { %1966 = vmatprep.mubr.f32.mxu0 %v6849_v54  ;;  %5344 = vmatpush1.bf16.msra.mxu0 %v5343_v56  ;;  %v1375_v54 = vld [vmem:[#allocation4 + $0x3b8] sm:$0xff]  ;;  %v3469_v56 = vld [vmem:[#allocation7 + $0x48] sm:$0xff] }
 0x1b5   : > { %5345 = vmatprep.subr.bf16.mxu0 %v7974_v8 }
 0x1b6   : > { %5077 = vmatmul.mubr.f32.gmra.mrb[20].mxu1 %v6911_v6 }
 0x1b7   : > { %1967 = vmatmul.mubr.f32.gmra.mrb[18].mxu0 %v6664_v9  ;;  %v5352_v9 = vpack.c.bf16 %v1375_v54, %v1374_v29  ;;  %5079 = vmatprep.mubr.f32.mxu1 %v6915_v13  ;;  %v845_v29 = vld [vmem:[#allocation2 + $0x90] sm:$0xff]  ;;  %v5414_v54 = vpack.c.bf16 %v3471_v30, %v3470_v28  ;;  %v860_v30 = vld [vmem:[#allocation2 + $0x188] sm:$0xff] }
 0x1b8   : > { %1971 = vmatprep.mubr.f32.mxu0 %v6854_v59  ;;  %5347 = vmatpush1.bf16.msra.mxu0 %v5346_v61  ;;  %v1377_v59 = vld [vmem:[#allocation4 + $0x3c8] sm:$0xff]  ;;  %v5411_v61 = vpack.c.bf16 %v3469_v56, %v3468_v38  ;;  %v857_v38 = vld [vmem:[#allocation2 + $0x150] sm:$0xff] }
 0x1b9   : > { %5348 = vmatprep.subr.bf16.mxu0 %v7974_v8  ;;  %v793_v56 = vld [vmem:[#allocation2 + $0x14f] sm:$0xff] }
 0x1ba   : > { %5080 = vmatmul.mubr.f32.gmra.mrb[22].mxu1 %v6919_v16  ;;  %v795_v28 = vld [vmem:[#allocation2 + $0x16f] sm:$0xff] }
 0x1bb   : > { %1972 = vmatmul.mubr.f32.gmra.mrb[20].mxu0 %v6671_v14  ;;  %v5355_v14 = vpack.c.bf16 %v1377_v59, %v1376_v37  ;;  %5082 = vmatprep.mubr.f32.mxu1 %v6923_v20  ;;  %v3473_v37 = vld [vmem:[#allocation7 + $0x68] sm:$0xff] }
 0x1bc   : > { %1976 = vmatprep.mubr.f32.mxu0 %v6859_v2  ;;  %5350 = vmatpush1.bf16.msra.mxu0 %v5349_v4  ;;  %v1379_v2 = vld [vmem:[#allocation4 + $0x3d8] sm:$0xff]  ;;  %v780_v4 = vld [vmem:[#allocation2 + $0x87] sm:$0xff]  ;;  %v781_v59 = vld [vmem:[#allocation2 + $0x8f] sm:$0xff] }
 0x1bd   : > { %5351 = vmatprep.subr.bf16.mxu0 %v7974_v8 }
 0x1be   : > { %5083 = vmatmul.mubr.f32.gmra.mrb[24].mxu1 %v6927_v25 }
 0x1bf   : > { %1977 = vmatmul.mubr.f32.gmra.mrb[22].mxu0 %v6678_v19  ;;  %v5358_v19 = vpack.c.bf16 %v1379_v2, %v1378_v18  ;;  %5085 = vmatprep.mubr.f32.mxu1 %v6933_v32  ;;  %v3474_v2 = vld [vmem:[#allocation7 + $0x70] sm:$0xff] }
 0x1c0   : > { %1981 = vmatprep.mubr.f32.mxu0 %v6864_v7  ;;  %5353 = vmatpush1.bf16.msra.mxu0 %v5352_v9  ;;  %v1381_v7 = vld [vmem:[#allocation4 + $0x3e8] sm:$0xff]  ;;  %v3472_v9 = vld [vmem:[#allocation7 + $0x60] sm:$0xff] }
 0x1c1   : > { %5354 = vmatprep.subr.bf16.mxu0 %v7974_v8  ;;  %v5417_v18 = vpack.c.bf16 %v3473_v37, %v3472_v9  ;;  %v796_v9 = vld [vmem:[#allocation2 + $0x187] sm:$0xff]  ;;  %v861_v37 = vld [vmem:[#allocation2 + $0x190] sm:$0xff] }
 0x1c2   : > { %5086 = vmatmul.mubr.f32.gmra.mrb[26].mxu1 %v6939_v36 }
 0x1c3   : > { %1982 = vmatmul.mubr.f32.gmra.mrb[24].mxu0 %v6685_v24  ;;  %v5361_v24 = vpack.c.bf16 %v1381_v7, %v1380_v26  ;;  %5088 = vmatprep.mubr.f32.mxu1 %v741_v63  ;;  %v782_v26 = vld [vmem:[#allocation2 + $0xa7] sm:$0xff]  ;;  %v847_v7 = vld [vmem:[#allocation2 + $0xb0] sm:$0xff] }
 0x1c4   : > { %1986 = vmatprep.mubr.f32.mxu0 %v6869_v12  ;;  %5356 = vmatpush1.bf16.msra.mxu0 %v5355_v14  ;;  %v1382_v12 = vld [vmem:[#allocation4 + $0x3f0] sm:$0xff]  ;;  %v846_v14 = vld [vmem:[#allocation2 + $0xa8] sm:$0xff] }
 0x1c5   : > { %5357 = vmatprep.subr.bf16.mxu0 %v7974_v8 }
 0x1c6   : > { %5089 = vmatmul.mubr.f32.gmra.mrb[28].mxu1 %v742_v31 }
 0x1c7   : > { %1987 = vmatmul.mubr.f32.gmra.mrb[26].mxu0 %v6692_v1  ;;  %v5364_v1 = vpack.c.bf16 %v1383_v3, %v1382_v12  ;;  %v3477_v12 = vld [vmem:[#allocation7 + $0x88] sm:$0xff] }
 0x1c8   : > { %1991 = vmatprep.mubr.f32.mxu0 %v6874_v42  ;;  %5359 = vmatpush1.bf16.msra.mxu0 %v5358_v19  ;;  %v7982_v42 = vld [vmem:[#allocation20_spill] sm:$0xff]  ;;  %v783_v3 = vld [vmem:[#allocation2 + $0xaf] sm:$0xff] }
 0x1c9   : > { %5360 = vmatprep.subr.bf16.mxu0 %v7974_v8  ;;  %v3475_v19 = vld [vmem:[#allocation7 + $0x78] sm:$0xff] }
 0x1cb   : > { %1992 = vmatmul.mubr.f32.gmra.mrb[28].mxu0 %v6699_v39  ;;  %v7975_v39 = vld [vmem:[#allocation13_spill] sm:$0xff] }
 0x1cc   : > { %1996 = vmatprep.mubr.f32.mxu0 %v6879_v45  ;;  %5362 = vmatpush1.bf16.msra.mxu0 %v5361_v24  ;;  %v7983_v45 = vld [vmem:[#allocation21_spill] sm:$0xff]  ;;  %7984 = vst [vmem:[#allocation13_spill] sm:$0xff] %v7056_v51  ;;  %v5420_v24 = vpack.c.bf16 %v3475_v19, %v3474_v2  ;;  %v3591_v2 = vld [vmem:[#allocation7 + $0x418] sm:$0xff] }
 0x1cd   : > { %5363 = vmatprep.subr.bf16.mxu0 %v7974_v8 }
 0x1cf   : > { %1997 = vmatmul.mubr.f32.gmra.mrb[30].mxu0 %v6706_v43  ;;  %v7976_v43 = vld [vmem:[#allocation14_spill] sm:$0xff] }
 0x1d0   : > { %2001 = vmatprep.mubr.f32.mxu0 %v6883_v15  ;;  %5365 = vmatpush1.bf16.msra.mxu0 %v5364_v1  ;;  %v7045_v15 = vld [vmem:[#allocation2 + $0x208] sm:$0xff] }
 0x1d1   : > { %5591 = vmatprep.subr.bf16.mxu0 %v7056_v51 }
 0x1d3   : > { %2002 = vmatmul.mubr.f32.gmra.mrb[32].mxu0 %v6713_v47  ;;  %v7977_v47 = vld [vmem:[#allocation15_spill] sm:$0xff] }
 0x1d4   : > { %2006 = vmatprep.mubr.f32.mxu0 %v6887_v48  ;;  %v934_v48 = vld [vmem:[#allocation2 + $0x229] sm:$0xff] }
 0x1d5   : > { %5091 = vmatprep.mubr.f32.mxu1 %v934_v48 }
 0x1d7   : > { %2007 = vmatmul.mubr.f32.gmra.mrb[34].mxu0 %v6719_v50  ;;  %v7978_v50 = vld [vmem:[#allocation16_spill] sm:$0xff] }
 0x1d8   : > { %2011 = vmatprep.mubr.f32.mxu0 %v6891_v17  ;;  %v935_v17 = vld [vmem:[#allocation2 + $0x231] sm:$0xff] }
 0x1d9   : > { %5092 = vmatmul.mubr.f32.gmra.mrb[30].mxu1 %v935_v17  ;;  %v3482_v17 = vld [vmem:[#allocation7 + $0xb0] sm:$0xff] }
 0x1db   : > { %2012 = vmatmul.mubr.f32.gmra.mrb[36].mxu0 %v6725_v53  ;;  %v7979_v53 = vld [vmem:[#allocation17_spill] sm:$0xff] }
 0x1dc   : > { %2016 = vmatprep.mubr.f32.mxu0 %v6895_v52  ;;  %v7048_v52 = vld [vmem:[#allocation2 + $0x210] sm:$0xff] }
 0x1df   : > { %2017 = vmatmul.mubr.f32.gmra.mrb[38].mxu0 %v6731_v57  ;;  %v7980_v57 = vld [vmem:[#allocation18_spill] sm:$0xff] }
 0x1e0   : > { %2021 = vmatprep.mubr.f32.mxu0 %v6899_v55  ;;  %v840_v55 = vld [vmem:[#allocation2 + $0x48] sm:$0xff] }
 0x1e3   : > { %2022 = vmatmul.mubr.f32.gmra.mrb[40].mxu0 %v6737_v60  ;;  %v7981_v60 = vld [vmem:[#allocation19_spill] sm:$0xff] }
 0x1e4   : > { %2026 = vmatprep.mubr.f32.mxu0 %v6903_v58  ;;  %v7050_v58 = vld [vmem:[#allocation2 + $0x8] sm:$0xff] }
 0x1e5   : > { %3675 = vmatprep.mubr.f32.mxu1 %v7050_v58 }
 0x1e7   : > { %2027 = vmatmul.mubr.f32.gmra.mrb[42].mxu0 %v7975_v39  ;;  %v3478_v39 = vld [vmem:[#allocation7 + $0x90] sm:$0xff] }
 0x1e8   : > { %2031 = vmatprep.mubr.f32.mxu0 %v6907_v62  ;;  %v3460_v62 = vld [vmem:[#allocation7] sm:$0xff] }
 0x1eb   : > { %2032 = vmatmul.mubr.f32.gmra.mrb[44].mxu0 %v7976_v43  ;;  %v3479_v43 = vld [vmem:[#allocation7 + $0x98] sm:$0xff] }
 0x1ec   : > { %2036 = vmatprep.mubr.f32.mxu0 %v6911_v6  ;;  %v3461_v6 = vld [vmem:[#allocation7 + $0x8] sm:$0xff] }
 0x1ef   : > { %2037 = vmatmul.mubr.f32.gmra.mrb[46].mxu0 %v7977_v47  ;;  %v784_v47 = vld [vmem:[#allocation2 + $0xc7] sm:$0xff] }
 0x1f0   : > { %2041 = vmatprep.mubr.f32.mxu0 %v6915_v13  ;;  %v3462_v13 = vld [vmem:[#allocation7 + $0x10] sm:$0xff] }
 0x1f3   : > { %2042 = vmatmul.mubr.f32.gmra.mrb[48].mxu0 %v7978_v50  ;;  %v849_v50 = vld [vmem:[#allocation2 + $0xd0] sm:$0xff] }
 0x1f4   : > { %2046 = vmatprep.mubr.f32.mxu0 %v6919_v16  ;;  %v776_v16 = vld [vmem:[#allocation2 + $0x47] sm:$0xff] }
 0x1f7   : > { %2047 = vmatmul.mubr.f32.gmra.mrb[50].mxu0 %v7979_v53  ;;  %v5426_v53 = vpack.c.bf16 %v3479_v43, %v3478_v39  ;;  %v798_v39 = vld [vmem:[#allocation2 + $0x1a7] sm:$0xff] }
 0x1f8   : > { %2051 = vmatprep.mubr.f32.mxu0 %v6923_v20  ;;  %v5399_v20 = vpack.c.bf16 %v3461_v6, %v3460_v62  ;;  %v786_v62 = vld [vmem:[#allocation2 + $0xe7] sm:$0xff]  ;;  %v851_v6 = vld [vmem:[#allocation2 + $0xf0] sm:$0xff] }
 0x1fa   : > { %5400 = vmatpush1.bf16.msra.mxu1 %v5399_v20  ;;  %v3485_v20 = vld [vmem:[#allocation7 + $0xc8] sm:$0xff] }
 0x1fb   : > { %2052 = vmatmul.mubr.f32.gmra.mrb[52].mxu0 %v7980_v57  ;;  %5401 = vmatprep.subr.bf16.mxu1 %v7974_v8  ;;  %v3480_v57 = vld [vmem:[#allocation7 + $0xa0] sm:$0xff] }
 0x1fc   : > { %2056 = vmatprep.mubr.f32.mxu0 %v6927_v25  ;;  %v3463_v25 = vld [vmem:[#allocation7 + $0x18] sm:$0xff] }
 0x1ff   : > { %2057 = vmatmul.mubr.f32.gmra.mrb[54].mxu0 %v7981_v60  ;;  %v3481_v60 = vld [vmem:[#allocation7 + $0xa8] sm:$0xff] }
 0x200   : > { %2061 = vmatprep.mubr.f32.mxu0 %v6933_v32  ;;  %v841_v32 = vld [vmem:[#allocation2 + $0x50] sm:$0xff]  ;;  %v5429_v48 = vpack.c.bf16 %v3481_v60, %v3480_v57 }
 0x201   : > { %v2597_v57 = vld [vmem:[#allocation2 + $0xf] sm:$0xff] }
 0x202   : > { %v799_v60 = vld [vmem:[#allocation2 + $0x1af] sm:$0xff] }
 0x203   : > { %2062 = vmatmul.mubr.f32.gmra.mrb[56].mxu0 %v7982_v42  ;;  %v785_v42 = vld [vmem:[#allocation2 + $0xcf] sm:$0xff] }
 0x204   : > { %2066 = vmatprep.mubr.f32.mxu0 %v6939_v36  ;;  %v5402_v36 = vpack.c.bf16 %v3463_v25, %v3462_v13  ;;  %v787_v25 = vld [vmem:[#allocation2 + $0xef] sm:$0xff] }
 0x206   : > { %5403 = vmatpush1.bf16.msra.mxu1 %v5402_v36 }
 0x207   : > { %2067 = vmatmul.mubr.f32.gmra.mrb[58].mxu0 %v7983_v45  ;;  %5404 = vmatprep.subr.bf16.mxu1 %v7974_v8  ;;  %v850_v45 = vld [vmem:[#allocation2 + $0xe8] sm:$0xff] }
 0x208   : > { %2071 = vmatprep.mubr.f32.mxu0 %v741_v63  ;;  %v3476_v63 = vld [vmem:[#allocation7 + $0x80] sm:$0xff] }
 0x209   : > { %v5423_v1 = vpack.c.bf16 %v3477_v12, %v3476_v63 }
 0x20a   : > { %5406 = vmatpush1.bf16.msra.mxu1 %v5405_v44  ;;  %v5438_v44 = vpack.c.bf16 %v3487_v40, %v3486_v33  ;;  %v3599_v33 = vld [vmem:[#allocation7 + $0x458] sm:$0xff]  ;;  %v801_v40 = vld [vmem:[#allocation2 + $0x1cf] sm:$0xff] }
 0x20b   : > { %2072 = vmatmul.mubr.f32.gmra.mrb[60].mxu0 %v7045_v15  ;;  %5407 = vmatprep.subr.bf16.mxu1 %v7974_v8 }
 0x20c   : > { %2076 = vmatprep.mubr.f32.mxu0 %v742_v31  ;;  %v848_v31 = vld [vmem:[#allocation2 + $0xc8] sm:$0xff] }
 0x20e   : > { %5409 = vmatpush1.bf16.msra.mxu1 %v5408_v22  ;;  %v792_v22 = vld [vmem:[#allocation2 + $0x147] sm:$0xff] }
 0x20f   : > { %2077 = vmatmul.mubr.f32.gmra.mrb[62].mxu0 %v7048_v52  ;;  %5410 = vmatprep.subr.bf16.mxu1 %v7974_v8 }
 0x210   : > { %2146 = vmatprep.mubr.f32.mxu0 %v840_v55  ;;  %v3483_v55 = vld [vmem:[#allocation7 + $0xb8] sm:$0xff] }
 0x211   : > { %v5432_v13 = vpack.c.bf16 %v3483_v55, %v3482_v17  ;;  %v3596_v55 = vld [vmem:[#allocation7 + $0x440] sm:$0xff] }
 0x212   : > { %5412 = vmatpush1.bf16.msra.mxu1 %v5411_v61  ;;  %v859_v61 = vld [vmem:[#allocation2 + $0x170] sm:$0xff] }
 0x213   : > { %2147 = vmatmul.mubr.f32.vlgmr.msra.gmra.mrb[0].mxu0 %v776_v16  ;;  %5413 = vmatprep.subr.bf16.mxu1 %v7974_v8  ;;  %v3484_v16 = vld [vmem:[#allocation7 + $0xc0] sm:$0xff] }
 0x214   : > { %2151 = vmatprep.mubr.f32.mxu0 %v841_v32  ;;  %5593 = vmatpush3.bf16.msra.mxu0 %v7056_v51  ;;  %v852_v32 = vld [vmem:[#allocation2 + $0x108] sm:$0xff]  ;;  %v5435_v36 = vpack.c.bf16 %v3485_v20, %v3484_v16  ;;  %v865_v16 = vld [vmem:[#allocation2 + $0x1d0] sm:$0xff]  ;;  %v3492_v20 = vld [vmem:[#allocation7 + $0x100] sm:$0xff] }
 0x216   : > { %5415 = vmatpush1.bf16.msra.mxu1 %v5414_v54 }
 0x217   : > { %2152 = vmatmul.mubr.f32.gmra.mrb[2].mxu0 %v777_v35  ;;  %5416 = vmatprep.subr.bf16.mxu1 %v7974_v8  ;;  %v788_v35 = vld [vmem:[#allocation2 + $0x107] sm:$0xff] }
 0x218   : > { %2156 = vmatprep.mubr.f32.mxu0 %v842_v5  ;;  %v853_v5 = vld [vmem:[#allocation2 + $0x110] sm:$0xff] }
 0x21a   : > { %5418 = vmatpush1.bf16.msra.mxu1 %v5417_v18  ;;  %v3590_v18 = vld [vmem:[#allocation7 + $0x410] sm:$0xff] }
 0x21b   : > { %2157 = vmatmul.mubr.f32.gmra.mrb[4].mxu0 %v778_v46  ;;  %5419 = vmatprep.subr.bf16.mxu1 %v7974_v8  ;;  %v855_v46 = vld [vmem:[#allocation2 + $0x130] sm:$0xff] }
 0x21c   : > { %2161 = vmatprep.mubr.f32.mxu0 %v843_v23  ;;  %v856_v23 = vld [vmem:[#allocation2 + $0x148] sm:$0xff] }
 0x21e   : > { %5421 = vmatpush1.bf16.msra.mxu1 %v5420_v24  ;;  %v862_v24 = vld [vmem:[#allocation2 + $0x1a8] sm:$0xff] }
 0x21f   : > { %2162 = vmatmul.mubr.f32.gmra.mrb[6].mxu0 %v779_v34  ;;  %5422 = vmatprep.subr.bf16.mxu1 %v7974_v8  ;;  %v858_v34 = vld [vmem:[#allocation2 + $0x168] sm:$0xff] }
 0x220   : > { %2166 = vmatprep.mubr.f32.mxu0 %v844_v21  ;;  %v794_v21 = vld [vmem:[#allocation2 + $0x167] sm:$0xff] }
 0x222   : > { %5424 = vmatpush1.bf16.msra.mxu1 %v5423_v1  ;;  %v2596_v1 = vld [vmem:[#allocation2 + $0x7] sm:$0xff] }
 0x223   : > { %2167 = vmatmul.mubr.f32.gmra.mrb[8].mxu0 %v780_v4  ;;  %5425 = vmatprep.subr.bf16.mxu1 %v7974_v8  ;;  %v3488_v4 = vld [vmem:[#allocation7 + $0xe0] sm:$0xff] }
 0x224   : > { %2171 = vmatprep.mubr.f32.mxu0 %v845_v29  ;;  %v3489_v29 = vld [vmem:[#allocation7 + $0xe8] sm:$0xff] }
 0x225   : > { %v5441_v54 = vpack.c.bf16 %v3489_v29, %v3488_v4  ;;  %v3496_v29 = vld [vmem:[#allocation7 + $0x120] sm:$0xff] }
 0x226   : > { %5427 = vmatpush1.bf16.msra.mxu1 %v5426_v53  ;;  %v3595_v53 = vld [vmem:[#allocation7 + $0x438] sm:$0xff] }
 0x227   : > { %2172 = vmatmul.mubr.f32.gmra.mrb[10].mxu0 %v781_v59  ;;  %5428 = vmatprep.subr.bf16.mxu1 %v7974_v8  ;;  %v3490_v59 = vld [vmem:[#allocation7 + $0xf0] sm:$0xff] }
 0x228   : > { %2176 = vmatprep.mubr.f32.mxu0 %v846_v14  ;;  %v3491_v14 = vld [vmem:[#allocation7 + $0xf8] sm:$0xff] }
 0x229   : > { %v5444_v19 = vpack.c.bf16 %v3491_v14, %v3490_v59  ;;  %v3498_v14 = vld [vmem:[#allocation7 + $0x130] sm:$0xff] }
 0x22a   : > { %5430 = vmatpush1.bf16.msra.mxu1 %v5429_v48 }
 0x22b   : > { %2177 = vmatmul.mubr.f32.gmra.mrb[12].mxu0 %v782_v26  ;;  %5431 = vmatprep.subr.bf16.mxu1 %v7974_v8  ;;  %v797_v26 = vld [vmem:[#allocation2 + $0x18f] sm:$0xff] }
 0x22c   : > { %2181 = vmatprep.mubr.f32.mxu0 %v847_v7  ;;  %v7073_v7 = vpack.c.bf16 %v3591_v2, %v3590_v18  ;;  %v3499_v18 = vld [vmem:[#allocation7 + $0x138] sm:$0xff] }
 0x22d   : > { %v5456_v2 = vpack.c.bf16 %v3499_v18, %v3498_v14  ;;  %v3516_v18 = vld [vmem:[#allocation7 + $0x1c0] sm:$0xff] }
 0x22e   : > { %5433 = vmatpush1.bf16.msra.mxu1 %v5432_v13  ;;  %7985 = vst [vmem:[#allocation14_spill] sm:$0xff] %v7073_v7  ;;  %5595 = vmatprep.subr.bf16.mxu0 %v7073_v7 }
 0x22f   : > { %2182 = vmatmul.mubr.f32.gmra.mrb[14].mxu0 %v783_v3  ;;  %5434 = vmatprep.subr.bf16.mxu1 %v7974_v8  ;;  %v3592_v3 = vld [vmem:[#allocation7 + $0x420] sm:$0xff] }
 0x230   : > { %2186 = vmatprep.mubr.f32.mxu0 %v848_v31  ;;  %v3593_v31 = vld [vmem:[#allocation7 + $0x428] sm:$0xff]  ;;  %5597 = vmatpush3.bf16.msra.mxu0 %v7073_v7 }
 0x231   : > { %v7082_v43 = vpack.c.bf16 %v3593_v31, %v3592_v3 }
 0x232   : > { %5436 = vmatpush1.bf16.msra.mxu1 %v5435_v36  ;;  %v3598_v36 = vld [vmem:[#allocation7 + $0x450] sm:$0xff] }
 0x233   : > { %2187 = vmatmul.mubr.f32.gmra.mrb[16].mxu0 %v784_v47  ;;  %5437 = vmatprep.subr.bf16.mxu1 %v7974_v8  ;;  %7986 = vst [vmem:[#allocation15_spill] sm:$0xff] %v7082_v43  ;;  %v863_v47 = vld [vmem:[#allocation2 + $0x1b0] sm:$0xff] }
 0x234   : > { %2191 = vmatprep.mubr.f32.mxu0 %v849_v50  ;;  %5599 = vmatprep.subr.bf16.mxu0 %v7082_v43  ;;  %v3594_v50 = vld [vmem:[#allocation7 + $0x430] sm:$0xff] }
 0x235   : > { %5601 = vmatpush3.bf16.msra.mxu0 %v7082_v43 }
 0x236   : > { %5439 = vmatpush1.bf16.msra.mxu1 %v5438_v44 }
 0x237   : > { %2192 = vmatmul.mubr.f32.gmra.mrb[18].mxu0 %v785_v42  ;;  %5440 = vmatprep.subr.bf16.mxu1 %v7974_v8  ;;  %v7087_v42 = vpack.c.bf16 %v3595_v53, %v3594_v50  ;;  %v3504_v53 = vld [vmem:[#allocation7 + $0x160] sm:$0xff] }
 0x238   : > { %2196 = vmatprep.mubr.f32.mxu0 %v850_v45  ;;  %v864_v45 = vld [vmem:[#allocation2 + $0x1c8] sm:$0xff] }
 0x239   : > { %7987 = vst [vmem:[#allocation16_spill] sm:$0xff] %v7087_v42  ;;  %5603 = vmatprep.subr.bf16.mxu0 %v7087_v42 }
 0x23a   : > { %5442 = vmatpush1.bf16.msra.mxu1 %v5441_v54  ;;  %5605 = vmatpush3.bf16.msra.mxu0 %v7087_v42  ;;  %v3497_v54 = vld [vmem:[#allocation7 + $0x128] sm:$0xff] }
 0x23b   : > { %2197 = vmatmul.mubr.f32.gmra.mrb[20].mxu0 %v786_v62  ;;  %5443 = vmatprep.subr.bf16.mxu1 %v7974_v8  ;;  %v3597_v62 = vld [vmem:[#allocation7 + $0x448] sm:$0xff] }
 0x23c   : > { %2201 = vmatprep.mubr.f32.mxu0 %v851_v6  ;;  %v800_v6 = vld [vmem:[#allocation2 + $0x1c7] sm:$0xff]  ;;  %v7095_v13 = vpack.c.bf16 %v3597_v62, %v3596_v55  ;;  %v3506_v62 = vld [vmem:[#allocation7 + $0x170] sm:$0xff] }
 0x23e   : > { %5445 = vmatpush1.bf16.msra.mxu1 %v5444_v19  ;;  %7988 = vst [vmem:[#allocation17_spill] sm:$0xff] %v7095_v13  ;;  %5607 = vmatprep.subr.bf16.mxu0 %v7095_v13 }
 0x23f   : > { %2202 = vmatmul.mubr.f32.gmra.mrb[22].mxu0 %v787_v25  ;;  %5446 = vmatprep.subr.bf16.mxu1 %v7974_v8  ;;  %v3493_v25 = vld [vmem:[#allocation7 + $0x108] sm:$0xff] }
 0x240   : > { %2206 = vmatprep.mubr.f32.mxu0 %v852_v32  ;;  %v5447_v32 = vpack.c.bf16 %v3493_v25, %v3492_v20  ;;  %5609 = vmatpush3.bf16.msra.mxu0 %v7095_v13 }
 0x241   : > { %3676 = vmatmul.mubr.f32.vlgmr.msra.gmra.mrb[32].mxu1 %v2596_v1  ;;  %v3503_v1 = vld [vmem:[#allocation7 + $0x158] sm:$0xff] }
 0x242   : > { %3680 = vmatprep.mubr.f32.mxu1 %v7050_v58  ;;  %5448 = vmatpush1.bf16.msra.mxu1 %v5447_v32  ;;  %v3508_v32 = vld [vmem:[#allocation7 + $0x180] sm:$0xff] }
 0x243   : > { %2207 = vmatmul.mubr.f32.gmra.mrb[24].mxu0 %v788_v35  ;;  %v7098_v35 = vpack.c.bf16 %v3599_v33, %v3598_v36  ;;  %5449 = vmatprep.subr.bf16.mxu1 %v7974_v8  ;;  %v3509_v36 = vld [vmem:[#allocation7 + $0x188] sm:$0xff] }
 0x244   : > { %2211 = vmatprep.mubr.f32.mxu0 %v853_v5  ;;  %v866_v5 = vld [vmem:[#allocation2 + $0x1e8] sm:$0xff]  ;;  %v5471_v33 = vpack.c.bf16 %v3509_v36, %v3508_v32 }
 0x245   : > { %3681 = vmatmul.mubr.f32.gmra.mrb[34].mxu1 %v2597_v57  ;;  %7989 = vst [vmem:[#allocation18_spill] sm:$0xff] %v7098_v35  ;;  %5611 = vmatprep.subr.bf16.mxu0 %v7098_v35  ;;  %v3505_v57 = vld [vmem:[#allocation7 + $0x168] sm:$0xff] }
 0x246   : > { %5613 = vmatpush3.bf16.msra.mxu0 %v7098_v35 }
 0x247   : > { %2212 = vmatmul.mubr.f32.gmra.mrb[26].mxu0 %v789_v41 }
 0x248   : > { %2216 = vmatprep.mubr.f32.mxu0 %v854_v11  ;;  %v3600_v11 = vld [vmem:[#allocation7 + $0x460] sm:$0xff] }
 0x24b   : > { %2217 = vmatmul.mubr.f32.gmra.mrb[28].mxu0 %v790_v49  ;;  %v3601_v49 = vld [vmem:[#allocation7 + $0x468] sm:$0xff] }
 0x24c   : > { %2221 = vmatprep.mubr.f32.mxu0 %v855_v46  ;;  %v802_v46 = vld [vmem:[#allocation2 + $0x1e7] sm:$0xff] }
 0x24f   : > { %2222 = vmatmul.mubr.f32.gmra.mrb[30].mxu0 %v791_v10  ;;  %v7107_v10 = vpack.c.bf16 %v3601_v49, %v3600_v11  ;;  %v3510_v11 = vld [vmem:[#allocation7 + $0x190] sm:$0xff]  ;;  %v3511_v49 = vld [vmem:[#allocation7 + $0x198] sm:$0xff] }
 0x250   : > { %2226 = vmatprep.mubr.f32.mxu0 %v856_v23  ;;  %v867_v23 = vld [vmem:[#allocation2 + $0x1f0] sm:$0xff] }
 0x251   : > { %7990 = vst [vmem:[#allocation19_spill] sm:$0xff] %v7107_v10  ;;  %5615 = vmatprep.subr.bf16.mxu0 %v7107_v10 }
 0x252   : > { %5617 = vmatpush3.bf16.msra.mxu0 %v7107_v10 }
 0x253   : > { %2227 = vmatmul.mubr.f32.gmra.mrb[32].mxu0 %v792_v22  ;;  %v3494_v22 = vld [vmem:[#allocation7 + $0x110] sm:$0xff] }
 0x254   : > { %2231 = vmatprep.mubr.f32.mxu0 %v857_v38  ;;  %v3495_v38 = vld [vmem:[#allocation7 + $0x118] sm:$0xff] }
 0x257   : > { %2232 = vmatmul.mubr.f32.gmra.mrb[34].mxu0 %v793_v56  ;;  %v5450_v56 = vpack.c.bf16 %v3495_v38, %v3494_v22  ;;  %v3512_v38 = vld [vmem:[#allocation7 + $0x1a0] sm:$0xff] }
 0x258   : > { %2236 = vmatprep.mubr.f32.mxu0 %v858_v34  ;;  %v3602_v34 = vld [vmem:[#allocation7 + $0x470] sm:$0xff] }
 0x259   : > { %5451 = vmatpush1.bf16.msra.mxu1 %v5450_v56  ;;  %v3513_v56 = vld [vmem:[#allocation7 + $0x1a8] sm:$0xff] }
 0x25a   : > { %5452 = vmatprep.subr.bf16.mxu1 %v7974_v8 }
 0x25b   : > { %2237 = vmatmul.mubr.f32.gmra.mrb[36].mxu0 %v794_v21  ;;  %v3603_v21 = vld [vmem:[#allocation7 + $0x478] sm:$0xff] }
 0x25c   : > { %2241 = vmatprep.mubr.f32.mxu0 %v859_v61  ;;  %v803_v61 = vld [vmem:[#allocation2 + $0x1ef] sm:$0xff] }
 0x25f   : > { %2242 = vmatmul.mubr.f32.gmra.mrb[38].mxu0 %v795_v28  ;;  %v7111_v28 = vpack.c.bf16 %v3603_v21, %v3602_v34  ;;  %v5477_v34 = vpack.c.bf16 %v3513_v56, %v3512_v38 }
 0x260   : > { %2246 = vmatprep.mubr.f32.mxu0 %v860_v30 }
 0x261   : > { %v7076_v63 = vpop.f32.mrb[0].mxu1  ;;  %7991 = vst [vmem:[#allocation20_spill] sm:$0xff] %v7111_v28  ;;  %5619 = vmatprep.subr.bf16.mxu0 %v7111_v28 }
 0x262   : > { %v7079_v12 = vpop.f32.mrb[1].mxu1  ;;  %5621 = vmatpush3.bf16.msra.mxu0 %v7111_v28 }
 0x263   : > { %2247 = vmatmul.mubr.f32.gmra.mrb[40].mxu0 %v796_v9  ;;  %v5453_v9 = vpack.c.bf16 %v3497_v54, %v3496_v29  ;;  %v3514_v29 = vld [vmem:[#allocation7 + $0x1b0] sm:$0xff]  ;;  %v3515_v54 = vld [vmem:[#allocation7 + $0x1b8] sm:$0xff] }
 0x264   : > { %2251 = vmatprep.mubr.f32.mxu0 %v861_v37 }
 0x265   : > { %v7090_v48 = vpop.f32.mrb[2].mxu1  ;;  %5454 = vmatpush1.bf16.msra.mxu1 %v5453_v9  ;;  %v5480_v9 = vpack.c.bf16 %v3515_v54, %v3514_v29 }
 0x266   : > { %v7092_v17 = vpop.f32.mrb[3].mxu1  ;;  %5455 = vmatprep.subr.bf16.mxu1 %v7974_v8 }
 0x267   : > { %2252 = vmatmul.mubr.f32.gmra.mrb[42].mxu0 %v797_v26  ;;  %v3501_v26 = vld [vmem:[#allocation7 + $0x148] sm:$0xff] }
 0x268   : > { %2256 = vmatprep.mubr.f32.mxu0 %v862_v24 }
 0x269   : > { %v7103_v44 = vpop.f32.mrb[4].mxu1  ;;  %5457 = vmatpush1.bf16.msra.mxu1 %v5456_v2  ;;  %v3517_v2 = vld [vmem:[#allocation7 + $0x1c8] sm:$0xff] }
 0x26a   : > { %v7105_v41 = vpop.f32.mrb[5].mxu1  ;;  %5458 = vmatprep.subr.bf16.mxu1 %v7974_v8 }
 0x26b   : > { %2257 = vmatmul.mubr.f32.gmra.mrb[44].mxu0 %v798_v39 }
 0x26c   : > { %2261 = vmatprep.mubr.f32.mxu0 %v863_v47 }
 0x26d   : > { %v7116_v30 = vpop.f32.mrb[6].mxu1 }
 0x26e   : > { %v7118_v4 = vpop.f32.mrb[7].mxu1 }
 0x26f   : > { %2262 = vmatmul.mubr.f32.gmra.mrb[46].mxu0 %v799_v60  ;;  %v5465_v60 = vpack.c.bf16 %v3505_v57, %v3504_v53  ;;  %v3520_v57 = vld [vmem:[#allocation7 + $0x1e0] sm:$0xff] }
 0x270   : > { %2266 = vmatprep.mubr.f32.mxu0 %v864_v45 }
 0x271   : > { %v7125_v37 = vpop.f32.mrb[8].mxu1 }
 0x272   : > { %v7128_v59 = vpop.f32.mrb[9].mxu1 }
 0x273   : > { %2267 = vmatmul.mubr.f32.gmra.mrb[48].mxu0 %v800_v6  ;;  %v3507_v6 = vld [vmem:[#allocation7 + $0x178] sm:$0xff] }
 0x274   : > { %2271 = vmatprep.mubr.f32.mxu0 %v865_v16  ;;  %v5468_v16 = vpack.c.bf16 %v3507_v6, %v3506_v62  ;;  %v7190_v6 = vld [vmem:[%s7907_s2] ss:$0 sm:$0xff] }
 0x277   : > { %2272 = vmatmul.mubr.f32.gmra.mrb[50].mxu0 %v801_v40 }
 0x278   : > { %2276 = vmatprep.mubr.f32.mxu0 %v866_v5 }
 0x27b   : > { %2277 = vmatmul.mubr.f32.gmra.mrb[52].mxu0 %v802_v46  ;;  %v5474_v46 = vpack.c.bf16 %v3511_v49, %v3510_v11  ;;  %v3523_v11 = vld [vmem:[#allocation7 + $0x1f8] sm:$0xff] }
 0x27c   : > { %2281 = vmatprep.mubr.f32.mxu0 %v867_v23 }
 0x27f   : > { %2282 = vmatmul.mubr.f32.gmra.mrb[54].mxu0 %v803_v61 }
 0x280   : > { %2286 = vmatprep.mubr.f32.mxu0 %v7045_v15  ;;  %v806_v15 = vld [vmem:[#allocation2 + $0x227] sm:$0xff] }
 0x283   : > { %2287 = vmatmul.mubr.f32.gmra.mrb[56].mxu0 %v6929_v27  ;;  %v807_v27 = vld [vmem:[#allocation2 + $0x22f] sm:$0xff] }
 0x284   : > { %2291 = vmatprep.mubr.f32.mxu0 %v7048_v52  ;;  %v7133_v52 = vpop.f32.mrb[10].mxu1 }
 0x285   : > { %v7135_v19 = vpop.f32.mrb[11].mxu1 }
 0x286   : > { %v7138_v3 = vpop.f32.mrb[12].mxu1 }
 0x287   : > { %2292 = vmatmul.mubr.f32.gmra.mrb[58].mxu0 %v6935_v0  ;;  %v3500_v0 = vld [vmem:[#allocation7 + $0x140] sm:$0xff]  ;;  %v7140_v31 = vpop.f32.mrb[13].mxu1 }
 0x288   : > { %2296 = vmatprep.mubr.f32.mxu0 %v7050_v58  ;;  %v5459_v24 = vpack.c.bf16 %v3501_v26, %v3500_v0  ;;  %v7143_v47 = vpop.f32.mrb[14].mxu1 }
 0x289   : > { %v7145_v50 = vpop.f32.mrb[15].mxu1 }
 0x28a   : > { %5460 = vmatpush1.bf16.msra.mxu1 %v5459_v24  ;;  %v7148_v45 = vpop.f32.mrb[16].mxu1  ;;  %v3518_v24 = vld [vmem:[#allocation7 + $0x1d0] sm:$0xff] }
 0x28b   : > { %2297 = vmatmul.mubr.f32.gmra.mrb[60].mxu0 %v806_v15  ;;  %5461 = vmatprep.subr.bf16.mxu1 %v7974_v8  ;;  %v7150_v55 = vpop.f32.mrb[17].mxu1 }
 0x28c   : > { %2301 = vmatprep.mubr.f32.mxu0 %v7050_v58  ;;  %v3502_v58 = vld [vmem:[#allocation7 + $0x150] sm:$0xff]  ;;  %v7153_v20 = vpop.f32.mrb[18].mxu1 }
 0x28d   : > { %v5462_v39 = vpack.c.bf16 %v3503_v1, %v3502_v58  ;;  %v7155_v25 = vpop.f32.mrb[19].mxu1  ;;  %v3519_v58 = vld [vmem:[#allocation7 + $0x1d8] sm:$0xff] }
 0x28e   : > { %v7158_v40 = vpop.f32.mrb[20].mxu1  ;;  %v5486_v1 = vpack.c.bf16 %v3519_v58, %v3518_v24 }
 0x28f   : > { %2302 = vmatmul.mubr.f32.gmra.mrb[62].mxu0 %v807_v27  ;;  %5463 = vmatpush1.bf16.msra.mxu1 %v5462_v39  ;;  %v7160_v5 = vpop.f32.mrb[21].mxu1  ;;  %v5483_v27 = vpack.c.bf16 %v3517_v2, %v3516_v18 }
 0x290   : > { %5464 = vmatprep.subr.bf16.mxu1 %v7974_v8  ;;  %v7163_v23 = vpop.f32.mrb[22].mxu1 }
 0x291   : > { %v7165_v22 = vpop.f32.mrb[23].mxu1 }
 0x292   : > { %v7168_v21 = vpop.f32.mrb[24].mxu1 }
 0x293   : > { %5466 = vmatpush1.bf16.msra.mxu1 %v5465_v60  ;;  %v7170_v61 = vpop.f32.mrb[25].mxu1  ;;  %v3521_v60 = vld [vmem:[#allocation7 + $0x1e8] sm:$0xff] }
 0x294   : > { %5467 = vmatprep.subr.bf16.mxu1 %v7974_v8  ;;  %v5489_v62 = vpack.c.bf16 %v3521_v60, %v3520_v57 }
 0x295   : > { %v7173_v15 = vpop.f32.mrb[26].mxu1 }
 0x296   : > { %v7175_v14 = vpop.f32.mrb[27].mxu1 }
 0x297   : > { %5469 = vmatpush1.bf16.msra.mxu1 %v5468_v16 }
 0x298   : > { %5470 = vmatprep.subr.bf16.mxu1 %v7974_v8 }
 0x299   : > { %v7178_v0 = vpop.f32.mrb[28].mxu1 }
 0x29a   : > { %v7180_v26 = vpop.f32.mrb[29].mxu1 }
 0x29b   : > { %5472 = vmatpush1.bf16.msra.mxu1 %v5471_v33  ;;  %v3522_v33 = vld [vmem:[#allocation7 + $0x1f0] sm:$0xff] }
 0x29c   : > { %5473 = vmatprep.subr.bf16.mxu1 %v7974_v8  ;;  %v5492_v49 = vpack.c.bf16 %v3523_v11, %v3522_v33 }
 0x29f   : > { %5475 = vmatpush1.bf16.msra.mxu1 %v5474_v46 }
 0x2a0   : > { %5476 = vmatprep.subr.bf16.mxu1 %v7974_v8 }
 0x2a3   : > { %5478 = vmatpush1.bf16.msra.mxu1 %v5477_v34 }
 0x2a4   : > { %5479 = vmatprep.subr.bf16.mxu1 %v7974_v8 }
 0x2a7   : > { %5481 = vmatpush1.bf16.msra.mxu1 %v5480_v9 }
 0x2a8   : > { %5482 = vmatprep.subr.bf16.mxu1 %v7974_v8 }
 0x2ab   : > { %5484 = vmatpush1.bf16.msra.mxu1 %v5483_v27 }
 0x2ac   : > { %5485 = vmatprep.subr.bf16.mxu1 %v7974_v8  ;;  %v7183_v39 = vpop.f32.mrb[30].mxu1 }
 0x2ad   : > { %v7185_v53 = vpop.f32.mrb[31].mxu1 }
 0x2af   : > { %5487 = vmatpush1.bf16.msra.mxu1 %v5486_v1 }
 0x2b0   : > { %5488 = vmatprep.subr.bf16.mxu1 %v7974_v8 }
 0x2b3   : > { %5490 = vmatpush1.bf16.msra.mxu1 %v5489_v62 }
 0x2b4   : > { %5491 = vmatprep.subr.bf16.mxu1 %v7974_v8 }
 0x2b7   : > { %5493 = vmatpush1.bf16.msra.mxu1 %v5492_v49 }
 0x2b8   : > { %5494 = vmatprep.subr.bf16.mxu1 %v7974_v8 }
 0x2e6   : > { %v2148_v16 = vpop.f32.mrb[0].mxu0 }
 0x2e7   : > { %v5638_v32 = vadd.f32 %v7190_v6, %v2148_v16  ;;  %v2150_v36 = vpop.f32.mrb[1].mxu0 }
 0x2e9   : > { %v2374_v46 = vadd.f32 %v5638_v32, %v7079_v12 }
 0x2ea   : > { %v2153_v38 = vpop.f32.mrb[2].mxu0 }
 0x2eb   : > { %v2532_v56 = vmax.f32 %v2374_v46, 0.0  ;;  %v5639_v34 = vadd.f32 %v7190_v6, %v2153_v38  ;;  %v2155_v29 = vpop.f32.mrb[3].mxu0 }
 0x2ed   : > { %2564 = vst [vmem:[#allocation2 + $0x28] sm:$0xff] %v2532_v56  ;;  %v2379_v54 = vadd.f32 %v5639_v34, %v7076_v63  ;;  %3685 = vmatprep.mubr.f32.mxu1 %v2532_v56 }
 0x2ee   : > { %v2158_v9 = vpop.f32.mrb[4].mxu0 }
 0x2ef   : > { %v2533_v18 = vmax.f32 %v2379_v54, 0.0  ;;  %v5640_v2 = vadd.f32 %v7190_v6, %v2158_v9  ;;  %v2160_v27 = vpop.f32.mrb[5].mxu0 }
 0x2f1   : > { %2565 = vst [vmem:[#allocation2 + $0x30] sm:$0xff] %v2533_v18  ;;  %v2384_v12 = vadd.f32 %v5640_v2, %v7092_v17 }
 0x2f2   : > { %v2163_v24 = vpop.f32.mrb[6].mxu0 }
 0x2f3   : > { %v2534_v58 = vmax.f32 %v2384_v12, 0.0  ;;  %v5641_v1 = vadd.f32 %v7190_v6, %v2163_v24  ;;  %v2165_v57 = vpop.f32.mrb[7].mxu0 }
 0x2f4   : > { %v7201_v60 = vld [vmem:[#allocation2 + $0x27] sm:$0xff] }
 0x2f5   : > { %2566 = vst [vmem:[#allocation2 + $0x48] sm:$0xff] %v2534_v58  ;;  %v2389_v62 = vadd.f32 %v5641_v1, %v7090_v48  ;;  %3686 = vmatmul.mubr.f32.gmra.mrb[36].mxu1 %v7201_v60 }
 0x2f6   : > { %v2168_v63 = vpop.f32.mrb[8].mxu0  ;;  %3690 = vmatprep.mubr.f32.mxu1 %v2533_v18 }
 0x2f7   : > { %v2535_v16 = vmax.f32 %v2389_v62, 0.0  ;;  %v5642_v32 = vadd.f32 %v7190_v6, %v2168_v63  ;;  %v2170_v36 = vpop.f32.mrb[9].mxu0 }
 0x2f8   : > { %v7206_v33 = vld [vmem:[#allocation2 + $0x2f] sm:$0xff] }
 0x2f9   : > { %2567 = vst [vmem:[#allocation2 + $0x50] sm:$0xff] %v2535_v16  ;;  %v2394_v17 = vadd.f32 %v5642_v32, %v7105_v41  ;;  %3691 = vmatmul.mubr.f32.gmra.mrb[38].mxu1 %v7206_v33 }
 0x2fa   : > { %v2173_v11 = vpop.f32.mrb[10].mxu0  ;;  %3695 = vmatprep.mubr.f32.mxu1 %v2534_v58 }
 0x2fb   : > { %v2536_v49 = vmax.f32 %v2394_v17, 0.0  ;;  %v5643_v48 = vadd.f32 %v7190_v6, %v2173_v11  ;;  %v2175_v46 = vpop.f32.mrb[11].mxu0 }
 0x2fc   : > { %v7211_v38 = vld [vmem:[#allocation2 + $0x47] sm:$0xff] }
 0x2fd   : > { %2568 = vst [vmem:[#allocation2 + $0x68] sm:$0xff] %v2536_v49  ;;  %v2399_v56 = vadd.f32 %v5643_v48, %v7103_v44  ;;  %3696 = vmatmul.mubr.f32.gmra.mrb[40].mxu1 %v7211_v38 }
 0x2fe   : > { %v2178_v34 = vpop.f32.mrb[12].mxu0  ;;  %3700 = vmatprep.mubr.f32.mxu1 %v2535_v16 }
 0x2ff   : > { %v2537_v29 = vmax.f32 %v2399_v56, 0.0  ;;  %v5644_v41 = vadd.f32 %v7190_v6, %v2178_v34  ;;  %v2180_v54 = vpop.f32.mrb[13].mxu0 }
 0x300   : > { %v7216_v9 = vld [vmem:[#allocation2 + $0x49] sm:$0xff]  ;;  %v7220_v2 = vld [vmem:[#allocation2 + $0x51] sm:$0xff] }
 0x301   : > { %v7218_v18 = vld [vmem:[#allocation2 + $0x4f] sm:$0xff]  ;;  %2569 = vst [vmem:[#allocation2 + $0x70] sm:$0xff] %v2537_v29  ;;  %v2404_v27 = vadd.f32 %v5644_v41, %v7118_v4  ;;  %5126 = vmatprep.mubr.f32.mxu0 %v7216_v9 }
 0x302   : > { %3701 = vmatmul.mubr.f32.gmra.mrb[42].mxu1 %v7218_v18  ;;  %v2183_v44 = vpop.f32.mrb[14].mxu0  ;;  %5127 = vmatmul.mubr.f32.vlgmr.msra.gmra.mrb[64].mxu0 %v7220_v2 }
 0x303   : > { %3705 = vmatprep.mubr.f32.mxu1 %v2536_v49  ;;  %v2538_v12 = vmax.f32 %v2404_v27, 0.0  ;;  %v5645_v24 = vadd.f32 %v7190_v6, %v2183_v44  ;;  %v2185_v58 = vpop.f32.mrb[15].mxu0 }
 0x304   : > { %v7227_v1 = vld [vmem:[#allocation2 + $0x67] sm:$0xff] }
 0x305   : > { %2570 = vst [vmem:[#allocation2 + $0x88] sm:$0xff] %v2538_v12  ;;  %v2409_v57 = vadd.f32 %v5645_v24, %v7116_v30 }
 0x306   : > { %3706 = vmatmul.mubr.f32.gmra.mrb[44].mxu1 %v7227_v1  ;;  %v2188_v4 = vpop.f32.mrb[16].mxu0 }
 0x307   : > { %3710 = vmatprep.mubr.f32.mxu1 %v2537_v29  ;;  %v2539_v62 = vmax.f32 %v2409_v57, 0.0  ;;  %v5646_v63 = vadd.f32 %v7190_v6, %v2188_v4  ;;  %v2190_v16 = vpop.f32.mrb[17].mxu0 }
 0x308   : > { %v7232_v32 = vld [vmem:[#allocation2 + $0x69] sm:$0xff]  ;;  %v7236_v17 = vld [vmem:[#allocation2 + $0x71] sm:$0xff] }
 0x309   : > { %v7234_v36 = vld [vmem:[#allocation2 + $0x6f] sm:$0xff]  ;;  %2571 = vst [vmem:[#allocation2 + $0x90] sm:$0xff] %v2539_v62  ;;  %v2414_v11 = vadd.f32 %v5646_v63, %v7128_v59  ;;  %5129 = vmatprep.mubr.f32.mxu0 %v7232_v32 }
 0x30a   : > { %3711 = vmatmul.mubr.f32.gmra.mrb[46].mxu1 %v7234_v36  ;;  %v2193_v30 = vpop.f32.mrb[18].mxu0  ;;  %5130 = vmatmul.mubr.f32.gmra.mrb[66].mxu0 %v7236_v17 }
 0x30b   : > { %3715 = vmatprep.mubr.f32.mxu1 %v2538_v12  ;;  %v2540_v49 = vmax.f32 %v2414_v11, 0.0  ;;  %v5647_v48 = vadd.f32 %v7190_v6, %v2193_v30  ;;  %v2195_v46 = vpop.f32.mrb[19].mxu0 }
 0x30c   : > { %v7243_v56 = vld [vmem:[#allocation2 + $0x87] sm:$0xff] }
 0x30d   : > { %2572 = vst [vmem:[#allocation2 + $0xa8] sm:$0xff] %v2540_v49  ;;  %v2419_v34 = vadd.f32 %v5647_v48, %v7125_v37 }
 0x30e   : > { %3716 = vmatmul.mubr.f32.gmra.mrb[48].mxu1 %v7243_v56  ;;  %v2198_v59 = vpop.f32.mrb[20].mxu0 }
 0x30f   : > { %3720 = vmatprep.mubr.f32.mxu1 %v2539_v62  ;;  %v2541_v29 = vmax.f32 %v2419_v34, 0.0  ;;  %v5648_v41 = vadd.f32 %v7190_v6, %v2198_v59  ;;  %v2200_v54 = vpop.f32.mrb[21].mxu0 }
 0x310   : > { %v7248_v27 = vld [vmem:[#allocation2 + $0x89] sm:$0xff]  ;;  %v7252_v12 = vld [vmem:[#allocation2 + $0x91] sm:$0xff] }
 0x311   : > { %v7250_v44 = vld [vmem:[#allocation2 + $0x8f] sm:$0xff]  ;;  %2573 = vst [vmem:[#allocation2 + $0xb0] sm:$0xff] %v2541_v29  ;;  %v2424_v24 = vadd.f32 %v5648_v41, %v7135_v19  ;;  %5132 = vmatprep.mubr.f32.mxu0 %v7248_v27 }
 0x312   : > { %3721 = vmatmul.mubr.f32.gmra.mrb[50].mxu1 %v7250_v44  ;;  %v2203_v37 = vpop.f32.mrb[22].mxu0  ;;  %5133 = vmatmul.mubr.f32.gmra.mrb[68].mxu0 %v7252_v12 }
 0x313   : > { %3725 = vmatprep.mubr.f32.mxu1 %v2540_v49  ;;  %v2542_v58 = vmax.f32 %v2424_v24, 0.0  ;;  %v5649_v57 = vadd.f32 %v7190_v6, %v2203_v37  ;;  %v2205_v4 = vpop.f32.mrb[23].mxu0 }
 0x314   : > { %v7259_v62 = vld [vmem:[#allocation2 + $0xa7] sm:$0xff] }
 0x315   : > { %2574 = vst [vmem:[#allocation2 + $0xc8] sm:$0xff] %v2542_v58  ;;  %v2429_v63 = vadd.f32 %v5649_v57, %v7133_v52 }
 0x316   : > { %3726 = vmatmul.mubr.f32.gmra.mrb[52].mxu1 %v7259_v62  ;;  %v2208_v19 = vpop.f32.mrb[24].mxu0 }
 0x317   : > { %3730 = vmatprep.mubr.f32.mxu1 %v2541_v29  ;;  %v2543_v16 = vmax.f32 %v2429_v63, 0.0  ;;  %v5650_v11 = vadd.f32 %v7190_v6, %v2208_v19  ;;  %v2210_v30 = vpop.f32.mrb[25].mxu0 }
 0x318   : > { %v7264_v48 = vld [vmem:[#allocation2 + $0xa9] sm:$0xff]  ;;  %v7268_v46 = vld [vmem:[#allocation2 + $0xb1] sm:$0xff] }
 0x319   : > { %v7266_v49 = vld [vmem:[#allocation2 + $0xaf] sm:$0xff]  ;;  %2575 = vst [vmem:[#allocation2 + $0xd0] sm:$0xff] %v2543_v16  ;;  %v2434_v34 = vadd.f32 %v5650_v11, %v7140_v31  ;;  %5135 = vmatprep.mubr.f32.mxu0 %v7264_v48 }
 0x31a   : > { %3731 = vmatmul.mubr.f32.gmra.mrb[54].mxu1 %v7266_v49  ;;  %v2213_v52 = vpop.f32.mrb[26].mxu0  ;;  %5136 = vmatmul.mubr.f32.gmra.mrb[70].mxu0 %v7268_v46 }
 0x31b   : > { %3735 = vmatprep.mubr.f32.mxu1 %v2542_v58  ;;  %v2544_v59 = vmax.f32 %v2434_v34, 0.0  ;;  %v5651_v29 = vadd.f32 %v7190_v6, %v2213_v52  ;;  %v2215_v41 = vpop.f32.mrb[27].mxu0 }
 0x31c   : > { %v7275_v54 = vld [vmem:[#allocation2 + $0xc7] sm:$0xff] }
 0x31d   : > { %2576 = vst [vmem:[#allocation2 + $0xe8] sm:$0xff] %v2544_v59  ;;  %v2439_v24 = vadd.f32 %v5651_v29, %v7138_v3 }
 0x31e   : > { %3736 = vmatmul.mubr.f32.gmra.mrb[56].mxu1 %v7275_v54  ;;  %v2218_v31 = vpop.f32.mrb[28].mxu0 }
 0x31f   : > { %3740 = vmatprep.mubr.f32.mxu1 %v2543_v16  ;;  %v2545_v37 = vmax.f32 %v2439_v24, 0.0  ;;  %v5652_v57 = vadd.f32 %v7190_v6, %v2218_v31  ;;  %v2220_v4 = vpop.f32.mrb[29].mxu0 }
 0x320   : > { %v7280_v63 = vld [vmem:[#allocation2 + $0xc9] sm:$0xff]  ;;  %v7284_v19 = vld [vmem:[#allocation2 + $0xd1] sm:$0xff] }
 0x321   : > { %v7282_v58 = vld [vmem:[#allocation2 + $0xcf] sm:$0xff]  ;;  %2577 = vst [vmem:[#allocation2 + $0xf0] sm:$0xff] %v2545_v37  ;;  %v2444_v11 = vadd.f32 %v5652_v57, %v7145_v50  ;;  %5138 = vmatprep.mubr.f32.mxu0 %v7280_v63 }
 0x322   : > { %3741 = vmatmul.mubr.f32.gmra.mrb[58].mxu1 %v7282_v58  ;;  %v2223_v3 = vpop.f32.mrb[30].mxu0  ;;  %5139 = vmatmul.mubr.f32.gmra.mrb[72].mxu0 %v7284_v19 }
 0x323   : > { %3745 = vmatprep.mubr.f32.mxu1 %v2544_v59  ;;  %v2546_v16 = vmax.f32 %v2444_v11, 0.0  ;;  %v5653_v30 = vadd.f32 %v7190_v6, %v2223_v3  ;;  %v2225_v34 = vpop.f32.mrb[31].mxu0 }
 0x324   : > { %v7291_v52 = vld [vmem:[#allocation2 + $0xe7] sm:$0xff] }
 0x325   : > { %2578 = vst [vmem:[#allocation2 + $0x108] sm:$0xff] %v2546_v16  ;;  %v2449_v29 = vadd.f32 %v5653_v30, %v7143_v47 }
 0x326   : > { %3746 = vmatmul.mubr.f32.gmra.mrb[60].mxu1 %v7291_v52  ;;  %v2228_v50 = vpop.f32.mrb[32].mxu0 }
 0x327   : > { %3750 = vmatprep.mubr.f32.mxu1 %v2545_v37  ;;  %v2547_v41 = vmax.f32 %v2449_v29, 0.0  ;;  %v5654_v24 = vadd.f32 %v7190_v6, %v2228_v50  ;;  %v2230_v31 = vpop.f32.mrb[33].mxu0 }
 0x328   : > { %v7296_v57 = vld [vmem:[#allocation2 + $0xe9] sm:$0xff]  ;;  %v7300_v4 = vld [vmem:[#allocation2 + $0xf1] sm:$0xff] }
 0x329   : > { %v7298_v59 = vld [vmem:[#allocation2 + $0xef] sm:$0xff]  ;;  %2579 = vst [vmem:[#allocation2 + $0x110] sm:$0xff] %v2547_v41  ;;  %v2454_v11 = vadd.f32 %v5654_v24, %v7150_v55  ;;  %5141 = vmatprep.mubr.f32.mxu0 %v7296_v57 }
 0x32a   : > { %3751 = vmatmul.mubr.f32.gmra.mrb[62].mxu1 %v7298_v59  ;;  %v2233_v47 = vpop.f32.mrb[34].mxu0  ;;  %5142 = vmatmul.mubr.f32.gmra.mrb[74].mxu0 %v7300_v4 }
 0x32b   : > { %3755 = vmatprep.mubr.f32.mxu1 %v2546_v16  ;;  %v2548_v37 = vmax.f32 %v2454_v11, 0.0  ;;  %v5655_v3 = vadd.f32 %v7190_v6, %v2233_v47  ;;  %v2235_v30 = vpop.f32.mrb[35].mxu0 }
 0x32c   : > { %v7307_v34 = vld [vmem:[#allocation2 + $0x107] sm:$0xff] }
 0x32d   : > { %2580 = vst [vmem:[#allocation2 + $0x128] sm:$0xff] %v2548_v37  ;;  %v2459_v29 = vadd.f32 %v5655_v3, %v7148_v45 }
 0x32e   : > { %3756 = vmatmul.mubr.f32.gmra.mrb[64].mxu1 %v7307_v34  ;;  %v2238_v55 = vpop.f32.mrb[36].mxu0 }
 0x32f   : > { %3760 = vmatprep.mubr.f32.mxu1 %v2547_v41  ;;  %v2549_v50 = vmax.f32 %v2459_v29, 0.0  ;;  %v5656_v24 = vadd.f32 %v7190_v6, %v2238_v55  ;;  %v2240_v31 = vpop.f32.mrb[37].mxu0 }
 0x330   : > { %v7312_v28 = vld [vmem:[#allocation2 + $0x109] sm:$0xff]  ;;  %v7316_v11 = vld [vmem:[#allocation2 + $0x111] sm:$0xff] }
 0x331   : > { %v7314_v16 = vld [vmem:[#allocation2 + $0x10f] sm:$0xff]  ;;  %2581 = vst [vmem:[#allocation2 + $0x130] sm:$0xff] %v2549_v50  ;;  %v2464_v47 = vadd.f32 %v5656_v24, %v7155_v25  ;;  %5144 = vmatprep.mubr.f32.mxu0 %v7312_v28 }
 0x332   : > { %3761 = vmatmul.mubr.f32.gmra.mrb[66].mxu1 %v7314_v16  ;;  %v2243_v45 = vpop.f32.mrb[38].mxu0  ;;  %5145 = vmatmul.mubr.f32.gmra.mrb[76].mxu0 %v7316_v11 }
 0x333   : > { %3765 = vmatprep.mubr.f32.mxu1 %v2548_v37  ;;  %v2550_v41 = vmax.f32 %v2464_v47, 0.0  ;;  %v5657_v3 = vadd.f32 %v7190_v6, %v2243_v45  ;;  %v2245_v30 = vpop.f32.mrb[39].mxu0 }
 0x334   : > { %v7323_v29 = vld [vmem:[#allocation2 + $0x127] sm:$0xff] }
 0x335   : > { %2582 = vst [vmem:[#allocation2 + $0x148] sm:$0xff] %v2550_v41  ;;  %v2469_v55 = vadd.f32 %v5657_v3, %v7153_v20 }
 0x336   : > { %3766 = vmatmul.mubr.f32.gmra.mrb[68].mxu1 %v7323_v29  ;;  %v2248_v25 = vpop.f32.mrb[40].mxu0 }
 0x337   : > { %3770 = vmatprep.mubr.f32.mxu1 %v2549_v50  ;;  %v2551_v24 = vmax.f32 %v2469_v55, 0.0  ;;  %v5658_v31 = vadd.f32 %v7190_v6, %v2248_v25  ;;  %v2250_v10 = vpop.f32.mrb[41].mxu0 }
 0x338   : > { %v7328_v35 = vld [vmem:[#allocation2 + $0x129] sm:$0xff]  ;;  %v7332_v47 = vld [vmem:[#allocation2 + $0x131] sm:$0xff] }
 0x339   : > { %v7330_v37 = vld [vmem:[#allocation2 + $0x12f] sm:$0xff]  ;;  %2583 = vst [vmem:[#allocation2 + $0x150] sm:$0xff] %v2551_v24  ;;  %v2474_v45 = vadd.f32 %v5658_v31, %v7160_v5  ;;  %5147 = vmatprep.mubr.f32.mxu0 %v7328_v35 }
 0x33a   : > { %3771 = vmatmul.mubr.f32.gmra.mrb[70].mxu1 %v7330_v37  ;;  %v2253_v20 = vpop.f32.mrb[42].mxu0  ;;  %5148 = vmatmul.mubr.f32.gmra.mrb[78].mxu0 %v7332_v47 }
 0x33b   : > { %3775 = vmatprep.mubr.f32.mxu1 %v2550_v41  ;;  %v2552_v50 = vmax.f32 %v2474_v45, 0.0  ;;  %v5659_v10 = vadd.f32 %v7190_v6, %v2253_v20  ;;  %v2255_v3 = vpop.f32.mrb[43].mxu0 }
 0x33c   : > { %v7339_v30 = vld [vmem:[#allocation2 + $0x147] sm:$0xff] }
 0x33d   : > { %2584 = vst [vmem:[#allocation2 + $0x168] sm:$0xff] %v2552_v50  ;;  %v2479_v55 = vadd.f32 %v5659_v10, %v7158_v40 }
 0x33e   : > { %3776 = vmatmul.mubr.f32.gmra.mrb[72].mxu1 %v7339_v30  ;;  %v2258_v5 = vpop.f32.mrb[44].mxu0 }
 0x33f   : > { %3780 = vmatprep.mubr.f32.mxu1 %v2551_v24  ;;  %v2553_v25 = vmax.f32 %v2479_v55, 0.0  ;;  %v5660_v31 = vadd.f32 %v7190_v6, %v2258_v5  ;;  %v2260_v13 = vpop.f32.mrb[45].mxu0 }
 0x340   : > { %v7344_v42 = vld [vmem:[#allocation2 + $0x149] sm:$0xff]  ;;  %v7348_v45 = vld [vmem:[#allocation2 + $0x151] sm:$0xff] }
 0x341   : > { %v7346_v41 = vld [vmem:[#allocation2 + $0x14f] sm:$0xff]  ;;  %2585 = vst [vmem:[#allocation2 + $0x170] sm:$0xff] %v2553_v25  ;;  %v2484_v20 = vadd.f32 %v5660_v31, %v7165_v22  ;;  %5150 = vmatprep.mubr.f32.mxu0 %v7344_v42 }
 0x342   : > { %3781 = vmatmul.mubr.f32.gmra.mrb[74].mxu1 %v7346_v41  ;;  %v2263_v40 = vpop.f32.mrb[46].mxu0  ;;  %5151 = vmatmul.mubr.f32.gmra.mrb[80].mxu0 %v7348_v45 }
 0x343   : > { %3785 = vmatprep.mubr.f32.mxu1 %v2552_v50  ;;  %v2554_v24 = vmax.f32 %v2484_v20, 0.0  ;;  %v5661_v13 = vadd.f32 %v7190_v6, %v2263_v40  ;;  %v2265_v10 = vpop.f32.mrb[47].mxu0 }
 0x344   : > { %v7355_v3 = vld [vmem:[#allocation2 + $0x167] sm:$0xff] }
 0x345   : > { %2586 = vst [vmem:[#allocation2 + $0x188] sm:$0xff] %v2554_v24  ;;  %v2489_v55 = vadd.f32 %v5661_v13, %v7163_v23 }
 0x346   : > { %3786 = vmatmul.mubr.f32.gmra.mrb[76].mxu1 %v7355_v3  ;;  %v2268_v22 = vpop.f32.mrb[48].mxu0 }
 0x347   : > { %3790 = vmatprep.mubr.f32.mxu1 %v2553_v25  ;;  %v2555_v5 = vmax.f32 %v2489_v55, 0.0  ;;  %v5662_v31 = vadd.f32 %v7190_v6, %v2268_v22  ;;  %v2270_v43 = vpop.f32.mrb[49].mxu0 }
 0x348   : > { %v7360_v7 = vld [vmem:[#allocation2 + $0x169] sm:$0xff]  ;;  %v7364_v20 = vld [vmem:[#allocation2 + $0x171] sm:$0xff] }
 0x349   : > { %v7362_v50 = vld [vmem:[#allocation2 + $0x16f] sm:$0xff]  ;;  %2587 = vst [vmem:[#allocation2 + $0x190] sm:$0xff] %v2555_v5  ;;  %v2494_v40 = vadd.f32 %v5662_v31, %v7170_v61  ;;  %5153 = vmatprep.mubr.f32.mxu0 %v7360_v7 }
 0x34a   : > { %3791 = vmatmul.mubr.f32.gmra.mrb[78].mxu1 %v7362_v50  ;;  %v2273_v23 = vpop.f32.mrb[50].mxu0  ;;  %5154 = vmatmul.mubr.f32.gmra.mrb[82].mxu0 %v7364_v20 }
 0x34b   : > { %3795 = vmatprep.mubr.f32.mxu1 %v2554_v24  ;;  %v7370_v25 = vmax.f32 %v2494_v40, 0.0  ;;  %v5663_v43 = vadd.f32 %v7190_v6, %v2273_v23  ;;  %v2275_v13 = vpop.f32.mrb[51].mxu0 }
 0x34c   : > { %v7373_v10 = vld [vmem:[#allocation2 + $0x187] sm:$0xff] }
 0x34d   : > { %7992 = vst [vmem:[#allocation21_spill] sm:$0xff] %v7370_v25  ;;  %2588 = vst [vmem:[#allocation2 + $0x1a8] sm:$0xff] %v7370_v25  ;;  %v2499_v55 = vadd.f32 %v5663_v43, %v7168_v21 }
 0x34e   : > { %3796 = vmatmul.mubr.f32.gmra.mrb[80].mxu1 %v7373_v10  ;;  %v2278_v61 = vpop.f32.mrb[52].mxu0 }
 0x34f   : > { %3800 = vmatprep.mubr.f32.mxu1 %v2555_v5  ;;  %v7378_v22 = vmax.f32 %v2499_v55, 0.0  ;;  %v5664_v31 = vadd.f32 %v7190_v6, %v2278_v61  ;;  %v2280_v24 = vpop.f32.mrb[53].mxu0 }
 0x350   : > { %v7381_v40 = vld [vmem:[#allocation2 + $0x189] sm:$0xff]  ;;  %v7385_v23 = vld [vmem:[#allocation2 + $0x191] sm:$0xff] }
 0x351   : > { %7993 = vst [vmem:[#allocation22_spill] sm:$0xff] %v7378_v22  ;;  %v7383_v51 = vld [vmem:[#allocation2 + $0x18f] sm:$0xff]  ;;  %7994 = vst [vmem:[#allocation23_spill] sm:$0xff] %v7385_v23  ;;  %v2504_v13 = vadd.f32 %v5664_v31, %v7175_v14  ;;  %5156 = vmatprep.mubr.f32.mxu0 %v7381_v40 }
 0x352   : > { %2589 = vst [vmem:[#allocation2 + $0x1b0] sm:$0xff] %v7378_v22  ;;  %3801 = vmatmul.mubr.f32.gmra.mrb[82].mxu1 %v7383_v51  ;;  %v2283_v21 = vpop.f32.mrb[54].mxu0  ;;  %5157 = vmatmul.mubr.f32.gmra.mrb[84].mxu0 %v7385_v23 }
 0x353   : > { %3805 = vmatprep.mubr.f32.mxu1 %v7370_v25  ;;  %v7393_v5 = vmax.f32 %v2504_v13, 0.0  ;;  %v5665_v43 = vadd.f32 %v7190_v6, %v2283_v21  ;;  %v2285_v55 = vpop.f32.mrb[55].mxu0 }
 0x354   : > { %v7396_v61 = vld [vmem:[#allocation2 + $0x1a7] sm:$0xff] }
 0x355   : > { %7995 = vst [vmem:[#allocation24_spill] sm:$0xff] %v7393_v5  ;;  %2590 = vst [vmem:[#allocation2 + $0x1c8] sm:$0xff] %v7393_v5  ;;  %v2509_v14 = vadd.f32 %v5665_v43, %v7173_v15 }
 0x356   : > { %3806 = vmatmul.mubr.f32.gmra.mrb[84].mxu1 %v7396_v61  ;;  %v2288_v31 = vpop.f32.mrb[56].mxu0 }
 0x357   : > { %3810 = vmatprep.mubr.f32.mxu1 %v7378_v22  ;;  %v7402_v24 = vmax.f32 %v2509_v14, 0.0  ;;  %v5666_v25 = vadd.f32 %v7190_v6, %v2288_v31  ;;  %v2290_v13 = vpop.f32.mrb[57].mxu0 }
 0x359   : > { %7996 = vst [vmem:[#allocation25_spill] sm:$0xff] %v7402_v24  ;;  %v7405_v23 = vld [vmem:[#allocation2 + $0x1a9] sm:$0xff]  ;;  %v7409_v55 = vld [vmem:[#allocation2 + $0x1b1] sm:$0xff]  ;;  %2591 = vst [vmem:[#allocation2 + $0x1d0] sm:$0xff] %v7402_v24  ;;  %v2514_v15 = vadd.f32 %v5666_v25, %v7180_v26 }
 0x35a   : > { %7997 = vst [vmem:[#allocation26_spill] sm:$0xff] %v7405_v23  ;;  %v7407_v21 = vld [vmem:[#allocation2 + $0x1af] sm:$0xff]  ;;  %7998 = vst [vmem:[#allocation27_spill] sm:$0xff] %v7409_v55  ;;  %5159 = vmatprep.mubr.f32.mxu0 %v7405_v23  ;;  %v2293_v43 = vpop.f32.mrb[58].mxu0 }
 0x35b   : > { %3811 = vmatmul.mubr.f32.gmra.mrb[86].mxu1 %v7407_v21  ;;  %5160 = vmatmul.mubr.f32.gmra.mrb[86].mxu0 %v7409_v55  ;;  %v7417_v14 = vmax.f32 %v2514_v15, 0.0  ;;  %v5667_v31 = vadd.f32 %v7190_v6, %v2293_v43  ;;  %v2295_v13 = vpop.f32.mrb[59].mxu0 }
 0x35c   : > { %3815 = vmatprep.mubr.f32.mxu1 %v7393_v5  ;;  %v7420_v22 = vld [vmem:[#allocation2 + $0x1c7] sm:$0xff] }
 0x35d   : > { %7999 = vst [vmem:[#allocation28_spill] sm:$0xff] %v7417_v14  ;;  %2592 = vst [vmem:[#allocation2 + $0x1e8] sm:$0xff] %v7417_v14  ;;  %v2519_v26 = vadd.f32 %v5667_v31, %v7178_v0 }
 0x35e   : > { %v2298_v25 = vpop.f32.mrb[60].mxu0 }
 0x35f   : > { %3816 = vmatmul.mubr.f32.gmra.mrb[88].mxu1 %v7420_v22  ;;  %v7426_v23 = vmax.f32 %v2519_v26, 0.0  ;;  %v5668_v5 = vadd.f32 %v7190_v6, %v2298_v25  ;;  %v2300_v15 = vpop.f32.mrb[61].mxu0 }
 0x360   : > { %3820 = vmatprep.mubr.f32.mxu1 %v7402_v24  ;;  %v7429_v55 = vld [vmem:[#allocation2 + $0x1cf] sm:$0xff] }
 0x361   : > { %8000 = vst [vmem:[#allocation29_spill] sm:$0xff] %v7426_v23  ;;  %2593 = vst [vmem:[#allocation2 + $0x1f0] sm:$0xff] %v7426_v23  ;;  %v7433_v43 = vadd.f32 %v5668_v5, %v7185_v53  ;;  %v3524_v5 = vld [vmem:[#allocation7 + $0x200] sm:$0xff]  ;;  %v3525_v15 = vld [vmem:[#allocation7 + $0x208] sm:$0xff] }
 0x362   : > { %v2303_v0 = vpop.f32.mrb[62].mxu0 }
 0x363   : > { %8001 = vst [vmem:[#allocation30_spill] sm:$0xff] %v7433_v43  ;;  %3821 = vmatmul.mubr.f32.gmra.mrb[90].mxu1 %v7429_v55  ;;  %v7952_v31 = vmax.f32 %v7433_v43, 0.0  ;;  %v5669_v13 = vadd.f32 %v7190_v6, %v2303_v0  ;;  %v2305_v26 = vpop.f32.mrb[63].mxu0  ;;  %v2724_v6 = vld [vmem:[#allocation2 + $0x9] sm:$0xff]  ;;  %v3528_v43 = vld [vmem:[#allocation7 + $0x220] sm:$0xff] }
 0x364   : > { %3825 = vmatprep.mubr.f32.mxu1 %v7417_v14  ;;  %v7439_v24 = vld [vmem:[#allocation2 + $0x1e7] sm:$0xff]  ;;  %v3526_v0 = vld [vmem:[#allocation7 + $0x210] sm:$0xff] }
 0x365   : > { %2594 = vst [vmem:[#allocation2 + $0x208] sm:$0xff] %v7952_v31  ;;  %v7444_v25 = vadd.f32 %v5669_v13, %v7183_v39  ;;  %v5495_v39 = vpack.c.bf16 %v3525_v15, %v3524_v5  ;;  %v3527_v13 = vld [vmem:[#allocation7 + $0x218] sm:$0xff]  ;;  %v7459_v15 = vld [vmem:[#allocation2 + $0x29] sm:$0xff] }
 0x366   : > { %v2725_v26 = vld [vmem:[#allocation2 + $0x11] sm:$0xff]  ;;  %v5498_v31 = vpack.c.bf16 %v3527_v13, %v3526_v0 }
 0x367   : > { %3826 = vmatmul.mubr.f32.gmra.mrb[92].mxu1 %v7439_v24  ;;  %v7955_v53 = vmax.f32 %v7444_v25, 0.0  ;;  %v3531_v5 = vld [vmem:[#allocation7 + $0x238] sm:$0xff]  ;;  %v3538_v13 = vld [vmem:[#allocation7 + $0x270] sm:$0xff] }
 0x368   : > { %3830 = vmatprep.mubr.f32.mxu1 %v7426_v23  ;;  %v7449_v14 = vld [vmem:[#allocation2 + $0x1ef] sm:$0xff] }
 0x369   : > { %2595 = vst [vmem:[#allocation2 + $0x210] sm:$0xff] %v7955_v53  ;;  %v3529_v23 = vld [vmem:[#allocation7 + $0x228] sm:$0xff]  ;;  %v7464_v0 = vld [vmem:[#allocation2 + $0x31] sm:$0xff] }
 0x36a   : > { %v5501_v53 = vpack.c.bf16 %v3529_v23, %v3528_v43  ;;  %v3534_v23 = vld [vmem:[#allocation7 + $0x250] sm:$0xff]  ;;  %v3535_v43 = vld [vmem:[#allocation7 + $0x258] sm:$0xff] }
 0x36b   : > { %3831 = vmatmul.mubr.f32.gmra.mrb[94].mxu1 %v7449_v14 }
 0x36c   : > { %3900 = vmatprep.mubr.f32.mxu1 %v7201_v60  ;;  %v3530_v60 = vld [vmem:[#allocation7 + $0x230] sm:$0xff] }
 0x36f   : > { %3901 = vmatmul.mubr.f32.vlgmr.msra.gmra.mrb[32].mxu1 %v2724_v6  ;;  %v3532_v6 = vld [vmem:[#allocation7 + $0x240] sm:$0xff] }
 0x370   : > { %3905 = vmatprep.mubr.f32.mxu1 %v7206_v33  ;;  %5496 = vmatpush1.bf16.msra.mxu1 %v5495_v39  ;;  %v5504_v33 = vpack.c.bf16 %v3531_v5, %v3530_v60  ;;  %v3533_v39 = vld [vmem:[#allocation7 + $0x248] sm:$0xff]  ;;  %v3543_v5 = vld [vmem:[#allocation7 + $0x298] sm:$0xff] }
 0x371   : > { %5497 = vmatprep.subr.bf16.mxu1 %v7974_v8  ;;  %v3541_v60 = vld [vmem:[#allocation7 + $0x288] sm:$0xff] }
 0x373   : > { %3906 = vmatmul.mubr.f32.gmra.mrb[34].mxu1 %v2725_v26  ;;  %v3539_v26 = vld [vmem:[#allocation7 + $0x278] sm:$0xff] }
 0x374   : > { %3910 = vmatprep.mubr.f32.mxu1 %v7211_v38  ;;  %5499 = vmatpush1.bf16.msra.mxu1 %v5498_v31  ;;  %v5507_v38 = vpack.c.bf16 %v3533_v39, %v3532_v6  ;;  %v3536_v31 = vld [vmem:[#allocation7 + $0x260] sm:$0xff]  ;;  %v3547_v6 = vld [vmem:[#allocation7 + $0x2b8] sm:$0xff]  ;;  %v3549_v39 = vld [vmem:[#allocation7 + $0x2c8] sm:$0xff] }
 0x375   : > { %5500 = vmatprep.subr.bf16.mxu1 %v7974_v8 }
 0x377   : > { %3911 = vmatmul.mubr.f32.gmra.mrb[36].mxu1 %v7459_v15 }
 0x378   : > { %3915 = vmatprep.mubr.f32.mxu1 %v7218_v18  ;;  %5502 = vmatpush1.bf16.msra.mxu1 %v5501_v53  ;;  %v5510_v18 = vpack.c.bf16 %v3535_v43, %v3534_v23  ;;  %v3537_v53 = vld [vmem:[#allocation7 + $0x268] sm:$0xff]  ;;  %v3555_v43 = vld [vmem:[#allocation7 + $0x2f8] sm:$0xff] }
 0x379   : > { %5503 = vmatprep.subr.bf16.mxu1 %v7974_v8  ;;  %v3553_v23 = vld [vmem:[#allocation7 + $0x2e8] sm:$0xff] }
 0x37b   : > { %3916 = vmatmul.mubr.f32.gmra.mrb[38].mxu1 %v7464_v0 }
 0x37c   : > { %3920 = vmatprep.mubr.f32.mxu1 %v7227_v1  ;;  %5505 = vmatpush1.bf16.msra.mxu1 %v5504_v33  ;;  %v5513_v1 = vpack.c.bf16 %v3537_v53, %v3536_v31  ;;  %v3545_v33 = vld [vmem:[#allocation7 + $0x2a8] sm:$0xff]  ;;  %v3560_v53 = vld [vmem:[#allocation7 + $0x320] sm:$0xff] }
 0x37d   : > { %5506 = vmatprep.subr.bf16.mxu1 %v7974_v8 }
 0x37f   : > { %3921 = vmatmul.mubr.f32.gmra.mrb[40].mxu1 %v7216_v9  ;;  %v5516_v9 = vpack.c.bf16 %v3539_v26, %v3538_v13  ;;  %v2853_v13 = vld [vmem:[#allocation2 + $0x30] sm:$0xff] }
 0x380   : > { %3925 = vmatprep.mubr.f32.mxu1 %v7234_v36  ;;  %5508 = vmatpush1.bf16.msra.mxu1 %v5507_v38  ;;  %v3540_v36 = vld [vmem:[#allocation7 + $0x280] sm:$0xff]  ;;  %v3551_v38 = vld [vmem:[#allocation7 + $0x2d8] sm:$0xff] }
 0x381   : > { %5509 = vmatprep.subr.bf16.mxu1 %v7974_v8 }
 0x383   : > { %3926 = vmatmul.mubr.f32.gmra.mrb[42].mxu1 %v7220_v2  ;;  %v5519_v2 = vpack.c.bf16 %v3541_v60, %v3540_v36  ;;  %v3563_v36 = vld [vmem:[#allocation7 + $0x338] sm:$0xff]  ;;  %v7568_v60 = vld [vmem:[#allocation2 + $0x48] sm:$0xff] }
 0x384   : > { %3930 = vmatprep.mubr.f32.mxu1 %v7243_v56  ;;  %5511 = vmatpush1.bf16.msra.mxu1 %v5510_v18  ;;  %v3542_v56 = vld [vmem:[#allocation7 + $0x290] sm:$0xff] }
 0x385   : > { %5512 = vmatprep.subr.bf16.mxu1 %v7974_v8 }
 0x387   : > { %3931 = vmatmul.mubr.f32.gmra.mrb[44].mxu1 %v7232_v32  ;;  %v5522_v32 = vpack.c.bf16 %v3543_v5, %v3542_v56 }
 0x388   : > { %3935 = vmatprep.mubr.f32.mxu1 %v7250_v44  ;;  %5514 = vmatpush1.bf16.msra.mxu1 %v5513_v1  ;;  %v3544_v44 = vld [vmem:[#allocation7 + $0x2a0] sm:$0xff]  ;;  %v3561_v1 = vld [vmem:[#allocation7 + $0x328] sm:$0xff] }
 0x389   : > { %5515 = vmatprep.subr.bf16.mxu1 %v7974_v8  ;;  %v5549_v26 = vpack.c.bf16 %v3561_v1, %v3560_v53  ;;  %v7600_v53 = vld [vmem:[#allocation2 + $0x90] sm:$0xff] }
 0x38a   : > { %v2924_v1 = vld [vmem:[#allocation2 + $0xa9] sm:$0xff] }
 0x38b   : > { %3936 = vmatmul.mubr.f32.gmra.mrb[46].mxu1 %v7236_v17  ;;  %v5525_v17 = vpack.c.bf16 %v3545_v33, %v3544_v44  ;;  %v3565_v44 = vld [vmem:[#allocation7 + $0x348] sm:$0xff]  ;;  %v7576_v33 = vld [vmem:[#allocation2 + $0x50] sm:$0xff] }
 0x38c   : > { %3940 = vmatprep.mubr.f32.mxu1 %v7259_v62  ;;  %5517 = vmatpush1.bf16.msra.mxu1 %v5516_v9  ;;  %v3546_v62 = vld [vmem:[#allocation7 + $0x2b0] sm:$0xff] }
 0x38d   : > { %5518 = vmatprep.subr.bf16.mxu1 %v7974_v8  ;;  %v3562_v9 = vld [vmem:[#allocation7 + $0x330] sm:$0xff] }
 0x38e   : > { %v5552_v5 = vpack.c.bf16 %v3563_v36, %v3562_v9  ;;  %v7604_v9 = vld [vmem:[#allocation2 + $0xa8] sm:$0xff] }
 0x38f   : > { %3941 = vmatmul.mubr.f32.gmra.mrb[48].mxu1 %v7248_v27  ;;  %v5528_v27 = vpack.c.bf16 %v3547_v6, %v3546_v62  ;;  %v3566_v6 = vld [vmem:[#allocation7 + $0x350] sm:$0xff] }
 0x390   : > { %3945 = vmatprep.mubr.f32.mxu1 %v7266_v49  ;;  %5520 = vmatpush1.bf16.msra.mxu1 %v5519_v2  ;;  %v3548_v49 = vld [vmem:[#allocation7 + $0x2c0] sm:$0xff] }
 0x391   : > { %5521 = vmatprep.subr.bf16.mxu1 %v7974_v8 }
 0x393   : > { %3946 = vmatmul.mubr.f32.gmra.mrb[50].mxu1 %v7252_v12  ;;  %v5531_v12 = vpack.c.bf16 %v3549_v39, %v3548_v49  ;;  %v7580_v49 = vld [vmem:[#allocation2 + $0x68] sm:$0xff] }
 0x394   : > { %3950 = vmatprep.mubr.f32.mxu1 %v7275_v54  ;;  %5523 = vmatpush1.bf16.msra.mxu1 %v5522_v32  ;;  %v3550_v54 = vld [vmem:[#allocation7 + $0x2d0] sm:$0xff]  ;;  %v3564_v32 = vld [vmem:[#allocation7 + $0x340] sm:$0xff] }
 0x395   : > { %5524 = vmatprep.subr.bf16.mxu1 %v7974_v8  ;;  %v5555_v62 = vpack.c.bf16 %v3565_v44, %v3564_v32  ;;  %v3576_v44 = vld [vmem:[#allocation7 + $0x3a0] sm:$0xff] }
 0x397   : > { %3951 = vmatmul.mubr.f32.gmra.mrb[52].mxu1 %v7264_v48  ;;  %v5534_v48 = vpack.c.bf16 %v3551_v38, %v3550_v54 }
 0x398   : > { %3955 = vmatprep.mubr.f32.mxu1 %v7282_v58  ;;  %5526 = vmatpush1.bf16.msra.mxu1 %v5525_v17  ;;  %v3552_v58 = vld [vmem:[#allocation7 + $0x2e0] sm:$0xff]  ;;  %v2920_v17 = vld [vmem:[#allocation2 + $0x69] sm:$0xff] }
 0x399   : > { %5527 = vmatprep.subr.bf16.mxu1 %v7974_v8 }
 0x39b   : > { %3956 = vmatmul.mubr.f32.gmra.mrb[54].mxu1 %v7268_v46  ;;  %v5537_v46 = vpack.c.bf16 %v3553_v23, %v3552_v58  ;;  %v3569_v58 = vld [vmem:[#allocation7 + $0x368] sm:$0xff]  ;;  %v7588_v23 = vld [vmem:[#allocation2 + $0x70] sm:$0xff] }
 0x39c   : > { %3960 = vmatprep.mubr.f32.mxu1 %v7291_v52  ;;  %5529 = vmatpush1.bf16.msra.mxu1 %v5528_v27  ;;  %v3554_v52 = vld [vmem:[#allocation7 + $0x2f0] sm:$0xff]  ;;  %v3567_v27 = vld [vmem:[#allocation7 + $0x358] sm:$0xff] }
 0x39d   : > { %5530 = vmatprep.subr.bf16.mxu1 %v7974_v8  ;;  %v5558_v38 = vpack.c.bf16 %v3567_v27, %v3566_v6  ;;  %v2926_v6 = vld [vmem:[#allocation2 + $0xc9] sm:$0xff] }
 0x39f   : > { %3961 = vmatmul.mubr.f32.gmra.mrb[56].mxu1 %v7280_v63  ;;  %v5540_v63 = vpack.c.bf16 %v3555_v43, %v3554_v52  ;;  %v3570_v43 = vld [vmem:[#allocation7 + $0x370] sm:$0xff] }
 0x3a0   : > { %3965 = vmatprep.mubr.f32.mxu1 %v7298_v59  ;;  %5532 = vmatpush1.bf16.msra.mxu1 %v5531_v12  ;;  %v2921_v12 = vld [vmem:[#allocation2 + $0x71] sm:$0xff] }
 0x3a1   : > { %5533 = vmatprep.subr.bf16.mxu1 %v7974_v8 }
 0x3a3   : > { %3966 = vmatmul.mubr.f32.gmra.mrb[58].mxu1 %v7284_v19 }
 0x3a4   : > { %3970 = vmatprep.mubr.f32.mxu1 %v7307_v34  ;;  %5535 = vmatpush1.bf16.msra.mxu1 %v5534_v48  ;;  %v3568_v48 = vld [vmem:[#allocation7 + $0x360] sm:$0xff] }
 0x3a5   : > { %5536 = vmatprep.subr.bf16.mxu1 %v7974_v8  ;;  %v5561_v52 = vpack.c.bf16 %v3569_v58, %v3568_v48  ;;  %v7616_v48 = vld [vmem:[#allocation2 + $0xc8] sm:$0xff] }
 0x3a7   : > { %3971 = vmatmul.mubr.f32.gmra.mrb[60].mxu1 %v7296_v57  ;;  %v8003_v57 = vld [vmem:[#allocation26_spill] sm:$0xff] }
 0x3a8   : > { %3975 = vmatprep.mubr.f32.mxu1 %v7314_v16  ;;  %5538 = vmatpush1.bf16.msra.mxu1 %v5537_v46  ;;  %v2922_v46 = vld [vmem:[#allocation2 + $0x89] sm:$0xff] }
 0x3a9   : > { %5539 = vmatprep.subr.bf16.mxu1 %v7974_v8 }
 0x3ab   : > { %3976 = vmatmul.mubr.f32.gmra.mrb[62].mxu1 %v7300_v4  ;;  %v7533_v4 = vld [vmem:[#allocation2 + $0x1c9] sm:$0xff] }
 0x3ac   : > { %3980 = vmatprep.mubr.f32.mxu1 %v7323_v29  ;;  %5541 = vmatpush1.bf16.msra.mxu1 %v5540_v63  ;;  %v7544_v29 = vld [vmem:[#allocation2 + $0x207] sm:$0xff]  ;;  %v3571_v63 = vld [vmem:[#allocation7 + $0x378] sm:$0xff] }
 0x3ad   : > { %5542 = vmatprep.subr.bf16.mxu1 %v7974_v8 }
 0x3af   : > { %3981 = vmatmul.mubr.f32.gmra.mrb[64].mxu1 %v7312_v28  ;;  %v8002_v28 = vld [vmem:[#allocation23_spill] sm:$0xff] }
 0x3b0   : > { %3985 = vmatprep.mubr.f32.mxu1 %v7330_v37  ;;  %v7547_v37 = vld [vmem:[#allocation2 + $0x1e9] sm:$0xff] }
 0x3b3   : > { %3986 = vmatmul.mubr.f32.gmra.mrb[66].mxu1 %v7316_v11  ;;  %v7541_v11 = vld [vmem:[#allocation2 + $0x1d1] sm:$0xff] }
 0x3b4   : > { %3990 = vmatprep.mubr.f32.mxu1 %v7339_v30 }
 0x3b7   : > { %3991 = vmatmul.mubr.f32.gmra.mrb[68].mxu1 %v7328_v35 }
 0x3b8   : > { %3995 = vmatprep.mubr.f32.mxu1 %v7346_v41  ;;  %v7552_v41 = vld [vmem:[#allocation2 + $0x20f] sm:$0xff] }
 0x3bb   : > { %3996 = vmatmul.mubr.f32.gmra.mrb[70].mxu1 %v7332_v47 }
 0x3bc   : > { %4000 = vmatprep.mubr.f32.mxu1 %v7355_v3 }
 0x3bf   : > { %4001 = vmatmul.mubr.f32.gmra.mrb[72].mxu1 %v7344_v42 }
 0x3c0   : > { %4005 = vmatprep.mubr.f32.mxu1 %v7362_v50  ;;  %v3556_v50 = vld [vmem:[#allocation7 + $0x300] sm:$0xff] }
 0x3c3   : > { %4006 = vmatmul.mubr.f32.gmra.mrb[74].mxu1 %v7348_v45 }
 0x3c4   : > { %4010 = vmatprep.mubr.f32.mxu1 %v7373_v10  ;;  %v3557_v10 = vld [vmem:[#allocation7 + $0x308] sm:$0xff] }
 0x3c7   : > { %4011 = vmatmul.mubr.f32.gmra.mrb[76].mxu1 %v7360_v7 }
 0x3c8   : > { %4015 = vmatprep.mubr.f32.mxu1 %v7383_v51  ;;  %v8004_v51 = vld [vmem:[#allocation27_spill] sm:$0xff] }
 0x3cb   : > { %4016 = vmatmul.mubr.f32.gmra.mrb[78].mxu1 %v7364_v20 }
 0x3cc   : > { %4020 = vmatprep.mubr.f32.mxu1 %v7396_v61  ;;  %v5543_v61 = vpack.c.bf16 %v3557_v10, %v3556_v50  ;;  %v7592_v50 = vld [vmem:[#allocation2 + $0x88] sm:$0xff] }
 0x3cf   : > { %4021 = vmatmul.mubr.f32.gmra.mrb[80].mxu1 %v7381_v40 }
 0x3d0   : > { %4025 = vmatprep.mubr.f32.mxu1 %v7407_v21  ;;  %v3559_v21 = vld [vmem:[#allocation7 + $0x318] sm:$0xff] }
 0x3d3   : > { %4026 = vmatmul.mubr.f32.gmra.mrb[82].mxu1 %v8002_v28 }
 0x3d4   : > { %4030 = vmatprep.mubr.f32.mxu1 %v7420_v22  ;;  %v7557_v22 = vld [vmem:[#allocation2 + $0x1f1] sm:$0xff] }
 0x3d5   : > { %v7525_v19 = vpop.f32.mrb[64].mxu0 }
 0x3d6   : > { %v7528_v59 = vpop.f32.mrb[65].mxu0 }
 0x3d7   : > { %4031 = vmatmul.mubr.f32.gmra.mrb[84].mxu1 %v8003_v57 }
 0x3d8   : > { %4035 = vmatprep.mubr.f32.mxu1 %v7429_v55  ;;  %v2852_v55 = vld [vmem:[#allocation2 + $0x28] sm:$0xff] }
 0x3db   : > { %4036 = vmatmul.mubr.f32.gmra.mrb[86].mxu1 %v8004_v51 }
 0x3dc   : > { %4040 = vmatprep.mubr.f32.mxu1 %v7439_v24  ;;  %v3558_v24 = vld [vmem:[#allocation7 + $0x310] sm:$0xff] }
 0x3dd   : > { %v7535_v34 = vpop.f32.mrb[66].mxu0  ;;  %v5546_v31 = vpack.c.bf16 %v3559_v21, %v3558_v24  ;;  %v5564_v21 = vpack.c.bf16 %v3571_v63, %v3570_v43  ;;  %v3580_v63 = vld [vmem:[#allocation7 + $0x3c0] sm:$0xff] }
 0x3de   : > { %v7538_v16 = vpop.f32.mrb[67].mxu0 }
 0x3df   : > { %4041 = vmatmul.mubr.f32.gmra.mrb[88].mxu1 %v7533_v4 }
 0x3e0   : > { %4045 = vmatprep.mubr.f32.mxu1 %v7449_v14 }
 0x3e3   : > { %4046 = vmatmul.mubr.f32.gmra.mrb[90].mxu1 %v7541_v11 }
 0x3e4   : > { %4050 = vmatprep.mubr.f32.mxu1 %v7544_v29 }
 0x3e5   : > { %v7549_v30 = vpop.f32.mrb[68].mxu0 }
 0x3e6   : > { %v7554_v3 = vpop.f32.mrb[69].mxu0 }
 0x3e7   : > { %4051 = vmatmul.mubr.f32.gmra.mrb[92].mxu1 %v7547_v37 }
 0x3e8   : > { %4055 = vmatprep.mubr.f32.mxu1 %v7552_v41 }
 0x3eb   : > { %4056 = vmatmul.mubr.f32.gmra.mrb[94].mxu1 %v7557_v22 }
 0x3ec   : > { %4125 = vmatprep.mubr.f32.mxu1 %v7459_v15  ;;  %v2918_v15 = vld [vmem:[#allocation2 + $0x49] sm:$0xff] }
 0x3ed   : > { %v7561_v14 = vpop.f32.mrb[70].mxu0 }
 0x3ee   : > { %v7563_v18 = vpop.f32.mrb[71].mxu0 }
 0x3ef   : > { %4126 = vmatmul.mubr.f32.vlgmr.msra.gmra.mrb[32].mxu1 %v2852_v55  ;;  %v3572_v55 = vld [vmem:[#allocation7 + $0x380] sm:$0xff] }
 0x3f0   : > { %4130 = vmatprep.mubr.f32.mxu1 %v7464_v0  ;;  %5544 = vmatpush1.bf16.msra.mxu1 %v5543_v61  ;;  %v2919_v0 = vld [vmem:[#allocation2 + $0x51] sm:$0xff] }
 0x3f1   : > { %5545 = vmatprep.subr.bf16.mxu1 %v7974_v8  ;;  %v2923_v61 = vld [vmem:[#allocation2 + $0x91] sm:$0xff] }
 0x3f3   : > { %4131 = vmatmul.mubr.f32.gmra.mrb[34].mxu1 %v2853_v13 }
 0x3f4   : > { %4135 = vmatprep.mubr.f32.mxu1 %v2918_v15  ;;  %5547 = vmatpush1.bf16.msra.mxu1 %v5546_v31  ;;  %v3573_v31 = vld [vmem:[#allocation7 + $0x388] sm:$0xff]  ;;  %v3574_v15 = vld [vmem:[#allocation7 + $0x390] sm:$0xff] }
 0x3f5   : > { %5548 = vmatprep.subr.bf16.mxu1 %v7974_v8  ;;  %v7570_v2 = vpop.f32.mrb[72].mxu0  ;;  %v5567_v13 = vpack.c.bf16 %v3573_v31, %v3572_v55  ;;  %v2928_v55 = vld [vmem:[#allocation2 + $0xe9] sm:$0xff] }
 0x3f6   : > { %v7573_v56 = vpop.f32.mrb[73].mxu0 }
 0x3f7   : > { %4136 = vmatmul.mubr.f32.gmra.mrb[36].mxu1 %v7568_v60 }
 0x3f8   : > { %4140 = vmatprep.mubr.f32.mxu1 %v2919_v0  ;;  %5550 = vmatpush1.bf16.msra.mxu1 %v5549_v26  ;;  %v3575_v26 = vld [vmem:[#allocation7 + $0x398] sm:$0xff] }
 0x3f9   : > { %5551 = vmatprep.subr.bf16.mxu1 %v7974_v8  ;;  %v2925_v0 = vld [vmem:[#allocation2 + $0xb1] sm:$0xff]  ;;  %v5570_v32 = vpack.c.bf16 %v3575_v26, %v3574_v15  ;;  %v7628_v15 = vld [vmem:[#allocation2 + $0xe8] sm:$0xff] }
 0x3fb   : > { %4141 = vmatmul.mubr.f32.gmra.mrb[38].mxu1 %v7576_v33 }
 0x3fc   : > { %4145 = vmatprep.mubr.f32.mxu1 %v2920_v17  ;;  %5553 = vmatpush1.bf16.msra.mxu1 %v5552_v5  ;;  %v3577_v17 = vld [vmem:[#allocation7 + $0x3a8] sm:$0xff] }
 0x3fd   : > { %5554 = vmatprep.subr.bf16.mxu1 %v7974_v8  ;;  %v7582_v39 = vpop.f32.mrb[74].mxu0  ;;  %v5573_v27 = vpack.c.bf16 %v3577_v17, %v3576_v44  ;;  %v3584_v17 = vld [vmem:[#allocation7 + $0x3e0] sm:$0xff] }
 0x3fe   : > { %v7585_v54 = vpop.f32.mrb[75].mxu0 }
 0x3ff   : > { %4146 = vmatmul.mubr.f32.gmra.mrb[40].mxu1 %v7580_v49 }
 0x400   : > { %4150 = vmatprep.mubr.f32.mxu1 %v2921_v12  ;;  %5556 = vmatpush1.bf16.msra.mxu1 %v5555_v62  ;;  %v7612_v62 = vld [vmem:[#allocation2 + $0xb0] sm:$0xff] }
 0x401   : > { %5557 = vmatprep.subr.bf16.mxu1 %v7974_v8  ;;  %v3578_v12 = vld [vmem:[#allocation7 + $0x3b0] sm:$0xff] }
 0x403   : > { %4151 = vmatmul.mubr.f32.gmra.mrb[42].mxu1 %v7588_v23 }
 0x404   : > { %4155 = vmatprep.mubr.f32.mxu1 %v2922_v46  ;;  %5559 = vmatpush1.bf16.msra.mxu1 %v5558_v38  ;;  %v3579_v38 = vld [vmem:[#allocation7 + $0x3b8] sm:$0xff] }
 0x405   : > { %5560 = vmatprep.subr.bf16.mxu1 %v7974_v8  ;;  %v7594_v10 = vpop.f32.mrb[76].mxu0  ;;  %v2927_v46 = vld [vmem:[#allocation2 + $0xd1] sm:$0xff]  ;;  %v5576_v43 = vpack.c.bf16 %v3579_v38, %v3578_v12  ;;  %v2930_v12 = vld [vmem:[#allocation2 + $0x109] sm:$0xff] }
 0x406   : > { %v7597_v24 = vpop.f32.mrb[77].mxu0 }
 0x407   : > { %4156 = vmatmul.mubr.f32.gmra.mrb[44].mxu1 %v7592_v50 }
 0x408   : > { %4160 = vmatprep.mubr.f32.mxu1 %v2923_v61  ;;  %5562 = vmatpush1.bf16.msra.mxu1 %v5561_v52  ;;  %v3581_v61 = vld [vmem:[#allocation7 + $0x3c8] sm:$0xff] }
 0x409   : > { %5563 = vmatprep.subr.bf16.mxu1 %v7974_v8  ;;  %v5579_v31 = vpack.c.bf16 %v3581_v61, %v3580_v63  ;;  %v7640_v63 = vld [vmem:[#allocation2 + $0x108] sm:$0xff] }
 0x40b   : > { %4161 = vmatmul.mubr.f32.gmra.mrb[46].mxu1 %v7600_v53 }
 0x40c   : > { %4165 = vmatprep.mubr.f32.mxu1 %v2924_v1  ;;  %5565 = vmatpush1.bf16.msra.mxu1 %v5564_v21  ;;  %v7624_v21 = vld [vmem:[#allocation2 + $0xd0] sm:$0xff] }
 0x40d   : > { %5566 = vmatprep.subr.bf16.mxu1 %v7974_v8  ;;  %v7606_v36 = vpop.f32.mrb[78].mxu0  ;;  %v3582_v1 = vld [vmem:[#allocation7 + $0x3d0] sm:$0xff] }
 0x40e   : > { %v7609_v5 = vpop.f32.mrb[79].mxu0 }
 0x40f   : > { %4166 = vmatmul.mubr.f32.gmra.mrb[48].mxu1 %v7604_v9 }
 0x410   : > { %4170 = vmatprep.mubr.f32.mxu1 %v2925_v0  ;;  %5568 = vmatpush1.bf16.msra.mxu1 %v5567_v13  ;;  %v3583_v13 = vld [vmem:[#allocation7 + $0x3d8] sm:$0xff] }
 0x411   : > { %5569 = vmatprep.subr.bf16.mxu1 %v7974_v8  ;;  %v2929_v0 = vld [vmem:[#allocation2 + $0xf1] sm:$0xff]  ;;  %v5582_v44 = vpack.c.bf16 %v3583_v13, %v3582_v1 }
 0x412   : > { %v7648_v13 = vld [vmem:[#allocation2 + $0x110] sm:$0xff] }
 0x413   : > { %4171 = vmatmul.mubr.f32.gmra.mrb[50].mxu1 %v7612_v62 }
 0x414   : > { %4175 = vmatprep.mubr.f32.mxu1 %v2926_v6  ;;  %5571 = vmatpush1.bf16.msra.mxu1 %v5570_v32  ;;  %v3585_v6 = vld [vmem:[#allocation7 + $0x3e8] sm:$0xff] }
 0x415   : > { %5572 = vmatprep.subr.bf16.mxu1 %v7974_v8  ;;  %v7618_v58 = vpop.f32.mrb[80].mxu0  ;;  %v5585_v38 = vpack.c.bf16 %v3585_v6, %v3584_v17 }
 0x416   : > { %v7621_v52 = vpop.f32.mrb[81].mxu0 }
 0x417   : > { %4176 = vmatmul.mubr.f32.gmra.mrb[52].mxu1 %v7616_v48 }
 0x418   : > { %4180 = vmatprep.mubr.f32.mxu1 %v2927_v46  ;;  %5574 = vmatpush1.bf16.msra.mxu1 %v5573_v27  ;;  %v7636_v27 = vld [vmem:[#allocation2 + $0xf0] sm:$0xff] }
 0x419   : > { %5575 = vmatprep.subr.bf16.mxu1 %v7974_v8  ;;  %v3586_v46 = vld [vmem:[#allocation7 + $0x3f0] sm:$0xff] }
 0x41b   : > { %4181 = vmatmul.mubr.f32.gmra.mrb[54].mxu1 %v7624_v21 }
 0x41c   : > { %4185 = vmatprep.mubr.f32.mxu1 %v2928_v55  ;;  %5577 = vmatpush1.bf16.msra.mxu1 %v5576_v43  ;;  %v3587_v43 = vld [vmem:[#allocation7 + $0x3f8] sm:$0xff] }
 0x41d   : > { %5578 = vmatprep.subr.bf16.mxu1 %v7974_v8  ;;  %v7630_v26 = vpop.f32.mrb[82].mxu0  ;;  %v2931_v55 = vld [vmem:[#allocation2 + $0x111] sm:$0xff]  ;;  %v5588_v1 = vpack.c.bf16 %v3587_v43, %v3586_v46  ;;  %v8009_v46 = vld [vmem:[#allocation25_spill] sm:$0xff]  ;;  %v7700_v43 = vld [vmem:[#allocation2 + $0x209] sm:$0xff] }
 0x41e   : > { %v7633_v32 = vpop.f32.mrb[83].mxu0 }
 0x41f   : > { %4186 = vmatmul.mubr.f32.gmra.mrb[56].mxu1 %v7628_v15 }
 0x420   : > { %4190 = vmatprep.mubr.f32.mxu1 %v2929_v0  ;;  %5580 = vmatpush1.bf16.msra.mxu1 %v5579_v31  ;;  %v8005_v0 = vld [vmem:[#allocation13_spill] sm:$0xff] }
 0x421   : > { %5581 = vmatprep.subr.bf16.mxu1 %v7974_v8 }
 0x423   : > { %4191 = vmatmul.mubr.f32.gmra.mrb[58].mxu1 %v7636_v27 }
 0x424   : > { %4195 = vmatprep.mubr.f32.mxu1 %v2930_v12  ;;  %5583 = vmatpush1.bf16.msra.mxu1 %v5582_v44  ;;  %v7653_v44 = vld [vmem:[#allocation2 + $0x128] sm:$0xff]  ;;  %v7669_v12 = vld [vmem:[#allocation2 + $0x150] sm:$0xff] }
 0x425   : > { %5584 = vmatprep.subr.bf16.mxu1 %v7974_v8  ;;  %v7642_v61 = vpop.f32.mrb[84].mxu0 }
 0x426   : > { %v7645_v31 = vpop.f32.mrb[85].mxu0 }
 0x427   : > { %4196 = vmatmul.mubr.f32.gmra.mrb[60].mxu1 %v7640_v63 }
 0x428   : > { %4200 = vmatprep.mubr.f32.mxu1 %v2931_v55  ;;  %5586 = vmatpush1.bf16.msra.mxu1 %v5585_v38  ;;  %v7673_v38 = vld [vmem:[#allocation2 + $0x168] sm:$0xff] }
 0x429   : > { %5587 = vmatprep.subr.bf16.mxu1 %v7974_v8  ;;  %v7661_v8 = vld [vmem:[#allocation2 + $0x130] sm:$0xff] }
 0x42b   : > { %4201 = vmatmul.mubr.f32.gmra.mrb[62].mxu1 %v7648_v13 }
 0x42c   : > { %4205 = vmatprep.mubr.f32.mxu1 %v7328_v35  ;;  %5589 = vmatpush1.bf16.msra.mxu1 %v5588_v1  ;;  %v7665_v35 = vld [vmem:[#allocation2 + $0x148] sm:$0xff]  ;;  %v7705_v1 = vld [vmem:[#allocation2 + $0x211] sm:$0xff] }
 0x42d   : > { %5622 = vmatprep.subr.bf16.mxu1 %v8005_v0 }
 0x42e   : > { %v7655_v17 = vpop.f32.mrb[86].mxu0 }
 0x42f   : > { %4206 = vmatmul.mubr.f32.gmra.mrb[64].mxu1 %v7653_v44  ;;  %v7658_v6 = vpop.f32.mrb[87].mxu0 }
 0x430   : > { %4210 = vmatprep.mubr.f32.mxu1 %v7332_v47  ;;  %v7677_v47 = vld [vmem:[#allocation2 + $0x170] sm:$0xff] }
 0x433   : > { %4211 = vmatmul.mubr.f32.gmra.mrb[66].mxu1 %v7661_v8 }
 0x434   : > { %4215 = vmatprep.mubr.f32.mxu1 %v7344_v42  ;;  %v7681_v42 = vld [vmem:[#allocation2 + $0x188] sm:$0xff] }
 0x437   : > { %4216 = vmatmul.mubr.f32.gmra.mrb[68].mxu1 %v7665_v35 }
 0x438   : > { %4220 = vmatprep.mubr.f32.mxu1 %v7348_v45  ;;  %v7685_v45 = vld [vmem:[#allocation2 + $0x190] sm:$0xff] }
 0x43b   : > { %4221 = vmatmul.mubr.f32.gmra.mrb[70].mxu1 %v7669_v12 }
 0x43c   : > { %4225 = vmatprep.mubr.f32.mxu1 %v7360_v7  ;;  %v8006_v7 = vld [vmem:[#allocation21_spill] sm:$0xff] }
 0x43f   : > { %4226 = vmatmul.mubr.f32.gmra.mrb[72].mxu1 %v7673_v38 }
 0x440   : > { %4230 = vmatprep.mubr.f32.mxu1 %v7364_v20  ;;  %v8007_v20 = vld [vmem:[#allocation22_spill] sm:$0xff] }
 0x443   : > { %4231 = vmatmul.mubr.f32.gmra.mrb[74].mxu1 %v7677_v47 }
 0x444   : > { %4235 = vmatprep.mubr.f32.mxu1 %v7381_v40  ;;  %v8008_v40 = vld [vmem:[#allocation24_spill] sm:$0xff] }
 0x447   : > { %4236 = vmatmul.mubr.f32.gmra.mrb[76].mxu1 %v7681_v42 }
 0x448   : > { %4240 = vmatprep.mubr.f32.mxu1 %v8002_v28  ;;  %v8010_v28 = vld [vmem:[#allocation28_spill] sm:$0xff] }
 0x44b   : > { %4241 = vmatmul.mubr.f32.gmra.mrb[78].mxu1 %v7685_v45 }
 0x44c   : > { %4245 = vmatprep.mubr.f32.mxu1 %v8003_v57  ;;  %v8011_v57 = vld [vmem:[#allocation29_spill] sm:$0xff] }
 0x44f   : > { %4246 = vmatmul.mubr.f32.gmra.mrb[80].mxu1 %v8006_v7  ;;  %v8014_v7 = vmax.f32 %v7444_v25, 0.0  ;;  %v2982_v25 = vld [vmem:[#allocation2 + $0x67] sm:$0xff] }
 0x450   : > { %4250 = vmatprep.mubr.f32.mxu1 %v8004_v51  ;;  %v8012_v51 = vld [vmem:[#allocation30_spill] sm:$0xff] }
 0x451   : > { %v8013_v55 = vmax.f32 %v8012_v51, 0.0  ;;  %v8020_v51 = vld [vmem:[#allocation19_spill] sm:$0xff] }
 0x453   : > { %4251 = vmatmul.mubr.f32.gmra.mrb[82].mxu1 %v8007_v20  ;;  %v2980_v20 = vld [vmem:[#allocation2 + $0x47] sm:$0xff] }
 0x454   : > { %4255 = vmatprep.mubr.f32.mxu1 %v7533_v4 }
 0x457   : > { %4256 = vmatmul.mubr.f32.gmra.mrb[84].mxu1 %v8008_v40  ;;  %v8015_v40 = vld [vmem:[#allocation14_spill] sm:$0xff] }
 0x458   : > { %4260 = vmatprep.mubr.f32.mxu1 %v7541_v11 }
 0x45b   : > { %4261 = vmatmul.mubr.f32.gmra.mrb[86].mxu1 %v8009_v46  ;;  %v2981_v46 = vld [vmem:[#allocation2 + $0x4f] sm:$0xff] }
 0x45c   : > { %4265 = vmatprep.mubr.f32.mxu1 %v7547_v37 }
 0x45f   : > { %4266 = vmatmul.mubr.f32.gmra.mrb[88].mxu1 %v8010_v28  ;;  %v8016_v28 = vld [vmem:[#allocation15_spill] sm:$0xff] }
 0x460   : > { %4270 = vmatprep.mubr.f32.mxu1 %v7557_v22 }
 0x463   : > { %4271 = vmatmul.mubr.f32.gmra.mrb[90].mxu1 %v8011_v57  ;;  %v8019_v57 = vld [vmem:[#allocation18_spill] sm:$0xff] }
 0x464   : > { %4275 = vmatprep.mubr.f32.mxu1 %v7700_v43 }
 0x467   : > { %4276 = vmatmul.mubr.f32.gmra.mrb[92].mxu1 %v8013_v55  ;;  %v8021_v55 = vld [vmem:[#allocation20_spill] sm:$0xff] }
 0x468   : > { %4280 = vmatprep.mubr.f32.mxu1 %v7705_v1 }
 0x46b   : > { %4281 = vmatmul.mubr.f32.gmra.mrb[94].mxu1 %v8014_v7  ;;  %v2988_v7 = vld [vmem:[#allocation2 + $0xc7] sm:$0xff] }
 0x46c   : > { %4350 = vmatprep.mubr.f32.mxu1 %v7568_v60  ;;  %v8017_v60 = vld [vmem:[#allocation16_spill] sm:$0xff] }
 0x46f   : > { %4351 = vmatmul.mubr.f32.vlgmr.msra.gmra.mrb[32].mxu1 %v2980_v20  ;;  %v2990_v20 = vld [vmem:[#allocation2 + $0xe7] sm:$0xff] }
 0x470   : > { %4355 = vmatprep.mubr.f32.mxu1 %v7576_v33  ;;  %5630 = vmatpush3.bf16.msra.mxu1 %v8005_v0  ;;  %v2983_v33 = vld [vmem:[#allocation2 + $0x6f] sm:$0xff]  ;;  %v8018_v0 = vld [vmem:[#allocation17_spill] sm:$0xff] }
 0x471   : > { %5623 = vmatprep.subr.bf16.mxu1 %v8015_v40 }
 0x473   : > { %4356 = vmatmul.mubr.f32.gmra.mrb[34].mxu1 %v2981_v46  ;;  %v3066_v46 = vld [vmem:[#allocation2 + $0x1a8] sm:$0xff] }
 0x474   : > { %4360 = vmatprep.mubr.f32.mxu1 %v7580_v49  ;;  %5631 = vmatpush3.bf16.msra.mxu1 %v8015_v40  ;;  %v2984_v49 = vld [vmem:[#allocation2 + $0x87] sm:$0xff] }
 0x475   : > { %5624 = vmatprep.subr.bf16.mxu1 %v8016_v28  ;;  %v2992_v40 = vld [vmem:[#allocation2 + $0x107] sm:$0xff] }
 0x477   : > { %4361 = vmatmul.mubr.f32.gmra.mrb[36].mxu1 %v2982_v25  ;;  %v3068_v25 = vld [vmem:[#allocation2 + $0x1c8] sm:$0xff] }
 0x478   : > { %4365 = vmatprep.mubr.f32.mxu1 %v7588_v23  ;;  %5632 = vmatpush3.bf16.msra.mxu1 %v8016_v28  ;;  %v2985_v23 = vld [vmem:[#allocation2 + $0x8f] sm:$0xff] }
 0x479   : > { %5625 = vmatprep.subr.bf16.mxu1 %v8017_v60  ;;  %v3067_v28 = vld [vmem:[#allocation2 + $0x1b0] sm:$0xff] }
 0x47b   : > { %4366 = vmatmul.mubr.f32.gmra.mrb[38].mxu1 %v2983_v33  ;;  %v3070_v33 = vld [vmem:[#allocation2 + $0x1e8] sm:$0xff] }
 0x47c   : > { %4370 = vmatprep.mubr.f32.mxu1 %v7592_v50  ;;  %5633 = vmatpush3.bf16.msra.mxu1 %v8017_v60  ;;  %v2986_v50 = vld [vmem:[#allocation2 + $0xa7] sm:$0xff]  ;;  %v3069_v60 = vld [vmem:[#allocation2 + $0x1d0] sm:$0xff] }
 0x47d   : > { %5626 = vmatprep.subr.bf16.mxu1 %v8018_v0 }
 0x47f   : > { %4371 = vmatmul.mubr.f32.gmra.mrb[40].mxu1 %v2984_v49  ;;  %v3007_v49 = vld [vmem:[#allocation2 + $0x1ef] sm:$0xff] }
 0x480   : > { %4375 = vmatprep.mubr.f32.mxu1 %v7600_v53  ;;  %5634 = vmatpush3.bf16.msra.mxu1 %v8018_v0  ;;  %v2987_v53 = vld [vmem:[#allocation2 + $0xaf] sm:$0xff] }
 0x481   : > { %5627 = vmatprep.subr.bf16.mxu1 %v8019_v57  ;;  %v3071_v0 = vld [vmem:[#allocation2 + $0x1f0] sm:$0xff] }
 0x483   : > { %4376 = vmatmul.mubr.f32.gmra.mrb[42].mxu1 %v2985_v23  ;;  %v3073_v23 = vld [vmem:[#allocation2 + $0x210] sm:$0xff] }
 0x484   : > { %4380 = vmatprep.mubr.f32.mxu1 %v7604_v9  ;;  %5635 = vmatpush3.bf16.msra.mxu1 %v8019_v57  ;;  %v2989_v9 = vld [vmem:[#allocation2 + $0xcf] sm:$0xff] }
 0x485   : > { %5628 = vmatprep.subr.bf16.mxu1 %v8020_v51  ;;  %v3072_v57 = vld [vmem:[#allocation2 + $0x208] sm:$0xff] }
 0x487   : > { %4381 = vmatmul.mubr.f32.gmra.mrb[44].mxu1 %v2986_v50  ;;  %v3010_v50 = vld [vmem:[#allocation2 + $0x227] sm:$0xff] }
 0x488   : > { %4385 = vmatprep.mubr.f32.mxu1 %v7612_v62  ;;  %5636 = vmatpush3.bf16.msra.mxu1 %v8020_v51  ;;  %v2991_v62 = vld [vmem:[#allocation2 + $0xef] sm:$0xff] }
 0x489   : > { %5629 = vmatprep.subr.bf16.mxu1 %v8021_v55  ;;  %v6153_v51 = vld [vmem:[#allocation2 + $0x8] sm:$0xff] }
 0x48b   : > { %4386 = vmatmul.mubr.f32.gmra.mrb[46].mxu1 %v2987_v53  ;;  %v7759_v53 = vld [vmem:[%s7909_s4] ss:$0 sm:$0xff] }
 0x48c   : > { %4390 = vmatprep.mubr.f32.mxu1 %v7616_v48  ;;  %5637 = vmatpush3.bf16.msra.mxu1 %v8021_v55  ;;  %v2993_v48 = vld [vmem:[#allocation2 + $0x10f] sm:$0xff] }
 0x48d   : > { %v3011_v55 = vld [vmem:[#allocation2 + $0x22f] sm:$0xff] }
 0x48f   : > { %4391 = vmatmul.mubr.f32.gmra.mrb[48].mxu1 %v2988_v7 }
 0x490   : > { %4395 = vmatprep.mubr.f32.mxu1 %v7624_v21  ;;  %v2994_v21 = vld [vmem:[#allocation2 + $0x127] sm:$0xff] }
 0x493   : > { %4396 = vmatmul.mubr.f32.gmra.mrb[50].mxu1 %v2989_v9 }
 0x494   : > { %4400 = vmatprep.mubr.f32.mxu1 %v7628_v15  ;;  %v2995_v15 = vld [vmem:[#allocation2 + $0x12f] sm:$0xff] }
 0x497   : > { %4401 = vmatmul.mubr.f32.gmra.mrb[52].mxu1 %v2990_v20 }
 0x498   : > { %4405 = vmatprep.mubr.f32.mxu1 %v7636_v27  ;;  %v2996_v27 = vld [vmem:[#allocation2 + $0x147] sm:$0xff] }
 0x49b   : > { %4406 = vmatmul.mubr.f32.gmra.mrb[54].mxu1 %v2991_v62 }
 0x49c   : > { %4410 = vmatprep.mubr.f32.mxu1 %v7640_v63  ;;  %v2997_v63 = vld [vmem:[#allocation2 + $0x14f] sm:$0xff] }
 0x49f   : > { %4411 = vmatmul.mubr.f32.gmra.mrb[56].mxu1 %v2992_v40 }
 0x4a0   : > { %4415 = vmatprep.mubr.f32.mxu1 %v7648_v13  ;;  %v2998_v13 = vld [vmem:[#allocation2 + $0x167] sm:$0xff] }
 0x4a3   : > { %4416 = vmatmul.mubr.f32.gmra.mrb[58].mxu1 %v2993_v48 }
 0x4a4   : > { %4420 = vmatprep.mubr.f32.mxu1 %v7653_v44  ;;  %v2999_v44 = vld [vmem:[#allocation2 + $0x16f] sm:$0xff] }
 0x4a7   : > { %4421 = vmatmul.mubr.f32.gmra.mrb[60].mxu1 %v2994_v21 }
 0x4a8   : > { %4425 = vmatprep.mubr.f32.mxu1 %v7661_v8  ;;  %v3000_v8 = vld [vmem:[#allocation2 + $0x187] sm:$0xff] }
 0x4ab   : > { %4426 = vmatmul.mubr.f32.gmra.mrb[62].mxu1 %v2995_v15 }
 0x4ac   : > { %4430 = vmatprep.mubr.f32.mxu1 %v7665_v35  ;;  %v3001_v35 = vld [vmem:[#allocation2 + $0x18f] sm:$0xff] }
 0x4af   : > { %4431 = vmatmul.mubr.f32.gmra.mrb[64].mxu1 %v2996_v27 }
 0x4b0   : > { %4435 = vmatprep.mubr.f32.mxu1 %v7669_v12  ;;  %v3002_v12 = vld [vmem:[#allocation2 + $0x1a7] sm:$0xff] }
 0x4b3   : > { %4436 = vmatmul.mubr.f32.gmra.mrb[66].mxu1 %v2997_v63 }
 0x4b4   : > { %4440 = vmatprep.mubr.f32.mxu1 %v7673_v38  ;;  %v3003_v38 = vld [vmem:[#allocation2 + $0x1af] sm:$0xff] }
 0x4b7   : > { %4441 = vmatmul.mubr.f32.gmra.mrb[68].mxu1 %v2998_v13 }
 0x4b8   : > { %4445 = vmatprep.mubr.f32.mxu1 %v7677_v47  ;;  %v3004_v47 = vld [vmem:[#allocation2 + $0x1c7] sm:$0xff] }
 0x4bb   : > { %4446 = vmatmul.mubr.f32.gmra.mrb[70].mxu1 %v2999_v44 }
 0x4bc   : > { %4450 = vmatprep.mubr.f32.mxu1 %v7681_v42  ;;  %v3005_v42 = vld [vmem:[#allocation2 + $0x1cf] sm:$0xff] }
 0x4bf   : > { %4451 = vmatmul.mubr.f32.gmra.mrb[72].mxu1 %v3000_v8 }
 0x4c0   : > { %4455 = vmatprep.mubr.f32.mxu1 %v7685_v45  ;;  %v3006_v45 = vld [vmem:[#allocation2 + $0x1e7] sm:$0xff] }
 0x4c3   : > { %4456 = vmatmul.mubr.f32.gmra.mrb[74].mxu1 %v3001_v35 }
 0x4c4   : > { %4460 = vmatprep.mubr.f32.mxu1 %v3066_v46 }
 0x4c7   : > { %4461 = vmatmul.mubr.f32.gmra.mrb[76].mxu1 %v3002_v12 }
 0x4c8   : > { %4465 = vmatprep.mubr.f32.mxu1 %v3067_v28 }
 0x4cb   : > { %4466 = vmatmul.mubr.f32.gmra.mrb[78].mxu1 %v3003_v38 }
 0x4cc   : > { %4470 = vmatprep.mubr.f32.mxu1 %v3068_v25 }
 0x4cf   : > { %4471 = vmatmul.mubr.f32.gmra.mrb[80].mxu1 %v3004_v47 }
 0x4d0   : > { %4475 = vmatprep.mubr.f32.mxu1 %v3069_v60 }
 0x4d3   : > { %4476 = vmatmul.mubr.f32.gmra.mrb[82].mxu1 %v3005_v42 }
 0x4d4   : > { %4480 = vmatprep.mubr.f32.mxu1 %v3070_v33 }
 0x4d7   : > { %4481 = vmatmul.mubr.f32.gmra.mrb[84].mxu1 %v3006_v45 }
 0x4d8   : > { %4485 = vmatprep.mubr.f32.mxu1 %v3071_v0 }
 0x4db   : > { %4486 = vmatmul.mubr.f32.gmra.mrb[86].mxu1 %v3007_v49 }
 0x4dc   : > { %4490 = vmatprep.mubr.f32.mxu1 %v3072_v57 }
 0x4df   : > { %4491 = vmatmul.mubr.f32.gmra.mrb[88].mxu1 %v7544_v29  ;;  %v3138_v29 = vld [vmem:[#allocation2 + $0x229] sm:$0xff] }
 0x4e0   : > { %4495 = vmatprep.mubr.f32.mxu1 %v3073_v23 }
 0x4e3   : > { %4496 = vmatmul.mubr.f32.gmra.mrb[90].mxu1 %v7552_v41  ;;  %v3139_v41 = vld [vmem:[#allocation2 + $0x231] sm:$0xff] }
 0x4e4   : > { %4500 = vmatprep.mubr.f32.mxu1 %v6153_v51 }
 0x4e7   : > { %4501 = vmatmul.mubr.f32.gmra.mrb[92].mxu1 %v3010_v50 }
 0x4e8   : > { %4505 = vmatprep.mubr.f32.mxu1 %v6153_v51 }
 0x4eb   : > { %4506 = vmatmul.mubr.f32.gmra.mrb[94].mxu1 %v3011_v55 }
 0x4ec   : > { %5162 = vmatprep.mubr.f32.mxu1 %v7533_v4 }
 0x4ef   : > { %5163 = vmatmul.mubr.f32.vlgmr.msra.gmra.mrb[96].mxu1 %v7541_v11 }
 0x4f0   : > { %5165 = vmatprep.mubr.f32.mxu1 %v7547_v37 }
 0x4f3   : > { %5166 = vmatmul.mubr.f32.gmra.mrb[98].mxu1 %v7557_v22 }
 0x4f4   : > { %5168 = vmatprep.mubr.f32.mxu1 %v7700_v43 }
 0x4f7   : > { %5169 = vmatmul.mubr.f32.gmra.mrb[100].mxu1 %v7705_v1 }
 0x4f8   : > { %5171 = vmatprep.mubr.f32.mxu1 %v3138_v29 }
 0x4fb   : > { %5172 = vmatmul.mubr.f32.gmra.mrb[102].mxu1 %v3139_v41 }
 0x542   : > { %v4352_v4 = vpop.f32.mrb[32].mxu1 }
 0x543   : > { %v5670_v11 = vadd.f32 %v7759_v53, %v4352_v4  ;;  %v4354_v37 = vpop.f32.mrb[33].mxu1 }
 0x545   : > { %v4578_v22 = vadd.f32 %v5670_v11, %v7528_v59 }
 0x546   : > { %v4357_v43 = vpop.f32.mrb[34].mxu1 }
 0x547   : > { %v4736_v7 = vmax.f32 %v4578_v22, 0.0  ;;  %v5671_v1 = vadd.f32 %v7759_v53, %v4357_v43  ;;  %v4359_v9 = vpop.f32.mrb[35].mxu1 }
 0x549   : > { %4768 = vst [vmem:[%s7766_s16] sm:$0xff] %v4736_v7  ;;  %v4583_v20 = vadd.f32 %v5671_v1, %v7525_v19 }
 0x54a   : > { %v4362_v62 = vpop.f32.mrb[36].mxu1 }
 0x54b   : > { %v4737_v40 = vmax.f32 %v4583_v20, 0.0  ;;  %v5672_v48 = vadd.f32 %v7759_v53, %v4362_v62  ;;  %v4364_v21 = vpop.f32.mrb[37].mxu1 }
 0x54d   : > { %4769 = vst [vmem:[%s7766_s16 + $0x8] sm:$0xff] %v4737_v40  ;;  %v4588_v59 = vadd.f32 %v5672_v48, %v7538_v16 }
 0x54e   : > { %v4367_v15 = vpop.f32.mrb[38].mxu1 }
 0x54f   : > { %v4738_v27 = vmax.f32 %v4588_v59, 0.0  ;;  %v5673_v63 = vadd.f32 %v7759_v53, %v4367_v15  ;;  %v4369_v13 = vpop.f32.mrb[39].mxu1 }
 0x551   : > { %4770 = vst [vmem:[%s7766_s16 + $0x10] sm:$0xff] %v4738_v27  ;;  %v4593_v44 = vadd.f32 %v5673_v63, %v7535_v34 }
 0x552   : > { %v4372_v8 = vpop.f32.mrb[40].mxu1 }
 0x553   : > { %v4739_v19 = vmax.f32 %v4593_v44, 0.0  ;;  %v5674_v35 = vadd.f32 %v7759_v53, %v4372_v8  ;;  %v4374_v46 = vpop.f32.mrb[41].mxu1 }
 0x555   : > { %4771 = vst [vmem:[%s7766_s16 + $0x18] sm:$0xff] %v4739_v19  ;;  %v4598_v12 = vadd.f32 %v5674_v35, %v7554_v3 }
 0x556   : > { %v4377_v28 = vpop.f32.mrb[42].mxu1 }
 0x557   : > { %v4740_v16 = vmax.f32 %v4598_v12, 0.0  ;;  %v5675_v38 = vadd.f32 %v7759_v53, %v4377_v28  ;;  %v4379_v25 = vpop.f32.mrb[43].mxu1 }
 0x559   : > { %4772 = vst [vmem:[%s7766_s16 + $0x20] sm:$0xff] %v4740_v16  ;;  %v4603_v47 = vadd.f32 %v5675_v38, %v7549_v30 }
 0x55a   : > { %v4382_v60 = vpop.f32.mrb[44].mxu1 }
 0x55b   : > { %v4741_v34 = vmax.f32 %v4603_v47, 0.0  ;;  %v5676_v42 = vadd.f32 %v7759_v53, %v4382_v60  ;;  %v4384_v33 = vpop.f32.mrb[45].mxu1 }
 0x55d   : > { %4773 = vst [vmem:[%s7766_s16 + $0x28] sm:$0xff] %v4741_v34  ;;  %v4608_v45 = vadd.f32 %v5676_v42, %v7563_v18 }
 0x55e   : > { %v4387_v0 = vpop.f32.mrb[46].mxu1 }
 0x55f   : > { %v4742_v3 = vmax.f32 %v4608_v45, 0.0  ;;  %v5677_v49 = vadd.f32 %v7759_v53, %v4387_v0  ;;  %v4389_v57 = vpop.f32.mrb[47].mxu1 }
 0x561   : > { %4774 = vst [vmem:[%s7766_s16 + $0x30] sm:$0xff] %v4742_v3  ;;  %v4613_v23 = vadd.f32 %v5677_v49, %v7561_v14 }
 0x562   : > { %v4392_v51 = vpop.f32.mrb[48].mxu1 }
 0x563   : > { %v4743_v30 = vmax.f32 %v4613_v23, 0.0  ;;  %v5678_v50 = vadd.f32 %v7759_v53, %v4392_v51  ;;  %v4394_v55 = vpop.f32.mrb[49].mxu1 }
 0x565   : > { %4775 = vst [vmem:[%s7766_s16 + $0x38] sm:$0xff] %v4743_v30  ;;  %v4618_v29 = vadd.f32 %v5678_v50, %v7573_v56 }
 0x566   : > { %v4397_v41 = vpop.f32.mrb[50].mxu1 }
 0x567   : > { %v4744_v18 = vmax.f32 %v4618_v29, 0.0  ;;  %v5679_v4 = vadd.f32 %v7759_v53, %v4397_v41  ;;  %v4399_v11 = vpop.f32.mrb[51].mxu1 }
 0x569   : > { %4776 = vst [vmem:[%s7766_s16 + $0x40] sm:$0xff] %v4744_v18  ;;  %v4623_v37 = vadd.f32 %v5679_v4, %v7570_v2 }
 0x56a   : > { %v4402_v22 = vpop.f32.mrb[52].mxu1 }
 0x56b   : > { %v4745_v14 = vmax.f32 %v4623_v37, 0.0  ;;  %v5680_v43 = vadd.f32 %v7759_v53, %v4402_v22  ;;  %v4404_v7 = vpop.f32.mrb[53].mxu1 }
 0x56d   : > { %4777 = vst [vmem:[%s7766_s16 + $0x48] sm:$0xff] %v4745_v14  ;;  %v4628_v1 = vadd.f32 %v5680_v43, %v7585_v54 }
 0x56e   : > { %v4407_v9 = vpop.f32.mrb[54].mxu1 }
 0x56f   : > { %v4746_v56 = vmax.f32 %v4628_v1, 0.0  ;;  %v5681_v20 = vadd.f32 %v7759_v53, %v4407_v9  ;;  %v4409_v62 = vpop.f32.mrb[55].mxu1 }
 0x571   : > { %4778 = vst [vmem:[%s7766_s16 + $0x50] sm:$0xff] %v4746_v56  ;;  %v4633_v40 = vadd.f32 %v5681_v20, %v7582_v39 }
 0x572   : > { %v4412_v48 = vpop.f32.mrb[56].mxu1 }
 0x573   : > { %v4747_v2 = vmax.f32 %v4633_v40, 0.0  ;;  %v5682_v21 = vadd.f32 %v7759_v53, %v4412_v48  ;;  %v4414_v59 = vpop.f32.mrb[57].mxu1 }
 0x575   : > { %4779 = vst [vmem:[%s7766_s16 + $0x58] sm:$0xff] %v4747_v2  ;;  %v4638_v15 = vadd.f32 %v5682_v21, %v7597_v24 }
 0x576   : > { %v4417_v27 = vpop.f32.mrb[58].mxu1 }
 0x577   : > { %v4748_v54 = vmax.f32 %v4638_v15, 0.0  ;;  %v5683_v63 = vadd.f32 %v7759_v53, %v4417_v27  ;;  %v4419_v13 = vpop.f32.mrb[59].mxu1 }
 0x579   : > { %4780 = vst [vmem:[%s7766_s16 + $0x60] sm:$0xff] %v4748_v54  ;;  %v4643_v44 = vadd.f32 %v5683_v63, %v7594_v10 }
 0x57a   : > { %v4422_v8 = vpop.f32.mrb[60].mxu1 }
 0x57b   : > { %v4749_v39 = vmax.f32 %v4643_v44, 0.0  ;;  %v5684_v19 = vadd.f32 %v7759_v53, %v4422_v8  ;;  %v4424_v35 = vpop.f32.mrb[61].mxu1 }
 0x57d   : > { %4781 = vst [vmem:[%s7766_s16 + $0x68] sm:$0xff] %v4749_v39  ;;  %v4648_v46 = vadd.f32 %v5684_v19, %v7609_v5 }
 0x57e   : > { %v4427_v12 = vpop.f32.mrb[62].mxu1 }
 0x57f   : > { %v4750_v24 = vmax.f32 %v4648_v46, 0.0  ;;  %v5685_v28 = vadd.f32 %v7759_v53, %v4427_v12  ;;  %v4429_v16 = vpop.f32.mrb[63].mxu1 }
 0x581   : > { %4782 = vst [vmem:[%s7766_s16 + $0x70] sm:$0xff] %v4750_v24  ;;  %v4653_v38 = vadd.f32 %v5685_v28, %v7606_v36 }
 0x582   : > { %v4432_v25 = vpop.f32.mrb[64].mxu1 }
 0x583   : > { %v4751_v10 = vmax.f32 %v4653_v38, 0.0  ;;  %v5686_v47 = vadd.f32 %v7759_v53, %v4432_v25  ;;  %v4434_v60 = vpop.f32.mrb[65].mxu1 }
 0x585   : > { %4783 = vst [vmem:[%s7766_s16 + $0x78] sm:$0xff] %v4751_v10  ;;  %v4658_v34 = vadd.f32 %v5686_v47, %v7621_v52 }
 0x586   : > { %v4437_v42 = vpop.f32.mrb[66].mxu1 }
 0x587   : > { %v4752_v5 = vmax.f32 %v4658_v34, 0.0  ;;  %v5687_v33 = vadd.f32 %v7759_v53, %v4437_v42  ;;  %v4439_v45 = vpop.f32.mrb[67].mxu1 }
 0x589   : > { %4784 = vst [vmem:[%s7766_s16 + $0x80] sm:$0xff] %v4752_v5  ;;  %v4663_v0 = vadd.f32 %v5687_v33, %v7618_v58 }
 0x58a   : > { %v4442_v3 = vpop.f32.mrb[68].mxu1 }
 0x58b   : > { %v4753_v36 = vmax.f32 %v4663_v0, 0.0  ;;  %v5688_v49 = vadd.f32 %v7759_v53, %v4442_v3  ;;  %v4444_v57 = vpop.f32.mrb[69].mxu1 }
 0x58d   : > { %4785 = vst [vmem:[%s7766_s16 + $0x88] sm:$0xff] %v4753_v36  ;;  %v4668_v23 = vadd.f32 %v5688_v49, %v7633_v32 }
 0x58e   : > { %v4447_v51 = vpop.f32.mrb[70].mxu1 }
 0x58f   : > { %v4754_v52 = vmax.f32 %v4668_v23, 0.0  ;;  %v5689_v30 = vadd.f32 %v7759_v53, %v4447_v51  ;;  %v4449_v50 = vpop.f32.mrb[71].mxu1 }
 0x591   : > { %4786 = vst [vmem:[%s7766_s16 + $0x90] sm:$0xff] %v4754_v52  ;;  %v4673_v55 = vadd.f32 %v5689_v30, %v7630_v26 }
 0x592   : > { %v4452_v29 = vpop.f32.mrb[72].mxu1 }
 0x593   : > { %v4755_v58 = vmax.f32 %v4673_v55, 0.0  ;;  %v5690_v41 = vadd.f32 %v7759_v53, %v4452_v29  ;;  %v4454_v18 = vpop.f32.mrb[73].mxu1 }
 0x595   : > { %4787 = vst [vmem:[%s7766_s16 + $0x98] sm:$0xff] %v4755_v58  ;;  %v4678_v4 = vadd.f32 %v5690_v41, %v7645_v31 }
 0x596   : > { %v4457_v11 = vpop.f32.mrb[74].mxu1 }
 0x597   : > { %v4756_v32 = vmax.f32 %v4678_v4, 0.0  ;;  %v5691_v37 = vadd.f32 %v7759_v53, %v4457_v11  ;;  %v4459_v22 = vpop.f32.mrb[75].mxu1 }
 0x599   : > { %4788 = vst [vmem:[%s7766_s16 + $0xa0] sm:$0xff] %v4756_v32  ;;  %v4683_v14 = vadd.f32 %v5691_v37, %v7642_v61 }
 0x59a   : > { %v4462_v26 = vpop.f32.mrb[76].mxu1 }
 0x59b   : > { %v4757_v43 = vmax.f32 %v4683_v14, 0.0  ;;  %v5692_v7 = vadd.f32 %v7759_v53, %v4462_v26  ;;  %v4464_v1 = vpop.f32.mrb[77].mxu1 }
 0x59d   : > { %4789 = vst [vmem:[%s7766_s16 + $0xa8] sm:$0xff] %v4757_v43  ;;  %v4688_v9 = vadd.f32 %v5692_v7, %v7658_v6 }
 0x59e   : > { %v4467_v56 = vpop.f32.mrb[78].mxu1 }
 0x59f   : > { %v4758_v31 = vmax.f32 %v4688_v9, 0.0  ;;  %v5693_v20 = vadd.f32 %v7759_v53, %v4467_v56  ;;  %v4469_v62 = vpop.f32.mrb[79].mxu1 }
 0x5a1   : > { %4790 = vst [vmem:[%s7766_s16 + $0xb0] sm:$0xff] %v4758_v31  ;;  %v4693_v40 = vadd.f32 %v5693_v20, %v7655_v17 }
 0x5a2   : > { %v4472_v48 = vpop.f32.mrb[80].mxu1 }
 0x5a3   : > { %v4759_v2 = vmax.f32 %v4693_v40, 0.0  ;;  %v4474_v61 = vpop.f32.mrb[81].mxu1  ;;  %v5694_v12 = vadd.f32 %v7759_v53, %v4472_v48 }
 0x5a5   : > { %4791 = vst [vmem:[%s7766_s16 + $0xb8] sm:$0xff] %v4759_v2 }
 0x5a6   : > { %v4477_v21 = vpop.f32.mrb[82].mxu1 }
 0x5a7   : > { %v4479_v59 = vpop.f32.mrb[83].mxu1  ;;  %v5695_v46 = vadd.f32 %v7759_v53, %v4477_v21 }
 0x5aa   : > { %v4482_v15 = vpop.f32.mrb[84].mxu1 }
 0x5ab   : > { %v4484_v27 = vpop.f32.mrb[85].mxu1  ;;  %v5696_v47 = vadd.f32 %v7759_v53, %v4482_v15 }
 0x5ae   : > { %v4487_v54 = vpop.f32.mrb[86].mxu1 }
 0x5af   : > { %v4489_v63 = vpop.f32.mrb[87].mxu1  ;;  %v5697_v25 = vadd.f32 %v7759_v53, %v4487_v54 }
 0x5b2   : > { %v4492_v13 = vpop.f32.mrb[88].mxu1 }
 0x5b3   : > { %v4494_v6 = vpop.f32.mrb[89].mxu1  ;;  %v5698_v3 = vadd.f32 %v7759_v53, %v4492_v13 }
 0x5b6   : > { %v4497_v44 = vpop.f32.mrb[90].mxu1 }
 0x5b7   : > { %v4499_v8 = vpop.f32.mrb[91].mxu1  ;;  %v5699_v45 = vadd.f32 %v7759_v53, %v4497_v44 }
 0x5ba   : > { %v4502_v39 = vpop.f32.mrb[92].mxu1 }
 0x5bb   : > { %v4504_v19 = vpop.f32.mrb[93].mxu1  ;;  %v5700_v50 = vadd.f32 %v7759_v53, %v4502_v39 }
 0x5be   : > { %v4507_v35 = vpop.f32.mrb[94].mxu1 }
 0x5bf   : > { %v4509_v17 = vpop.f32.mrb[95].mxu1  ;;  %v5701_v52 = vadd.f32 %v7759_v53, %v4507_v35 }
 0x5c2   : > { %v5164_v24 = vpop.f32.mrb[96].mxu1 }
 0x5c3   : > { %v4703_v28 = vadd.f32 %v5695_v46, %v5164_v24  ;;  %v4697_v16 = vpop.f32.mrb[97].mxu1 }
 0x5c4   : > { %v4698_v38 = vadd.f32 %v5694_v12, %v4697_v16 }
 0x5c5   : > { %v4761_v10 = vmax.f32 %v4703_v28, 0.0 }
 0x5c6   : > { %v4760_v60 = vmax.f32 %v4698_v38, 0.0  ;;  %v5167_v34 = vpop.f32.mrb[98].mxu1 }
 0x5c7   : > { %4793 = vst [vmem:[%s7766_s16 + $0xc8] sm:$0xff] %v4761_v10  ;;  %v4713_v42 = vadd.f32 %v5697_v25, %v5167_v34  ;;  %v4707_v5 = vpop.f32.mrb[99].mxu1 }
 0x5c8   : > { %4792 = vst [vmem:[%s7766_s16 + $0xc0] sm:$0xff] %v4760_v60  ;;  %v4708_v33 = vadd.f32 %v5696_v47, %v4707_v5 }
 0x5c9   : > { %v4763_v0 = vmax.f32 %v4713_v42, 0.0 }
 0x5ca   : > { %v4762_v36 = vmax.f32 %v4708_v33, 0.0  ;;  %v5170_v49 = vpop.f32.mrb[100].mxu1 }
 0x5cb   : > { %4795 = vst [vmem:[%s7766_s16 + $0xd8] sm:$0xff] %v4763_v0  ;;  %v4723_v57 = vadd.f32 %v5699_v45, %v5170_v49  ;;  %v4717_v23 = vpop.f32.mrb[101].mxu1 }
 0x5cc   : > { %4794 = vst [vmem:[%s7766_s16 + $0xd0] sm:$0xff] %v4762_v36  ;;  %v4718_v51 = vadd.f32 %v5698_v3, %v4717_v23 }
 0x5cd   : > { %v4765_v30 = vmax.f32 %v4723_v57, 0.0 }
 0x5ce   : > { %v4764_v55 = vmax.f32 %v4718_v51, 0.0  ;;  %v5173_v29 = vpop.f32.mrb[102].mxu1 }
 0x5cf   : > { %4797 = vst [vmem:[%s7766_s16 + $0xe8] sm:$0xff] %v4765_v30  ;;  %v4733_v58 = vadd.f32 %v5701_v52, %v5173_v29  ;;  %v4727_v41 = vpop.f32.mrb[103].mxu1 }
 0x5d0   : > { %4796 = vst [vmem:[%s7766_s16 + $0xe0] sm:$0xff] %v4764_v55  ;;  %v4728_v18 = vadd.f32 %v5700_v50, %v4727_v41 }
 0x5d1   : > { %v4767_v4 = vmax.f32 %v4733_v58, 0.0 }
 0x5d2   : > { %v4766_v53 = vmax.f32 %v4728_v18, 0.0 }
 0x5d3   : > { %4799 = vst [vmem:[%s7766_s16 + $0xf8] sm:$0xff] %v4767_v4 }
 0x5d4   : > { %4798 = vst [vmem:[%s7766_s16 + $0xf0] sm:$0xff] %v4766_v53 }
 0x5d5   : > { %6223 = shalt.err (!%p6220_p11)
}
 0x5d6   : > { %s6224_s9 = scalar_lea.hbm %s7856_s30, 4096  ;;  %s6228_s13 = scalar_lea.hbm %s7910_s5, 8192 }
 0x5d7   : > { %p6225_p13 = scmp.ne.s32.totalorder %s7856_s30, %s6224_s9  ;;  %p6229_p6 = scmp.lt.u32.totalorder %s7856_s30, %s7910_s5 }
 0x5d8   : > { %p6230_p9 = scmp.lt.u32.totalorder %s6228_s13, %s6224_s9  ;;  %p6232_p10 = scmp.lt.u32.totalorder %s6224_s9, %s7856_s30 }
 0x5d9   : > { %p6226_p5 = pnand %p6225_p13, %p8022_p1 }
 0x5da   : > { %p6231_p12 = por %p6230_p9, %p6229_p6 }
 0x5db   : > { %p6227_p0 = pneg %p6226_p5 }
 0x5dc   : > { %p6233_p2 = por %p6232_p10, %p6231_p12 }
 0x5de   : > { %p6234_p3 = pnand %p6233_p2, %p6227_p0 }
 0x5e0   : > { %6237 = shalt.err (!%p6234_p3)
}
 0x5e1   : > { %s6289_s16 = smov 128   ;;  %s6290_s17 = smov 8  }
 0x5e2   : > { %6094 = dma.vmem_to_hbm [thread:$0]  (%p8022_p1), %s7858_s7, 4096, %s7856_s30, %s7864_s22, %s6289_s16, %s6289_s16, %s6290_s17  }
 0x5e3 PF: > { %p6111_p4 = scmp.ge.s32.totalorder %s6280_s21, 2  ;;  %s4829_s23 = sand.u32 1, %s6268_s18  }
 0x5e4   : > { %p8023_p7 = scmp.ne.s32.totalorder %s7957_s29, 0  ;;  %s4830_s6 = scalar_lea.sflag [#allocation6], %s4829_s23 }
 0x5e6   : > { %p6104_p8 = pnand %p6111_p4, %p8023_p7 }
 0x5e8   : > { %6263 = dma.done.wait (!%p6104_p8), %s4830_s6, 4096  }
 0x5e9   : > { %6265 = vsyncadd (!%p6104_p8), %s4830_s6, 4294963200  ;;  %p17_p11 = scmp.ge.s32.totalorder %s6346_s24, 4   ;;  %s8024_s18 = smov %s6272_s19 }
 0x5ea   : > { %s8025_s19 = smov %s6276_s20  ;;  %s8026_s20 = smov %s6357_s27 }
 0x5eb   : > { %s8027_s21 = smov %s6346_s24  ;;  %19 = sbr.rel (!%p17_p11) target bundleno = 5 (0x5), region = 86 }
 0x5f2   :  { %4835 = vsyncpa [#allocation5], 1 }
 0x5f3   :  { %4837 = vsyncpa [#allocation5 + $0x1], 1 }
 0x5f4   :  { %4838 = vsyncpa [#allocation8], 1 }
 0x5f5   :  { %4839 = vsyncpa [#allocation6], 1 }
 0x5f6   :  { %4841 = vsyncpa [#allocation6 + $0x1], 1 }

</bundles_post_ra>
